<compile_context>
chip_gen: v7x
topology: tpu7x:2x2x1
jax: 0.10.0
libtpu: 0.0.40
codegen_flags: <defaults>
</compile_context>

<pallas_src>
import jax
import jax.numpy as jnp
from jax.experimental import pallas as pl
from jax.experimental.pallas import tpu as pltpu


def _round_up(x, m):
    return (x + m - 1) // m * m


def _make_lstm_kernel(L, T, BP, HP):
    GP = 4 * HP

    def kernel(*refs):
        x_ref = refs[0]                                             # (T*BP, 1)
        w_ih0 = refs[1][...]                                        # (1, GP)
        w_hh0 = refs[2][...]                                        # (HP, GP)
        b0 = refs[3][...]                                           # (1, GP)
        w_cat = [refs[4 + 2 * (l - 1)][...] for l in range(1, L)]   # (2HP, GP)
        b_up = [refs[5 + 2 * (l - 1)][...] for l in range(1, L)]    # (1, GP)
        fc_w = refs[4 + 2 * (L - 1)][...]                           # (HP, NP)
        fc_b = refs[5 + 2 * (L - 1)][...]                           # (1, NP)
        out_ref = refs[6 + 2 * (L - 1)]                             # (BP, NP)

        # Layer-0 input projection (+ fused bias): a single hoisted VPU
        # broadcast pass over all timesteps, off the recurrent chain.
        x_proj = x_ref[...] * w_ih0 + b0                            # (T*BP, GP)

        # Hoist bias broadcasts out of the loop (JAX does not CSE broadcasts).
        b_up_b = [jnp.broadcast_to(b, (BP, GP)) for b in b_up]

        def cell(gates, c):
            # HP == 128 -> every gate slice lands on a vreg boundary.
            i = jax.nn.sigmoid(gates[:, 0 * HP:1 * HP])
            f = jax.nn.sigmoid(gates[:, 1 * HP:2 * HP])
            g = jnp.tanh(gates[:, 2 * HP:3 * HP])
            o = jax.nn.sigmoid(gates[:, 3 * HP:4 * HP])
            c_new = f * c + i * g
            h_new = o * jnp.tanh(c_new)
            return h_new, c_new

        h = [jnp.zeros((BP, HP), jnp.float32) for _ in range(L)]
        c = [jnp.zeros((BP, HP), jnp.float32) for _ in range(L)]

        # Fully unrolled recurrence (T and L are small static constants): the
        # scheduler sees every cell, so independent cells of adjacent timesteps
        # (layer wavefront) interleave on MXU/EUP/VPU without restructuring.
        for t in range(T):
            # x_proj rows are BP-aligned (BP is a multiple of 8 sublanes).
            gates0 = x_proj[t * BP:(t + 1) * BP, :] + jnp.dot(
                h[0], w_hh0, preferred_element_type=jnp.float32)
            h[0], c[0] = cell(gates0, c[0])
            for l in range(1, L):
                # One fused MXU op per upper-layer cell: [h_{l-1}(t), h_l(t-1)]
                # against the stacked [w_ih; w_hh] weight.  Both halves are
                # full 128-lane tiles, so the concat is tile-aligned.
                inp = jnp.concatenate([h[l - 1], h[l]], axis=1)     # (BP, 2HP)
                gates = jnp.dot(inp, w_cat[l - 1],
                                preferred_element_type=jnp.float32) + b_up_b[l - 1]
                h[l], c[l] = cell(gates, c[l])

        # fc(out[:, -1, :]) -> padded (BP, NP); lane-dense unmasked store.
        out_ref[...] = jnp.dot(h[L - 1], fc_w,
                               preferred_element_type=jnp.float32) + fc_b

    return kernel


def _pad_gate_cols(w, H, HP):
    """(rows, 4H) -> (rows, 4*HP): gate k's H columns placed at offset k*HP."""
    rows = w.shape[0]
    out = jnp.zeros((rows, 4 * HP), jnp.float32)
    for k in range(4):
        out = out.at[:, k * HP:k * HP + H].set(w[:, k * H:(k + 1) * H])
    return out


def _pad_rows(w, HP):
    """(rows, cols) -> (HP, cols), zero-padded rows."""
    rows, cols = w.shape
    return jnp.zeros((HP, cols), jnp.float32).at[:rows, :].set(w)


def lstm_classifier_forward(x, params):
    """x: (B, T, 1) float32 (batch_first, like PyTorch).  Returns (B, 3)."""
    B, T, _ = x.shape
    L = len(params["w_ih"])
    H = params["w_hh"][0].shape[1]
    HP = _round_up(max(H, 128), 128)     # padded hidden (lanes per gate)
    NP = 128                             # padded FC output lanes
    BP = _round_up(max(B, 8), 8)         # padded batch (sublanes)

    # Time-major, batch-padded input, flattened to 2D for aligned static slices.
    x_tm = jnp.transpose(x, (1, 0, 2)).astype(jnp.float32)          # (T, B, 1)
    x_tm = jnp.pad(x_tm, ((0, 0), (0, BP - B), (0, 0)))             # (T, BP, 1)
    x2 = x_tm.reshape(T * BP, 1)

    f32 = lambda a: jnp.asarray(a, jnp.float32)

    # Layer 0.
    w_ih0 = _pad_gate_cols(f32(params["w_ih"][0]).T, H, HP)                  # (1, 4HP)
    w_hh0 = _pad_rows(_pad_gate_cols(f32(params["w_hh"][0]).T, H, HP), HP)   # (HP, 4HP)
    b0 = _pad_gate_cols((f32(params["b_ih"][0]) + f32(params["b_hh"][0]))
                        .reshape(1, 4 * H), H, HP)                           # (1, 4HP)
    inputs = [x2, w_ih0, w_hh0, b0]

    # Layers 1..L-1: stacked [w_ih; w_hh] -> single fused matmul per cell.
    for l in range(1, L):
        w_ih = _pad_rows(_pad_gate_cols(f32(params["w_ih"][l]).T, H, HP), HP)
        w_hh = _pad_rows(_pad_gate_cols(f32(params["w_hh"][l]).T, H, HP), HP)
        w_cat = jnp.concatenate([w_ih, w_hh], axis=0)                        # (2HP, 4HP)
        b = _pad_gate_cols((f32(params["b_ih"][l]) + f32(params["b_hh"][l]))
                           .reshape(1, 4 * H), H, HP)
        inputs += [w_cat, b]

    # FC head, padded to 128 output lanes (lane-dense final store).
    fc_w = jnp.zeros((HP, NP), jnp.float32).at[:H, :3].set(f32(params["fc_w"]).T)
    fc_b = jnp.zeros((1, NP), jnp.float32).at[0, :3].set(f32(params["fc_b"]))
    inputs += [fc_w, fc_b]

    vmem = pltpu.MemorySpace.VMEM
    kernel = _make_lstm_kernel(L, T, BP, HP)
    out_pad = pl.pallas_call(
        kernel,
        out_shape=jax.ShapeDtypeStruct((BP, NP), jnp.float32),
        in_specs=[pl.BlockSpec(memory_space=vmem) for _ in inputs],
        out_specs=pl.BlockSpec(memory_space=vmem),
    )(*inputs)
    return out_pad[:B, :3]


def _reference_forward(x, params):
    """Pure-JAX reference matching PyTorch nn.LSTM semantics."""
    B, T, _ = x.shape
    L = len(params["w_ih"])
    H = params["w_hh"][0].shape[1]
    h = [jnp.zeros((B, H), jnp.float32) for _ in range(L)]
    c = [jnp.zeros((B, H), jnp.float32) for _ in range(L)]
    for t in range(T):
        inp = x[:, t, :]
        for l in range(L):
            gates = (inp @ params["w_ih"][l].T + h[l] @ params["w_hh"][l].T
                     + params["b_ih"][l] + params["b_hh"][l])
            i = jax.nn.sigmoid(gates[:, 0 * H:1 * H])
            f = jax.nn.sigmoid(gates[:, 1 * H:2 * H])
            g = jnp.tanh(gates[:, 2 * H:3 * H])
            o = jax.nn.sigmoid(gates[:, 3 * H:4 * H])
            c[l] = f * c[l] + i * g
            h[l] = o * jnp.tanh(c[l])
            inp = h[l]
    return h[L - 1] @ params["fc_w"].T + params["fc_b"]


def init_params(key, num_layers, hidden_size):
    """Deterministic init mirroring nn.LSTM / nn.Linear shapes (uniform(-1/sqrt(H), 1/sqrt(H)))."""
    H = hidden_size
    k = 1.0 / jnp.sqrt(jnp.float32(H))
    params = {"w_ih": [], "w_hh": [], "b_ih": [], "b_hh": []}
    for l in range(num_layers):
        in_l = 1 if l == 0 else H
        key, k1, k2, k3, k4 = jax.random.split(key, 5)
        params["w_ih"].append(jax.random.uniform(k1, (4 * H, in_l), jnp.float32, -k, k))
        params["w_hh"].append(jax.random.uniform(k2, (4 * H, H), jnp.float32, -k, k))
        params["b_ih"].append(jax.random.uniform(k3, (4 * H,), jnp.float32, -k, k))
        params["b_hh"].append(jax.random.uniform(k4, (4 * H,), jnp.float32, -k, k))
    key, k5, k6 = jax.random.split(key, 3)
    kf = 1.0 / jnp.sqrt(jnp.float32(H))
    params["fc_w"] = jax.random.uniform(k5, (3, H), jnp.float32, -kf, kf)
    params["fc_b"] = jax.random.uniform(k6, (3,), jnp.float32, -kf, kf)
    return params


if __name__ == "__main__":
    B, T, H, L = 2, 8, 32, 2   # batch, seq_len, hidden_size, num_layers

    key = jax.random.PRNGKey(0)
    key, xkey, pkey = jax.random.split(key, 3)
    x = jax.random.normal(xkey, (B, T, 1), jnp.float32)   # PyTorch-style (batch, seq, input=1)
    params = init_params(pkey, L, H)

    out = lstm_classifier_forward(x, params)
    out = jax.block_until_ready(out)

    ref = _reference_forward(x, params)
    assert out.shape == (B, 3), out.shape
    assert jnp.allclose(out, ref, atol=2e-3, rtol=2e-3), (out, ref)

    print("KERNEL_OK")
</pallas_src>

<mosaic_0001>
module attributes {stable_mosaic.version = 11 : i64} {
  func.func @kernel(%arg0: memref<64x1xf32, #tpu.memory_space<vmem>>, %arg1: memref<1x512xf32, #tpu.memory_space<vmem>>, %arg2: memref<128x512xf32, #tpu.memory_space<vmem>>, %arg3: memref<1x512xf32, #tpu.memory_space<vmem>>, %arg4: memref<256x512xf32, #tpu.memory_space<vmem>>, %arg5: memref<1x512xf32, #tpu.memory_space<vmem>>, %arg6: memref<128x128xf32, #tpu.memory_space<vmem>>, %arg7: memref<1x128xf32, #tpu.memory_space<vmem>>, %arg8: memref<8x128xf32, #tpu.memory_space<vmem>>) attributes {dimension_semantics = [], scalar_prefetch = 0 : i64, scratch_operands = 0 : i64, tpu.core_type = #tpu.core_type<tc>} {
    %c0 = arith.constant 0 : index
    %c0_0 = arith.constant 0 : index
    %0 = vector.load %arg1[%c0, %c0_0] : memref<1x512xf32, #tpu.memory_space<vmem>>, vector<1x512xf32>
    %c0_1 = arith.constant 0 : index
    %c0_2 = arith.constant 0 : index
    %1 = vector.load %arg2[%c0_1, %c0_2] : memref<128x512xf32, #tpu.memory_space<vmem>>, vector<128x512xf32>
    %c0_3 = arith.constant 0 : index
    %c0_4 = arith.constant 0 : index
    %2 = vector.load %arg3[%c0_3, %c0_4] : memref<1x512xf32, #tpu.memory_space<vmem>>, vector<1x512xf32>
    %c0_5 = arith.constant 0 : index
    %c0_6 = arith.constant 0 : index
    %3 = vector.load %arg4[%c0_5, %c0_6] : memref<256x512xf32, #tpu.memory_space<vmem>>, vector<256x512xf32>
    %c0_7 = arith.constant 0 : index
    %c0_8 = arith.constant 0 : index
    %4 = vector.load %arg5[%c0_7, %c0_8] : memref<1x512xf32, #tpu.memory_space<vmem>>, vector<1x512xf32>
    %c0_9 = arith.constant 0 : index
    %c0_10 = arith.constant 0 : index
    %5 = vector.load %arg6[%c0_9, %c0_10] : memref<128x128xf32, #tpu.memory_space<vmem>>, vector<128x128xf32>
    %c0_11 = arith.constant 0 : index
    %c0_12 = arith.constant 0 : index
    %6 = vector.load %arg7[%c0_11, %c0_12] : memref<1x128xf32, #tpu.memory_space<vmem>>, vector<1x128xf32>
    %c0_13 = arith.constant 0 : index
    %c0_14 = arith.constant 0 : index
    %7 = vector.load %arg0[%c0_13, %c0_14] : memref<64x1xf32, #tpu.memory_space<vmem>>, vector<64x1xf32>
    %8 = vector.broadcast %7 : vector<64x1xf32> to vector<64x512xf32>
    %9 = vector.broadcast %0 : vector<1x512xf32> to vector<64x512xf32>
    %10 = arith.mulf %8, %9 : vector<64x512xf32>
    %11 = vector.broadcast %2 : vector<1x512xf32> to vector<64x512xf32>
    %12 = arith.addf %10, %11 : vector<64x512xf32>
    %13 = vector.shape_cast %4 : vector<1x512xf32> to vector<1x512xf32>
    %14 = vector.broadcast %13 : vector<1x512xf32> to vector<8x512xf32>
    %cst = arith.constant 0.000000e+00 : f32
    %15 = vector.broadcast %cst : f32 to vector<8x128xf32>
    %cst_15 = arith.constant 0.000000e+00 : f32
    %16 = vector.broadcast %cst_15 : f32 to vector<8x128xf32>
    %cst_16 = arith.constant 0.000000e+00 : f32
    %17 = vector.broadcast %cst_16 : f32 to vector<8x128xf32>
    %cst_17 = arith.constant 0.000000e+00 : f32
    %18 = vector.broadcast %cst_17 : f32 to vector<8x128xf32>
    %19 = vector.extract_strided_slice %12 {offsets = [0, 0], sizes = [8, 512], strides = [1, 1]} : vector<64x512xf32> to vector<8x512xf32>
    %cst_18 = arith.constant dense<0.000000e+00> : vector<8x512xf32>
    %20 = tpu.matmul %15, %1, %cst_18 {dimension_numbers = #tpu.dot_dimension_numbers<[1], [0], [0], [1], [0, 0, 1, 1], [], []>} : vector<8x128xf32>, vector<128x512xf32>, vector<8x512xf32> -> vector<8x512xf32>
    %21 = arith.addf %19, %20 : vector<8x512xf32>
    %22 = vector.extract_strided_slice %21 {offsets = [0, 0], sizes = [8, 128], strides = [1, 1]} : vector<8x512xf32> to vector<8x128xf32>
    %23 = arith.negf %22 : vector<8x128xf32>
    %24 = math.exp %23 : vector<8x128xf32>
    %cst_19 = arith.constant 1.000000e+00 : f32
    %25 = vector.broadcast %cst_19 : f32 to vector<8x128xf32>
    %26 = arith.addf %25, %24 : vector<8x128xf32>
    %27 = arith.divf %25, %26 : vector<8x128xf32>
    %28 = vector.extract_strided_slice %21 {offsets = [0, 128], sizes = [8, 128], strides = [1, 1]} : vector<8x512xf32> to vector<8x128xf32>
    %29 = arith.negf %28 : vector<8x128xf32>
    %30 = math.exp %29 : vector<8x128xf32>
    %cst_20 = arith.constant 1.000000e+00 : f32
    %31 = vector.broadcast %cst_20 : f32 to vector<8x128xf32>
    %32 = arith.addf %31, %30 : vector<8x128xf32>
    %33 = arith.divf %31, %32 : vector<8x128xf32>
    %34 = vector.extract_strided_slice %21 {offsets = [0, 256], sizes = [8, 128], strides = [1, 1]} : vector<8x512xf32> to vector<8x128xf32>
    %35 = math.tanh %34 : vector<8x128xf32>
    %36 = vector.extract_strided_slice %21 {offsets = [0, 384], sizes = [8, 128], strides = [1, 1]} : vector<8x512xf32> to vector<8x128xf32>
    %37 = arith.negf %36 : vector<8x128xf32>
    %38 = math.exp %37 : vector<8x128xf32>
    %cst_21 = arith.constant 1.000000e+00 : f32
    %39 = vector.broadcast %cst_21 : f32 to vector<8x128xf32>
    %40 = arith.addf %39, %38 : vector<8x128xf32>
    %41 = arith.divf %39, %40 : vector<8x128xf32>
    %42 = arith.mulf %33, %17 : vector<8x128xf32>
    %43 = arith.mulf %27, %35 : vector<8x128xf32>
    %44 = arith.addf %42, %43 : vector<8x128xf32>
    %45 = math.tanh %44 : vector<8x128xf32>
    %46 = arith.mulf %41, %45 : vector<8x128xf32>
    %47 = tpu.concatenate %46, %16 in 1 : vector<8x128xf32>, vector<8x128xf32> -> vector<8x256xf32>
    %cst_22 = arith.constant dense<0.000000e+00> : vector<8x512xf32>
    %48 = tpu.matmul %47, %3, %cst_22 {dimension_numbers = #tpu.dot_dimension_numbers<[1], [0], [0], [1], [0, 0, 1, 1], [], []>} : vector<8x256xf32>, vector<256x512xf32>, vector<8x512xf32> -> vector<8x512xf32>
    %49 = arith.addf %48, %14 : vector<8x512xf32>
    %50 = vector.extract_strided_slice %49 {offsets = [0, 0], sizes = [8, 128], strides = [1, 1]} : vector<8x512xf32> to vector<8x128xf32>
    %51 = arith.negf %50 : vector<8x128xf32>
    %52 = math.exp %51 : vector<8x128xf32>
    %cst_23 = arith.constant 1.000000e+00 : f32
    %53 = vector.broadcast %cst_23 : f32 to vector<8x128xf32>
    %54 = arith.addf %53, %52 : vector<8x128xf32>
    %55 = arith.divf %53, %54 : vector<8x128xf32>
    %56 = vector.extract_strided_slice %49 {offsets = [0, 128], sizes = [8, 128], strides = [1, 1]} : vector<8x512xf32> to vector<8x128xf32>
    %57 = arith.negf %56 : vector<8x128xf32>
    %58 = math.exp %57 : vector<8x128xf32>
    %cst_24 = arith.constant 1.000000e+00 : f32
    %59 = vector.broadcast %cst_24 : f32 to vector<8x128xf32>
    %60 = arith.addf %59, %58 : vector<8x128xf32>
    %61 = arith.divf %59, %60 : vector<8x128xf32>
    %62 = vector.extract_strided_slice %49 {offsets = [0, 256], sizes = [8, 128], strides = [1, 1]} : vector<8x512xf32> to vector<8x128xf32>
    %63 = math.tanh %62 : vector<8x128xf32>
    %64 = vector.extract_strided_slice %49 {offsets = [0, 384], sizes = [8, 128], strides = [1, 1]} : vector<8x512xf32> to vector<8x128xf32>
    %65 = arith.negf %64 : vector<8x128xf32>
    %66 = math.exp %65 : vector<8x128xf32>
    %cst_25 = arith.constant 1.000000e+00 : f32
    %67 = vector.broadcast %cst_25 : f32 to vector<8x128xf32>
    %68 = arith.addf %67, %66 : vector<8x128xf32>
    %69 = arith.divf %67, %68 : vector<8x128xf32>
    %70 = arith.mulf %61, %18 : vector<8x128xf32>
    %71 = arith.mulf %55, %63 : vector<8x128xf32>
    %72 = arith.addf %70, %71 : vector<8x128xf32>
    %73 = math.tanh %72 : vector<8x128xf32>
    %74 = arith.mulf %69, %73 : vector<8x128xf32>
    %75 = vector.extract_strided_slice %12 {offsets = [8, 0], sizes = [8, 512], strides = [1, 1]} : vector<64x512xf32> to vector<8x512xf32>
    %cst_26 = arith.constant dense<0.000000e+00> : vector<8x512xf32>
    %76 = tpu.matmul %46, %1, %cst_26 {dimension_numbers = #tpu.dot_dimension_numbers<[1], [0], [0], [1], [0, 0, 1, 1], [], []>} : vector<8x128xf32>, vector<128x512xf32>, vector<8x512xf32> -> vector<8x512xf32>
    %77 = arith.addf %75, %76 : vector<8x512xf32>
    %78 = vector.extract_strided_slice %77 {offsets = [0, 0], sizes = [8, 128], strides = [1, 1]} : vector<8x512xf32> to vector<8x128xf32>
    %79 = arith.negf %78 : vector<8x128xf32>
    %80 = math.exp %79 : vector<8x128xf32>
    %cst_27 = arith.constant 1.000000e+00 : f32
    %81 = vector.broadcast %cst_27 : f32 to vector<8x128xf32>
    %82 = arith.addf %81, %80 : vector<8x128xf32>
    %83 = arith.divf %81, %82 : vector<8x128xf32>
    %84 = vector.extract_strided_slice %77 {offsets = [0, 128], sizes = [8, 128], strides = [1, 1]} : vector<8x512xf32> to vector<8x128xf32>
    %85 = arith.negf %84 : vector<8x128xf32>
    %86 = math.exp %85 : vector<8x128xf32>
    %cst_28 = arith.constant 1.000000e+00 : f32
    %87 = vector.broadcast %cst_28 : f32 to vector<8x128xf32>
    %88 = arith.addf %87, %86 : vector<8x128xf32>
    %89 = arith.divf %87, %88 : vector<8x128xf32>
    %90 = vector.extract_strided_slice %77 {offsets = [0, 256], sizes = [8, 128], strides = [1, 1]} : vector<8x512xf32> to vector<8x128xf32>
    %91 = math.tanh %90 : vector<8x128xf32>
    %92 = vector.extract_strided_slice %77 {offsets = [0, 384], sizes = [8, 128], strides = [1, 1]} : vector<8x512xf32> to vector<8x128xf32>
    %93 = arith.negf %92 : vector<8x128xf32>
    %94 = math.exp %93 : vector<8x128xf32>
    %cst_29 = arith.constant 1.000000e+00 : f32
    %95 = vector.broadcast %cst_29 : f32 to vector<8x128xf32>
    %96 = arith.addf %95, %94 : vector<8x128xf32>
    %97 = arith.divf %95, %96 : vector<8x128xf32>
    %98 = arith.mulf %89, %44 : vector<8x128xf32>
    %99 = arith.mulf %83, %91 : vector<8x128xf32>
    %100 = arith.addf %98, %99 : vector<8x128xf32>
    %101 = math.tanh %100 : vector<8x128xf32>
    %102 = arith.mulf %97, %101 : vector<8x128xf32>
    %103 = tpu.concatenate %102, %74 in 1 : vector<8x128xf32>, vector<8x128xf32> -> vector<8x256xf32>
    %cst_30 = arith.constant dense<0.000000e+00> : vector<8x512xf32>
    %104 = tpu.matmul %103, %3, %cst_30 {dimension_numbers = #tpu.dot_dimension_numbers<[1], [0], [0], [1], [0, 0, 1, 1], [], []>} : vector<8x256xf32>, vector<256x512xf32>, vector<8x512xf32> -> vector<8x512xf32>
    %105 = arith.addf %104, %14 : vector<8x512xf32>
    %106 = vector.extract_strided_slice %105 {offsets = [0, 0], sizes = [8, 128], strides = [1, 1]} : vector<8x512xf32> to vector<8x128xf32>
    %107 = arith.negf %106 : vector<8x128xf32>
    %108 = math.exp %107 : vector<8x128xf32>
    %cst_31 = arith.constant 1.000000e+00 : f32
    %109 = vector.broadcast %cst_31 : f32 to vector<8x128xf32>
    %110 = arith.addf %109, %108 : vector<8x128xf32>
    %111 = arith.divf %109, %110 : vector<8x128xf32>
    %112 = vector.extract_strided_slice %105 {offsets = [0, 128], sizes = [8, 128], strides = [1, 1]} : vector<8x512xf32> to vector<8x128xf32>
    %113 = arith.negf %112 : vector<8x128xf32>
    %114 = math.exp %113 : vector<8x128xf32>
    %cst_32 = arith.constant 1.000000e+00 : f32
    %115 = vector.broadcast %cst_32 : f32 to vector<8x128xf32>
    %116 = arith.addf %115, %114 : vector<8x128xf32>
    %117 = arith.divf %115, %116 : vector<8x128xf32>
    %118 = vector.extract_strided_slice %105 {offsets = [0, 256], sizes = [8, 128], strides = [1, 1]} : vector<8x512xf32> to vector<8x128xf32>
    %119 = math.tanh %118 : vector<8x128xf32>
    %120 = vector.extract_strided_slice %105 {offsets = [0, 384], sizes = [8, 128], strides = [1, 1]} : vector<8x512xf32> to vector<8x128xf32>
    %121 = arith.negf %120 : vector<8x128xf32>
    %122 = math.exp %121 : vector<8x128xf32>
    %cst_33 = arith.constant 1.000000e+00 : f32
    %123 = vector.broadcast %cst_33 : f32 to vector<8x128xf32>
    %124 = arith.addf %123, %122 : vector<8x128xf32>
    %125 = arith.divf %123, %124 : vector<8x128xf32>
    %126 = arith.mulf %117, %72 : vector<8x128xf32>
    %127 = arith.mulf %111, %119 : vector<8x128xf32>
    %128 = arith.addf %126, %127 : vector<8x128xf32>
    %129 = math.tanh %128 : vector<8x128xf32>
    %130 = arith.mulf %125, %129 : vector<8x128xf32>
    %131 = vector.extract_strided_slice %12 {offsets = [16, 0], sizes = [8, 512], strides = [1, 1]} : vector<64x512xf32> to vector<8x512xf32>
    %cst_34 = arith.constant dense<0.000000e+00> : vector<8x512xf32>
    %132 = tpu.matmul %102, %1, %cst_34 {dimension_numbers = #tpu.dot_dimension_numbers<[1], [0], [0], [1], [0, 0, 1, 1], [], []>} : vector<8x128xf32>, vector<128x512xf32>, vector<8x512xf32> -> vector<8x512xf32>
    %133 = arith.addf %131, %132 : vector<8x512xf32>
    %134 = vector.extract_strided_slice %133 {offsets = [0, 0], sizes = [8, 128], strides = [1, 1]} : vector<8x512xf32> to vector<8x128xf32>
    %135 = arith.negf %134 : vector<8x128xf32>
    %136 = math.exp %135 : vector<8x128xf32>
    %cst_35 = arith.constant 1.000000e+00 : f32
    %137 = vector.broadcast %cst_35 : f32 to vector<8x128xf32>
    %138 = arith.addf %137, %136 : vector<8x128xf32>
    %139 = arith.divf %137, %138 : vector<8x128xf32>
    %140 = vector.extract_strided_slice %133 {offsets = [0, 128], sizes = [8, 128], strides = [1, 1]} : vector<8x512xf32> to vector<8x128xf32>
    %141 = arith.negf %140 : vector<8x128xf32>
    %142 = math.exp %141 : vector<8x128xf32>
    %cst_36 = arith.constant 1.000000e+00 : f32
    %143 = vector.broadcast %cst_36 : f32 to vector<8x128xf32>
    %144 = arith.addf %143, %142 : vector<8x128xf32>
    %145 = arith.divf %143, %144 : vector<8x128xf32>
    %146 = vector.extract_strided_slice %133 {offsets = [0, 256], sizes = [8, 128], strides = [1, 1]} : vector<8x512xf32> to vector<8x128xf32>
    %147 = math.tanh %146 : vector<8x128xf32>
    %148 = vector.extract_strided_slice %133 {offsets = [0, 384], sizes = [8, 128], strides = [1, 1]} : vector<8x512xf32> to vector<8x128xf32>
    %149 = arith.negf %148 : vector<8x128xf32>
    %150 = math.exp %149 : vector<8x128xf32>
    %cst_37 = arith.constant 1.000000e+00 : f32
    %151 = vector.broadcast %cst_37 : f32 to vector<8x128xf32>
    %152 = arith.addf %151, %150 : vector<8x128xf32>
    %153 = arith.divf %151, %152 : vector<8x128xf32>
    %154 = arith.mulf %145, %100 : vector<8x128xf32>
    %155 = arith.mulf %139, %147 : vector<8x128xf32>
    %156 = arith.addf %154, %155 : vector<8x128xf32>
    %157 = math.tanh %156 : vector<8x128xf32>
    %158 = arith.mulf %153, %157 : vector<8x128xf32>
    %159 = tpu.concatenate %158, %130 in 1 : vector<8x128xf32>, vector<8x128xf32> -> vector<8x256xf32>
    %cst_38 = arith.constant dense<0.000000e+00> : vector<8x512xf32>
    %160 = tpu.matmul %159, %3, %cst_38 {dimension_numbers = #tpu.dot_dimension_numbers<[1], [0], [0], [1], [0, 0, 1, 1], [], []>} : vector<8x256xf32>, vector<256x512xf32>, vector<8x512xf32> -> vector<8x512xf32>
    %161 = arith.addf %160, %14 : vector<8x512xf32>
    %162 = vector.extract_strided_slice %161 {offsets = [0, 0], sizes = [8, 128], strides = [1, 1]} : vector<8x512xf32> to vector<8x128xf32>
    %163 = arith.negf %162 : vector<8x128xf32>
    %164 = math.exp %163 : vector<8x128xf32>
    %cst_39 = arith.constant 1.000000e+00 : f32
    %165 = vector.broadcast %cst_39 : f32 to vector<8x128xf32>
    %166 = arith.addf %165, %164 : vector<8x128xf32>
    %167 = arith.divf %165, %166 : vector<8x128xf32>
    %168 = vector.extract_strided_slice %161 {offsets = [0, 128], sizes = [8, 128], strides = [1, 1]} : vector<8x512xf32> to vector<8x128xf32>
    %169 = arith.negf %168 : vector<8x128xf32>
    %170 = math.exp %169 : vector<8x128xf32>
    %cst_40 = arith.constant 1.000000e+00 : f32
    %171 = vector.broadcast %cst_40 : f32 to vector<8x128xf32>
    %172 = arith.addf %171, %170 : vector<8x128xf32>
    %173 = arith.divf %171, %172 : vector<8x128xf32>
    %174 = vector.extract_strided_slice %161 {offsets = [0, 256], sizes = [8, 128], strides = [1, 1]} : vector<8x512xf32> to vector<8x128xf32>
    %175 = math.tanh %174 : vector<8x128xf32>
    %176 = vector.extract_strided_slice %161 {offsets = [0, 384], sizes = [8, 128], strides = [1, 1]} : vector<8x512xf32> to vector<8x128xf32>
    %177 = arith.negf %176 : vector<8x128xf32>
    %178 = math.exp %177 : vector<8x128xf32>
    %cst_41 = arith.constant 1.000000e+00 : f32
    %179 = vector.broadcast %cst_41 : f32 to vector<8x128xf32>
    %180 = arith.addf %179, %178 : vector<8x128xf32>
    %181 = arith.divf %179, %180 : vector<8x128xf32>
    %182 = arith.mulf %173, %128 : vector<8x128xf32>
    %183 = arith.mulf %167, %175 : vector<8x128xf32>
    %184 = arith.addf %182, %183 : vector<8x128xf32>
    %185 = math.tanh %184 : vector<8x128xf32>
    %186 = arith.mulf %181, %185 : vector<8x128xf32>
    %187 = vector.extract_strided_slice %12 {offsets = [24, 0], sizes = [8, 512], strides = [1, 1]} : vector<64x512xf32> to vector<8x512xf32>
    %cst_42 = arith.constant dense<0.000000e+00> : vector<8x512xf32>
    %188 = tpu.matmul %158, %1, %cst_42 {dimension_numbers = #tpu.dot_dimension_numbers<[1], [0], [0], [1], [0, 0, 1, 1], [], []>} : vector<8x128xf32>, vector<128x512xf32>, vector<8x512xf32> -> vector<8x512xf32>
    %189 = arith.addf %187, %188 : vector<8x512xf32>
    %190 = vector.extract_strided_slice %189 {offsets = [0, 0], sizes = [8, 128], strides = [1, 1]} : vector<8x512xf32> to vector<8x128xf32>
    %191 = arith.negf %190 : vector<8x128xf32>
    %192 = math.exp %191 : vector<8x128xf32>
    %cst_43 = arith.constant 1.000000e+00 : f32
    %193 = vector.broadcast %cst_43 : f32 to vector<8x128xf32>
    %194 = arith.addf %193, %192 : vector<8x128xf32>
    %195 = arith.divf %193, %194 : vector<8x128xf32>
    %196 = vector.extract_strided_slice %189 {offsets = [0, 128], sizes = [8, 128], strides = [1, 1]} : vector<8x512xf32> to vector<8x128xf32>
    %197 = arith.negf %196 : vector<8x128xf32>
    %198 = math.exp %197 : vector<8x128xf32>
    %cst_44 = arith.constant 1.000000e+00 : f32
    %199 = vector.broadcast %cst_44 : f32 to vector<8x128xf32>
    %200 = arith.addf %199, %198 : vector<8x128xf32>
    %201 = arith.divf %199, %200 : vector<8x128xf32>
    %202 = vector.extract_strided_slice %189 {offsets = [0, 256], sizes = [8, 128], strides = [1, 1]} : vector<8x512xf32> to vector<8x128xf32>
    %203 = math.tanh %202 : vector<8x128xf32>
    %204 = vector.extract_strided_slice %189 {offsets = [0, 384], sizes = [8, 128], strides = [1, 1]} : vector<8x512xf32> to vector<8x128xf32>
    %205 = arith.negf %204 : vector<8x128xf32>
    %206 = math.exp %205 : vector<8x128xf32>
    %cst_45 = arith.constant 1.000000e+00 : f32
    %207 = vector.broadcast %cst_45 : f32 to vector<8x128xf32>
    %208 = arith.addf %207, %206 : vector<8x128xf32>
    %209 = arith.divf %207, %208 : vector<8x128xf32>
    %210 = arith.mulf %201, %156 : vector<8x128xf32>
    %211 = arith.mulf %195, %203 : vector<8x128xf32>
    %212 = arith.addf %210, %211 : vector<8x128xf32>
    %213 = math.tanh %212 : vector<8x128xf32>
    %214 = arith.mulf %209, %213 : vector<8x128xf32>
    %215 = tpu.concatenate %214, %186 in 1 : vector<8x128xf32>, vector<8x128xf32> -> vector<8x256xf32>
    %cst_46 = arith.constant dense<0.000000e+00> : vector<8x512xf32>
    %216 = tpu.matmul %215, %3, %cst_46 {dimension_numbers = #tpu.dot_dimension_numbers<[1], [0], [0], [1], [0, 0, 1, 1], [], []>} : vector<8x256xf32>, vector<256x512xf32>, vector<8x512xf32> -> vector<8x512xf32>
    %217 = arith.addf %216, %14 : vector<8x512xf32>
    %218 = vector.extract_strided_slice %217 {offsets = [0, 0], sizes = [8, 128], strides = [1, 1]} : vector<8x512xf32> to vector<8x128xf32>
    %219 = arith.negf %218 : vector<8x128xf32>
    %220 = math.exp %219 : vector<8x128xf32>
    %cst_47 = arith.constant 1.000000e+00 : f32
    %221 = vector.broadcast %cst_47 : f32 to vector<8x128xf32>
    %222 = arith.addf %221, %220 : vector<8x128xf32>
    %223 = arith.divf %221, %222 : vector<8x128xf32>
    %224 = vector.extract_strided_slice %217 {offsets = [0, 128], sizes = [8, 128], strides = [1, 1]} : vector<8x512xf32> to vector<8x128xf32>
    %225 = arith.negf %224 : vector<8x128xf32>
    %226 = math.exp %225 : vector<8x128xf32>
    %cst_48 = arith.constant 1.000000e+00 : f32
    %227 = vector.broadcast %cst_48 : f32 to vector<8x128xf32>
    %228 = arith.addf %227, %226 : vector<8x128xf32>
    %229 = arith.divf %227, %228 : vector<8x128xf32>
    %230 = vector.extract_strided_slice %217 {offsets = [0, 256], sizes = [8, 128], strides = [1, 1]} : vector<8x512xf32> to vector<8x128xf32>
    %231 = math.tanh %230 : vector<8x128xf32>
    %232 = vector.extract_strided_slice %217 {offsets = [0, 384], sizes = [8, 128], strides = [1, 1]} : vector<8x512xf32> to vector<8x128xf32>
    %233 = arith.negf %232 : vector<8x128xf32>
    %234 = math.exp %233 : vector<8x128xf32>
    %cst_49 = arith.constant 1.000000e+00 : f32
    %235 = vector.broadcast %cst_49 : f32 to vector<8x128xf32>
    %236 = arith.addf %235, %234 : vector<8x128xf32>
    %237 = arith.divf %235, %236 : vector<8x128xf32>
    %238 = arith.mulf %229, %184 : vector<8x128xf32>
    %239 = arith.mulf %223, %231 : vector<8x128xf32>
    %240 = arith.addf %238, %239 : vector<8x128xf32>
    %241 = math.tanh %240 : vector<8x128xf32>
    %242 = arith.mulf %237, %241 : vector<8x128xf32>
    %243 = vector.extract_strided_slice %12 {offsets = [32, 0], sizes = [8, 512], strides = [1, 1]} : vector<64x512xf32> to vector<8x512xf32>
    %cst_50 = arith.constant dense<0.000000e+00> : vector<8x512xf32>
    %244 = tpu.matmul %214, %1, %cst_50 {dimension_numbers = #tpu.dot_dimension_numbers<[1], [0], [0], [1], [0, 0, 1, 1], [], []>} : vector<8x128xf32>, vector<128x512xf32>, vector<8x512xf32> -> vector<8x512xf32>
    %245 = arith.addf %243, %244 : vector<8x512xf32>
    %246 = vector.extract_strided_slice %245 {offsets = [0, 0], sizes = [8, 128], strides = [1, 1]} : vector<8x512xf32> to vector<8x128xf32>
    %247 = arith.negf %246 : vector<8x128xf32>
    %248 = math.exp %247 : vector<8x128xf32>
    %cst_51 = arith.constant 1.000000e+00 : f32
    %249 = vector.broadcast %cst_51 : f32 to vector<8x128xf32>
    %250 = arith.addf %249, %248 : vector<8x128xf32>
    %251 = arith.divf %249, %250 : vector<8x128xf32>
    %252 = vector.extract_strided_slice %245 {offsets = [0, 128], sizes = [8, 128], strides = [1, 1]} : vector<8x512xf32> to vector<8x128xf32>
    %253 = arith.negf %252 : vector<8x128xf32>
    %254 = math.exp %253 : vector<8x128xf32>
    %cst_52 = arith.constant 1.000000e+00 : f32
    %255 = vector.broadcast %cst_52 : f32 to vector<8x128xf32>
    %256 = arith.addf %255, %254 : vector<8x128xf32>
    %257 = arith.divf %255, %256 : vector<8x128xf32>
    %258 = vector.extract_strided_slice %245 {offsets = [0, 256], sizes = [8, 128], strides = [1, 1]} : vector<8x512xf32> to vector<8x128xf32>
    %259 = math.tanh %258 : vector<8x128xf32>
    %260 = vector.extract_strided_slice %245 {offsets = [0, 384], sizes = [8, 128], strides = [1, 1]} : vector<8x512xf32> to vector<8x128xf32>
    %261 = arith.negf %260 : vector<8x128xf32>
    %262 = math.exp %261 : vector<8x128xf32>
    %cst_53 = arith.constant 1.000000e+00 : f32
    %263 = vector.broadcast %cst_53 : f32 to vector<8x128xf32>
    %264 = arith.addf %263, %262 : vector<8x128xf32>
    %265 = arith.divf %263, %264 : vector<8x128xf32>
    %266 = arith.mulf %257, %212 : vector<8x128xf32>
    %267 = arith.mulf %251, %259 : vector<8x128xf32>
    %268 = arith.addf %266, %267 : vector<8x128xf32>
    %269 = math.tanh %268 : vector<8x128xf32>
    %270 = arith.mulf %265, %269 : vector<8x128xf32>
    %271 = tpu.concatenate %270, %242 in 1 : vector<8x128xf32>, vector<8x128xf32> -> vector<8x256xf32>
    %cst_54 = arith.constant dense<0.000000e+00> : vector<8x512xf32>
    %272 = tpu.matmul %271, %3, %cst_54 {dimension_numbers = #tpu.dot_dimension_numbers<[1], [0], [0], [1], [0, 0, 1, 1], [], []>} : vector<8x256xf32>, vector<256x512xf32>, vector<8x512xf32> -> vector<8x512xf32>
    %273 = arith.addf %272, %14 : vector<8x512xf32>
    %274 = vector.extract_strided_slice %273 {offsets = [0, 0], sizes = [8, 128], strides = [1, 1]} : vector<8x512xf32> to vector<8x128xf32>
    %275 = arith.negf %274 : vector<8x128xf32>
    %276 = math.exp %275 : vector<8x128xf32>
    %cst_55 = arith.constant 1.000000e+00 : f32
    %277 = vector.broadcast %cst_55 : f32 to vector<8x128xf32>
    %278 = arith.addf %277, %276 : vector<8x128xf32>
    %279 = arith.divf %277, %278 : vector<8x128xf32>
    %280 = vector.extract_strided_slice %273 {offsets = [0, 128], sizes = [8, 128], strides = [1, 1]} : vector<8x512xf32> to vector<8x128xf32>
    %281 = arith.negf %280 : vector<8x128xf32>
    %282 = math.exp %281 : vector<8x128xf32>
    %cst_56 = arith.constant 1.000000e+00 : f32
    %283 = vector.broadcast %cst_56 : f32 to vector<8x128xf32>
    %284 = arith.addf %283, %282 : vector<8x128xf32>
    %285 = arith.divf %283, %284 : vector<8x128xf32>
    %286 = vector.extract_strided_slice %273 {offsets = [0, 256], sizes = [8, 128], strides = [1, 1]} : vector<8x512xf32> to vector<8x128xf32>
    %287 = math.tanh %286 : vector<8x128xf32>
    %288 = vector.extract_strided_slice %273 {offsets = [0, 384], sizes = [8, 128], strides = [1, 1]} : vector<8x512xf32> to vector<8x128xf32>
    %289 = arith.negf %288 : vector<8x128xf32>
    %290 = math.exp %289 : vector<8x128xf32>
    %cst_57 = arith.constant 1.000000e+00 : f32
    %291 = vector.broadcast %cst_57 : f32 to vector<8x128xf32>
    %292 = arith.addf %291, %290 : vector<8x128xf32>
    %293 = arith.divf %291, %292 : vector<8x128xf32>
    %294 = arith.mulf %285, %240 : vector<8x128xf32>
    %295 = arith.mulf %279, %287 : vector<8x128xf32>
    %296 = arith.addf %294, %295 : vector<8x128xf32>
    %297 = math.tanh %296 : vector<8x128xf32>
    %298 = arith.mulf %293, %297 : vector<8x128xf32>
    %299 = vector.extract_strided_slice %12 {offsets = [40, 0], sizes = [8, 512], strides = [1, 1]} : vector<64x512xf32> to vector<8x512xf32>
    %cst_58 = arith.constant dense<0.000000e+00> : vector<8x512xf32>
    %300 = tpu.matmul %270, %1, %cst_58 {dimension_numbers = #tpu.dot_dimension_numbers<[1], [0], [0], [1], [0, 0, 1, 1], [], []>} : vector<8x128xf32>, vector<128x512xf32>, vector<8x512xf32> -> vector<8x512xf32>
    %301 = arith.addf %299, %300 : vector<8x512xf32>
    %302 = vector.extract_strided_slice %301 {offsets = [0, 0], sizes = [8, 128], strides = [1, 1]} : vector<8x512xf32> to vector<8x128xf32>
    %303 = arith.negf %302 : vector<8x128xf32>
    %304 = math.exp %303 : vector<8x128xf32>
    %cst_59 = arith.constant 1.000000e+00 : f32
    %305 = vector.broadcast %cst_59 : f32 to vector<8x128xf32>
    %306 = arith.addf %305, %304 : vector<8x128xf32>
    %307 = arith.divf %305, %306 : vector<8x128xf32>
    %308 = vector.extract_strided_slice %301 {offsets = [0, 128], sizes = [8, 128], strides = [1, 1]} : vector<8x512xf32> to vector<8x128xf32>
    %309 = arith.negf %308 : vector<8x128xf32>
    %310 = math.exp %309 : vector<8x128xf32>
    %cst_60 = arith.constant 1.000000e+00 : f32
    %311 = vector.broadcast %cst_60 : f32 to vector<8x128xf32>
    %312 = arith.addf %311, %310 : vector<8x128xf32>
    %313 = arith.divf %311, %312 : vector<8x128xf32>
    %314 = vector.extract_strided_slice %301 {offsets = [0, 256], sizes = [8, 128], strides = [1, 1]} : vector<8x512xf32> to vector<8x128xf32>
    %315 = math.tanh %314 : vector<8x128xf32>
    %316 = vector.extract_strided_slice %301 {offsets = [0, 384], sizes = [8, 128], strides = [1, 1]} : vector<8x512xf32> to vector<8x128xf32>
    %317 = arith.negf %316 : vector<8x128xf32>
    %318 = math.exp %317 : vector<8x128xf32>
    %cst_61 = arith.constant 1.000000e+00 : f32
    %319 = vector.broadcast %cst_61 : f32 to vector<8x128xf32>
    %320 = arith.addf %319, %318 : vector<8x128xf32>
    %321 = arith.divf %319, %320 : vector<8x128xf32>
    %322 = arith.mulf %313, %268 : vector<8x128xf32>
    %323 = arith.mulf %307, %315 : vector<8x128xf32>
    %324 = arith.addf %322, %323 : vector<8x128xf32>
    %325 = math.tanh %324 : vector<8x128xf32>
    %326 = arith.mulf %321, %325 : vector<8x128xf32>
    %327 = tpu.concatenate %326, %298 in 1 : vector<8x128xf32>, vector<8x128xf32> -> vector<8x256xf32>
    %cst_62 = arith.constant dense<0.000000e+00> : vector<8x512xf32>
    %328 = tpu.matmul %327, %3, %cst_62 {dimension_numbers = #tpu.dot_dimension_numbers<[1], [0], [0], [1], [0, 0, 1, 1], [], []>} : vector<8x256xf32>, vector<256x512xf32>, vector<8x512xf32> -> vector<8x512xf32>
    %329 = arith.addf %328, %14 : vector<8x512xf32>
    %330 = vector.extract_strided_slice %329 {offsets = [0, 0], sizes = [8, 128], strides = [1, 1]} : vector<8x512xf32> to vector<8x128xf32>
    %331 = arith.negf %330 : vector<8x128xf32>
    %332 = math.exp %331 : vector<8x128xf32>
    %cst_63 = arith.constant 1.000000e+00 : f32
    %333 = vector.broadcast %cst_63 : f32 to vector<8x128xf32>
    %334 = arith.addf %333, %332 : vector<8x128xf32>
    %335 = arith.divf %333, %334 : vector<8x128xf32>
    %336 = vector.extract_strided_slice %329 {offsets = [0, 128], sizes = [8, 128], strides = [1, 1]} : vector<8x512xf32> to vector<8x128xf32>
    %337 = arith.negf %336 : vector<8x128xf32>
    %338 = math.exp %337 : vector<8x128xf32>
    %cst_64 = arith.constant 1.000000e+00 : f32
    %339 = vector.broadcast %cst_64 : f32 to vector<8x128xf32>
    %340 = arith.addf %339, %338 : vector<8x128xf32>
    %341 = arith.divf %339, %340 : vector<8x128xf32>
    %342 = vector.extract_strided_slice %329 {offsets = [0, 256], sizes = [8, 128], strides = [1, 1]} : vector<8x512xf32> to vector<8x128xf32>
    %343 = math.tanh %342 : vector<8x128xf32>
    %344 = vector.extract_strided_slice %329 {offsets = [0, 384], sizes = [8, 128], strides = [1, 1]} : vector<8x512xf32> to vector<8x128xf32>
    %345 = arith.negf %344 : vector<8x128xf32>
    %346 = math.exp %345 : vector<8x128xf32>
    %cst_65 = arith.constant 1.000000e+00 : f32
    %347 = vector.broadcast %cst_65 : f32 to vector<8x128xf32>
    %348 = arith.addf %347, %346 : vector<8x128xf32>
    %349 = arith.divf %347, %348 : vector<8x128xf32>
    %350 = arith.mulf %341, %296 : vector<8x128xf32>
    %351 = arith.mulf %335, %343 : vector<8x128xf32>
    %352 = arith.addf %350, %351 : vector<8x128xf32>
    %353 = math.tanh %352 : vector<8x128xf32>
    %354 = arith.mulf %349, %353 : vector<8x128xf32>
    %355 = vector.extract_strided_slice %12 {offsets = [48, 0], sizes = [8, 512], strides = [1, 1]} : vector<64x512xf32> to vector<8x512xf32>
    %cst_66 = arith.constant dense<0.000000e+00> : vector<8x512xf32>
    %356 = tpu.matmul %326, %1, %cst_66 {dimension_numbers = #tpu.dot_dimension_numbers<[1], [0], [0], [1], [0, 0, 1, 1], [], []>} : vector<8x128xf32>, vector<128x512xf32>, vector<8x512xf32> -> vector<8x512xf32>
    %357 = arith.addf %355, %356 : vector<8x512xf32>
    %358 = vector.extract_strided_slice %357 {offsets = [0, 0], sizes = [8, 128], strides = [1, 1]} : vector<8x512xf32> to vector<8x128xf32>
    %359 = arith.negf %358 : vector<8x128xf32>
    %360 = math.exp %359 : vector<8x128xf32>
    %cst_67 = arith.constant 1.000000e+00 : f32
    %361 = vector.broadcast %cst_67 : f32 to vector<8x128xf32>
    %362 = arith.addf %361, %360 : vector<8x128xf32>
    %363 = arith.divf %361, %362 : vector<8x128xf32>
    %364 = vector.extract_strided_slice %357 {offsets = [0, 128], sizes = [8, 128], strides = [1, 1]} : vector<8x512xf32> to vector<8x128xf32>
    %365 = arith.negf %364 : vector<8x128xf32>
    %366 = math.exp %365 : vector<8x128xf32>
    %cst_68 = arith.constant 1.000000e+00 : f32
    %367 = vector.broadcast %cst_68 : f32 to vector<8x128xf32>
    %368 = arith.addf %367, %366 : vector<8x128xf32>
    %369 = arith.divf %367, %368 : vector<8x128xf32>
    %370 = vector.extract_strided_slice %357 {offsets = [0, 256], sizes = [8, 128], strides = [1, 1]} : vector<8x512xf32> to vector<8x128xf32>
    %371 = math.tanh %370 : vector<8x128xf32>
    %372 = vector.extract_strided_slice %357 {offsets = [0, 384], sizes = [8, 128], strides = [1, 1]} : vector<8x512xf32> to vector<8x128xf32>
    %373 = arith.negf %372 : vector<8x128xf32>
    %374 = math.exp %373 : vector<8x128xf32>
    %cst_69 = arith.constant 1.000000e+00 : f32
    %375 = vector.broadcast %cst_69 : f32 to vector<8x128xf32>
    %376 = arith.addf %375, %374 : vector<8x128xf32>
    %377 = arith.divf %375, %376 : vector<8x128xf32>
    %378 = arith.mulf %369, %324 : vector<8x128xf32>
    %379 = arith.mulf %363, %371 : vector<8x128xf32>
    %380 = arith.addf %378, %379 : vector<8x128xf32>
    %381 = math.tanh %380 : vector<8x128xf32>
    %382 = arith.mulf %377, %381 : vector<8x128xf32>
    %383 = tpu.concatenate %382, %354 in 1 : vector<8x128xf32>, vector<8x128xf32> -> vector<8x256xf32>
    %cst_70 = arith.constant dense<0.000000e+00> : vector<8x512xf32>
    %384 = tpu.matmul %383, %3, %cst_70 {dimension_numbers = #tpu.dot_dimension_numbers<[1], [0], [0], [1], [0, 0, 1, 1], [], []>} : vector<8x256xf32>, vector<256x512xf32>, vector<8x512xf32> -> vector<8x512xf32>
    %385 = arith.addf %384, %14 : vector<8x512xf32>
    %386 = vector.extract_strided_slice %385 {offsets = [0, 0], sizes = [8, 128], strides = [1, 1]} : vector<8x512xf32> to vector<8x128xf32>
    %387 = arith.negf %386 : vector<8x128xf32>
    %388 = math.exp %387 : vector<8x128xf32>
    %cst_71 = arith.constant 1.000000e+00 : f32
    %389 = vector.broadcast %cst_71 : f32 to vector<8x128xf32>
    %390 = arith.addf %389, %388 : vector<8x128xf32>
    %391 = arith.divf %389, %390 : vector<8x128xf32>
    %392 = vector.extract_strided_slice %385 {offsets = [0, 128], sizes = [8, 128], strides = [1, 1]} : vector<8x512xf32> to vector<8x128xf32>
    %393 = arith.negf %392 : vector<8x128xf32>
    %394 = math.exp %393 : vector<8x128xf32>
    %cst_72 = arith.constant 1.000000e+00 : f32
    %395 = vector.broadcast %cst_72 : f32 to vector<8x128xf32>
    %396 = arith.addf %395, %394 : vector<8x128xf32>
    %397 = arith.divf %395, %396 : vector<8x128xf32>
    %398 = vector.extract_strided_slice %385 {offsets = [0, 256], sizes = [8, 128], strides = [1, 1]} : vector<8x512xf32> to vector<8x128xf32>
    %399 = math.tanh %398 : vector<8x128xf32>
    %400 = vector.extract_strided_slice %385 {offsets = [0, 384], sizes = [8, 128], strides = [1, 1]} : vector<8x512xf32> to vector<8x128xf32>
    %401 = arith.negf %400 : vector<8x128xf32>
    %402 = math.exp %401 : vector<8x128xf32>
    %cst_73 = arith.constant 1.000000e+00 : f32
    %403 = vector.broadcast %cst_73 : f32 to vector<8x128xf32>
    %404 = arith.addf %403, %402 : vector<8x128xf32>
    %405 = arith.divf %403, %404 : vector<8x128xf32>
    %406 = arith.mulf %397, %352 : vector<8x128xf32>
    %407 = arith.mulf %391, %399 : vector<8x128xf32>
    %408 = arith.addf %406, %407 : vector<8x128xf32>
    %409 = math.tanh %408 : vector<8x128xf32>
    %410 = arith.mulf %405, %409 : vector<8x128xf32>
    %411 = vector.extract_strided_slice %12 {offsets = [56, 0], sizes = [8, 512], strides = [1, 1]} : vector<64x512xf32> to vector<8x512xf32>
    %cst_74 = arith.constant dense<0.000000e+00> : vector<8x512xf32>
    %412 = tpu.matmul %382, %1, %cst_74 {dimension_numbers = #tpu.dot_dimension_numbers<[1], [0], [0], [1], [0, 0, 1, 1], [], []>} : vector<8x128xf32>, vector<128x512xf32>, vector<8x512xf32> -> vector<8x512xf32>
    %413 = arith.addf %411, %412 : vector<8x512xf32>
    %414 = vector.extract_strided_slice %413 {offsets = [0, 0], sizes = [8, 128], strides = [1, 1]} : vector<8x512xf32> to vector<8x128xf32>
    %415 = arith.negf %414 : vector<8x128xf32>
    %416 = math.exp %415 : vector<8x128xf32>
    %cst_75 = arith.constant 1.000000e+00 : f32
    %417 = vector.broadcast %cst_75 : f32 to vector<8x128xf32>
    %418 = arith.addf %417, %416 : vector<8x128xf32>
    %419 = arith.divf %417, %418 : vector<8x128xf32>
    %420 = vector.extract_strided_slice %413 {offsets = [0, 128], sizes = [8, 128], strides = [1, 1]} : vector<8x512xf32> to vector<8x128xf32>
    %421 = arith.negf %420 : vector<8x128xf32>
    %422 = math.exp %421 : vector<8x128xf32>
    %cst_76 = arith.constant 1.000000e+00 : f32
    %423 = vector.broadcast %cst_76 : f32 to vector<8x128xf32>
    %424 = arith.addf %423, %422 : vector<8x128xf32>
    %425 = arith.divf %423, %424 : vector<8x128xf32>
    %426 = vector.extract_strided_slice %413 {offsets = [0, 256], sizes = [8, 128], strides = [1, 1]} : vector<8x512xf32> to vector<8x128xf32>
    %427 = math.tanh %426 : vector<8x128xf32>
    %428 = vector.extract_strided_slice %413 {offsets = [0, 384], sizes = [8, 128], strides = [1, 1]} : vector<8x512xf32> to vector<8x128xf32>
    %429 = arith.negf %428 : vector<8x128xf32>
    %430 = math.exp %429 : vector<8x128xf32>
    %cst_77 = arith.constant 1.000000e+00 : f32
    %431 = vector.broadcast %cst_77 : f32 to vector<8x128xf32>
    %432 = arith.addf %431, %430 : vector<8x128xf32>
    %433 = arith.divf %431, %432 : vector<8x128xf32>
    %434 = arith.mulf %425, %380 : vector<8x128xf32>
    %435 = arith.mulf %419, %427 : vector<8x128xf32>
    %436 = arith.addf %434, %435 : vector<8x128xf32>
    %437 = math.tanh %436 : vector<8x128xf32>
    %438 = arith.mulf %433, %437 : vector<8x128xf32>
    %439 = tpu.concatenate %438, %410 in 1 : vector<8x128xf32>, vector<8x128xf32> -> vector<8x256xf32>
    %cst_78 = arith.constant dense<0.000000e+00> : vector<8x512xf32>
    %440 = tpu.matmul %439, %3, %cst_78 {dimension_numbers = #tpu.dot_dimension_numbers<[1], [0], [0], [1], [0, 0, 1, 1], [], []>} : vector<8x256xf32>, vector<256x512xf32>, vector<8x512xf32> -> vector<8x512xf32>
    %441 = arith.addf %440, %14 : vector<8x512xf32>
    %442 = vector.extract_strided_slice %441 {offsets = [0, 0], sizes = [8, 128], strides = [1, 1]} : vector<8x512xf32> to vector<8x128xf32>
    %443 = arith.negf %442 : vector<8x128xf32>
    %444 = math.exp %443 : vector<8x128xf32>
    %cst_79 = arith.constant 1.000000e+00 : f32
    %445 = vector.broadcast %cst_79 : f32 to vector<8x128xf32>
    %446 = arith.addf %445, %444 : vector<8x128xf32>
    %447 = arith.divf %445, %446 : vector<8x128xf32>
    %448 = vector.extract_strided_slice %441 {offsets = [0, 128], sizes = [8, 128], strides = [1, 1]} : vector<8x512xf32> to vector<8x128xf32>
    %449 = arith.negf %448 : vector<8x128xf32>
    %450 = math.exp %449 : vector<8x128xf32>
    %cst_80 = arith.constant 1.000000e+00 : f32
    %451 = vector.broadcast %cst_80 : f32 to vector<8x128xf32>
    %452 = arith.addf %451, %450 : vector<8x128xf32>
    %453 = arith.divf %451, %452 : vector<8x128xf32>
    %454 = vector.extract_strided_slice %441 {offsets = [0, 256], sizes = [8, 128], strides = [1, 1]} : vector<8x512xf32> to vector<8x128xf32>
    %455 = math.tanh %454 : vector<8x128xf32>
    %456 = vector.extract_strided_slice %441 {offsets = [0, 384], sizes = [8, 128], strides = [1, 1]} : vector<8x512xf32> to vector<8x128xf32>
    %457 = arith.negf %456 : vector<8x128xf32>
    %458 = math.exp %457 : vector<8x128xf32>
    %cst_81 = arith.constant 1.000000e+00 : f32
    %459 = vector.broadcast %cst_81 : f32 to vector<8x128xf32>
    %460 = arith.addf %459, %458 : vector<8x128xf32>
    %461 = arith.divf %459, %460 : vector<8x128xf32>
    %462 = arith.mulf %453, %408 : vector<8x128xf32>
    %463 = arith.mulf %447, %455 : vector<8x128xf32>
    %464 = arith.addf %462, %463 : vector<8x128xf32>
    %465 = math.tanh %464 : vector<8x128xf32>
    %466 = arith.mulf %461, %465 : vector<8x128xf32>
    %cst_82 = arith.constant dense<0.000000e+00> : vector<8x128xf32>
    %467 = tpu.matmul %466, %5, %cst_82 {dimension_numbers = #tpu.dot_dimension_numbers<[1], [0], [0], [1], [0, 0, 1, 1], [], []>} : vector<8x128xf32>, vector<128x128xf32>, vector<8x128xf32> -> vector<8x128xf32>
    %468 = vector.broadcast %6 : vector<1x128xf32> to vector<8x128xf32>
    %469 = arith.addf %467, %468 : vector<8x128xf32>
    %c0_83 = arith.constant 0 : index
    %c0_84 = arith.constant 0 : index
    %470 = vector.load %arg8[%c0_83, %c0_84] : memref<8x128xf32, #tpu.memory_space<vmem>>, vector<8x128xf32>
    tpu.vector_store %arg8[%c0_83, %c0_84], %469 {strides = array<i32>} : memref<8x128xf32, #tpu.memory_space<vmem>>, vector<8x128xf32>,
    return
  }
}

</mosaic_0001>

<bundles_post_ra>
// kernel: tpu_custom_call.1
= control target key start
LH: loop header
LB: loop body
LE: loop exit
PB: predicated region body
PF: predicated region fallthrough
CT: control target
= control target key end

     0   :  { %13 = vsyncpa [#allocation3], 0  ;;  %s6589_s0 = inlined_call_operand.vmem [shape: f32[64,1], index: 0, kind: input, shape index: {}]   ;;  %s6590_s1 = inlined_call_operand.vmem [shape: f32[1,512], index: 1, kind: input, shape index: {}]   ;;  %s6591_s2 = inlined_call_operand.hbm [shape: f32[128,512], index: 2, kind: input, shape index: {}]   ;;  %s6592_s3 = inlined_call_operand.vmem [shape: f32[1,512], index: 3, kind: input, shape index: {}]   ;;  %s6593_s4 = inlined_call_operand.hbm [shape: f32[256,512], index: 4, kind: input, shape index: {}]   ;;  %s6594_s5 = inlined_call_operand.vmem [shape: f32[1,512], index: 5, kind: input, shape index: {}]   ;;  %s6595_s6 = inlined_call_operand.hbm [shape: f32[128,128], index: 6, kind: input, shape index: {}]   ;;  %s6596_s7 = inlined_call_operand.vmem [shape: f32[1,128], index: 7, kind: input, shape index: {}]   ;;  %s6597_s8 = inlined_call_operand.hbm [shape: f32[8,128], index: 8, kind: output, shape index: {}]  }
   0x1   :  { %14 = vsyncpa [#allocation6], 0 }
   0x2   :  { %15 = vsyncpa [#allocation4], 0  ;;  %s5264_s27 = smov [#allocation5]   ;;  %s5265_s29 = smov [#allocation2]  }
   0x3   :  { %s39_s28 = sshll.u32 %s5264_s27, 4  ;;  %s25_s30 = sshll.u32 %s5265_s29, 4  ;;  %s40_s28 = int_to_ptr.vmem [resolvable:$true] %s39_s28  ;;  %s5321_s30 = int_to_ptr.vmem [resolvable:$true] %s25_s30 }
   0x4   :  { %s5170_s11 = scalar_lea.hbm %s6593_s4, 16384 }
   0x5   :  { %p5171_p0 = scmp.ne.s32.totalorder %s6593_s4, %s5170_s11  ;;  %p5174_p1 = scmp.lt.u32.totalorder %s5170_s11, %s6593_s4 }
   0x7   :  { %p5176_p2 = pnand %p5174_p1, %p5171_p0 }
   0x9   :  { %5179 = shalt.err (!%p5176_p2)
}
   0xa   :  { %s5180_s16 = scalar_lea.vmem %s40_s28, 16384  ;;  %p5185_p4 = scmp.lt.s32.totalorder %s40_s28, %s40_s28 }
   0xb   :  { %p5181_p3 = scmp.ne.s32.totalorder %s40_s28, %s5180_s16  ;;  %p5186_p5 = scmp.lt.s32.totalorder %s5180_s16, %s5180_s16 }
   0xd   :  { %p5187_p6 = por %p5186_p5, %p5185_p4 }
   0xf   :  { %p5188_p7 = pnand %p5187_p6, %p5181_p3 }
  0x11   :  { %5191 = shalt.err (!%p5188_p7)
}
  0x12   :  { %s5266_s17 = smov 512   ;;  %s5267_s18 = smov 32  }
  0x13   :  { %45 = dma.hbm_to_vmem [thread:$0]  %s6593_s4, 16384, %s40_s28, [#allocation6], %s5266_s17, %s5266_s17, %s5267_s18  }
  0x14   :  { %s5192_s23 = scalar_lea.hbm %s6591_s2, 8192 }
  0x15   :  { %p5193_p8 = scmp.ne.s32.totalorder %s6591_s2, %s5192_s23  ;;  %p5196_p9 = scmp.lt.u32.totalorder %s5192_s23, %s6591_s2 }
  0x17   :  { %p5198_p10 = pnand %p5196_p9, %p5193_p8 }
  0x19   :  { %5201 = shalt.err (!%p5198_p10)
}
  0x1a   :  { %s5202_s29 = scalar_lea.vmem %s5321_s30, 8192  ;;  %p5207_p12 = scmp.lt.s32.totalorder %s5321_s30, %s5321_s30 }
  0x1b   :  { %p5203_p11 = scmp.ne.s32.totalorder %s5321_s30, %s5202_s29  ;;  %p5208_p13 = scmp.lt.s32.totalorder %s5202_s29, %s5202_s29 }
  0x1d   :  { %p5209_p0 = por %p5208_p13, %p5207_p12 }
  0x1f   :  { %p5210_p1 = pnand %p5209_p0, %p5203_p11 }
  0x21   :  { %5213 = shalt.err (!%p5210_p1)
}
  0x22   :  { %31 = dma.hbm_to_vmem [thread:$0]  %s6591_s2, 8192, %s5321_s30, [#allocation3], %s5266_s17, %s5266_s17, %s5267_s18  }
  0x23   :  { %s5268_s9 = smov [#allocation7]   ;;  %s5214_s13 = scalar_lea.hbm %s6595_s6, 2048 }
  0x24   :  { %s53_s10 = sshll.u32 %s5268_s9, 4  ;;  %p5215_p2 = scmp.ne.s32.totalorder %s6595_s6, %s5214_s13  ;;  %s54_s10 = int_to_ptr.vmem [resolvable:$true] %s53_s10 }
  0x25   :  { %p5218_p3 = scmp.lt.u32.totalorder %s5214_s13, %s6595_s6 }
  0x27   :  { %p5220_p4 = pnand %p5218_p3, %p5215_p2 }
  0x29   :  { %5223 = shalt.err (!%p5220_p4)
}
  0x2a   :  { %s5224_s20 = scalar_lea.vmem %s54_s10, 2048  ;;  %p5229_p6 = scmp.lt.s32.totalorder %s54_s10, %s54_s10 }
  0x2b   :  { %p5225_p5 = scmp.ne.s32.totalorder %s54_s10, %s5224_s20  ;;  %p5230_p7 = scmp.lt.s32.totalorder %s5224_s20, %s5224_s20 }
  0x2d   :  { %p5231_p8 = por %p5230_p7, %p5229_p6 }
  0x2f   :  { %p5232_p9 = pnand %p5231_p8, %p5225_p5 }
  0x31   :  { %5235 = shalt.err (!%p5232_p9)
}
  0x32   :  { %s5269_s2 = smov 128   ;;  %s5270_s30 = smov 8  }
  0x33   :  { %59 = dma.hbm_to_vmem [thread:$0]  %s6595_s6, 2048, %s54_s10, [#allocation6], %s5269_s2, %s5269_s2, %s5270_s30  }
  0x34   :  { %5258 = dma.done.wait [#allocation3], 8192  }
  0x35   :  { %5259 = vsyncadd [#allocation3], 4294959104 }
  0x36   :  { %5260 = dma.done.wait [#allocation6], 18432  }
  0x37   :  { %5261 = vsyncadd [#allocation6], 4294948864  ;;  %v6598_v0 = vmov 0.0   ;;  %v5272_v1 = vmov 0   ;;  %v73_v2 = vld [vmem:[#allocation2 + $0x8] sm:$0xff]  ;;  %v75_v4 = vld [vmem:[#allocation2 + $0x18] sm:$0xff] }
  0x38   :  { %522 = vmatprep.mubr.f32.mxu0 %v6598_v0  ;;  %593 = vmatprep.mubr.f32.mxu1 %v6598_v0  ;;  %v77_v3 = vld [vmem:[#allocation2 + $0x28] sm:$0xff]  ;;  %v79_v6 = vld [vmem:[#allocation2 + $0x38] sm:$0xff]  ;;  %v72_v7 = vld [vmem:[#allocation2] sm:$0xff]  ;;  %vm5274_vm0 = vmmov 0   ;;  %s5275_s20 = smov [#allocation8]  }
  0x39   :  { %4912 = vset.pattern.permute.xlu0 %v5272_v1  ;;  %4913 = vset.pattern.permute.xlu1 %v5272_v1  ;;  %v5366_v5 = vpack.c.bf16 %v77_v3, %v73_v2  ;;  %v76_v8 = vld [vmem:[#allocation2 + $0x20] sm:$0xff]  ;;  %v5368_v9 = vpack.c.bf16 %v79_v6, %v75_v4  ;;  %v74_v11 = vld [vmem:[#allocation2 + $0x10] sm:$0xff]  ;;  %v81_v13 = vld [vmem:[#allocation2 + $0x48] sm:$0xff]  ;;  %s3229_s2 = sshll.u32 %s5275_s20, 4  ;;  %s3230_s2 = int_to_ptr.vmem [resolvable:$true] %s3229_s2 }
  0x3a   :  { %v5370_v10 = vpack.c.bf16 %v76_v8, %v72_v7  ;;  %v78_v12 = vld [vmem:[#allocation2 + $0x30] sm:$0xff]  ;;  %v85_v15 = vld [vmem:[#allocation2 + $0x68] sm:$0xff]  ;;  %v83_v16 = vld [vmem:[#allocation2 + $0x58] sm:$0xff]  ;;  %s5236_s30 = scalar_lea.vmem %s3230_s2, 128  ;;  %p5241_p11 = scmp.lt.s32.totalorder %s3230_s2, %s3230_s2 }
  0x3b   :  { %6743 = vst [vmem:[#allocation12_spill] sm:$0xff] %v5366_v5  ;;  %6744 = vst [vmem:[#allocation13_spill] sm:$0xff] %v5368_v9  ;;  %3341 = vmatprep.subr.bf16.mxu0 %v5366_v5  ;;  %v5373_v14 = vpack.c.bf16 %v78_v12, %v74_v11  ;;  %v87_v17 = vld [vmem:[#allocation2 + $0x78] sm:$0xff]  ;;  %3373 = vmatprep.subr.bf16.mxu1 %v5368_v9  ;;  %v5377_v18 = vpack.c.bf16 %v85_v15, %v81_v13  ;;  %v80_v20 = vld [vmem:[#allocation2 + $0x40] sm:$0xff]  ;;  %p5237_p10 = scmp.ne.s32.totalorder %s3230_s2, %s5236_s30  ;;  %p5242_p12 = scmp.lt.s32.totalorder %s5236_s30, %s5236_s30 }
  0x3c   :  { %3343 = vmatpush1.bf16.msra.mxu0 %v5370_v10  ;;  %v5379_v19 = vpack.c.bf16 %v87_v17, %v83_v16  ;;  %v84_v21 = vld [vmem:[#allocation2 + $0x60] sm:$0xff]  ;;  %v82_v22 = vld [vmem:[#allocation2 + $0x50] sm:$0xff]  ;;  %v89_v25 = vld [vmem:[#allocation2 + $0x88] sm:$0xff] }
  0x3d   :  { %3375 = vmatpush1.bf16.msra.mxu1 %v5373_v14  ;;  %v5382_v23 = vpack.c.bf16 %v84_v21, %v80_v20  ;;  %v86_v24 = vld [vmem:[#allocation2 + $0x70] sm:$0xff]  ;;  %v93_v26 = vld [vmem:[#allocation2 + $0xa8] sm:$0xff]  ;;  %3345 = vmatprep.subr.bf16.mxu0 %v5377_v18  ;;  %v91_v29 = vld [vmem:[#allocation2 + $0x98] sm:$0xff]  ;;  %p5243_p13 = por %p5242_p12, %p5241_p11 }
  0x3e   :  { %3377 = vmatprep.subr.bf16.mxu1 %v5379_v19  ;;  %v5386_v27 = vpack.c.bf16 %v86_v24, %v82_v22  ;;  %v5388_v28 = vpack.c.bf16 %v93_v26, %v89_v25  ;;  %v95_v30 = vld [vmem:[#allocation2 + $0xb8] sm:$0xff]  ;;  %v88_v31 = vld [vmem:[#allocation2 + $0x80] sm:$0xff]  ;;  %v90_v34 = vld [vmem:[#allocation2 + $0x90] sm:$0xff] }
  0x3f   :  { %v5390_v32 = vpack.c.bf16 %v95_v30, %v91_v29  ;;  %v92_v33 = vld [vmem:[#allocation2 + $0xa0] sm:$0xff]  ;;  %v94_v35 = vld [vmem:[#allocation2 + $0xb0] sm:$0xff]  ;;  %v97_v37 = vld [vmem:[#allocation2 + $0xc8] sm:$0xff]  ;;  %p5244_p0 = pnand %p5243_p13, %p5237_p10 }
  0x40   :  { %3347 = vmatpush1.bf16.msra.mxu0 %v5382_v23  ;;  %v5393_v36 = vpack.c.bf16 %v92_v33, %v88_v31  ;;  %v101_v38 = vld [vmem:[#allocation2 + $0xe8] sm:$0xff]  ;;  %v99_v39 = vld [vmem:[#allocation2 + $0xd8] sm:$0xff]  ;;  %v5397_v40 = vpack.c.bf16 %v94_v35, %v90_v34  ;;  %v96_v43 = vld [vmem:[#allocation2 + $0xc0] sm:$0xff] }
  0x41   :  { %3379 = vmatpush1.bf16.msra.mxu1 %v5386_v27  ;;  %3349 = vmatprep.subr.bf16.mxu0 %v5388_v28  ;;  %v5399_v41 = vpack.c.bf16 %v101_v38, %v97_v37  ;;  %v103_v42 = vld [vmem:[#allocation2 + $0xf8] sm:$0xff]  ;;  %v100_v44 = vld [vmem:[#allocation2 + $0xe0] sm:$0xff]  ;;  %v98_v46 = vld [vmem:[#allocation2 + $0xd0] sm:$0xff] }
  0x42   :  { %3381 = vmatprep.subr.bf16.mxu1 %v5390_v32  ;;  %v5402_v45 = vpack.c.bf16 %v103_v42, %v99_v39  ;;  %v102_v47 = vld [vmem:[#allocation2 + $0xf0] sm:$0xff]  ;;  %v105_v48 = vld [vmem:[#allocation2 + $0x108] sm:$0xff]  ;;  %v107_v50 = vld [vmem:[#allocation2 + $0x118] sm:$0xff]  ;;  %v5405_v52 = vpack.c.bf16 %v100_v44, %v96_v43 }
  0x43   :  { %v109_v49 = vld [vmem:[#allocation2 + $0x128] sm:$0xff]  ;;  %v111_v51 = vld [vmem:[#allocation2 + $0x138] sm:$0xff]  ;;  %v5409_v53 = vpack.c.bf16 %v102_v47, %v98_v46  ;;  %v104_v55 = vld [vmem:[#allocation2 + $0x100] sm:$0xff] }
  0x44   :  { %3351 = vmatpush1.bf16.msra.mxu0 %v5393_v36  ;;  %v5411_v54 = vpack.c.bf16 %v109_v49, %v105_v48  ;;  %v108_v56 = vld [vmem:[#allocation2 + $0x120] sm:$0xff]  ;;  %v106_v57 = vld [vmem:[#allocation2 + $0x110] sm:$0xff]  ;;  %v5414_v58 = vpack.c.bf16 %v111_v51, %v107_v50  ;;  %v113_v60 = vld [vmem:[#allocation2 + $0x148] sm:$0xff] }
  0x45   :  { %3383 = vmatpush1.bf16.msra.mxu1 %v5397_v40  ;;  %3353 = vmatprep.subr.bf16.mxu0 %v5399_v41  ;;  %v110_v59 = vld [vmem:[#allocation2 + $0x130] sm:$0xff]  ;;  %v117_v61 = vld [vmem:[#allocation2 + $0x168] sm:$0xff]  ;;  %v115_v62 = vld [vmem:[#allocation2 + $0x158] sm:$0xff]  ;;  %v5417_v1 = vpack.c.bf16 %v108_v56, %v104_v55 }
  0x46   :  { %3385 = vmatprep.subr.bf16.mxu1 %v5402_v45  ;;  %v119_v63 = vld [vmem:[#allocation2 + $0x178] sm:$0xff]  ;;  %v5421_v2 = vpack.c.bf16 %v110_v59, %v106_v57  ;;  %v5423_v3 = vpack.c.bf16 %v117_v61, %v113_v60  ;;  %v112_v4 = vld [vmem:[#allocation2 + $0x140] sm:$0xff]  ;;  %v114_v7 = vld [vmem:[#allocation2 + $0x150] sm:$0xff] }
  0x47   :  { %v116_v6 = vld [vmem:[#allocation2 + $0x160] sm:$0xff]  ;;  %v5426_v8 = vpack.c.bf16 %v119_v63, %v115_v62  ;;  %v118_v11 = vld [vmem:[#allocation2 + $0x170] sm:$0xff]  ;;  %v121_v12 = vld [vmem:[#allocation2 + $0x188] sm:$0xff] }
  0x48   :  { %3355 = vmatpush1.bf16.msra.mxu0 %v5405_v52  ;;  %v125_v13 = vld [vmem:[#allocation2 + $0x1a8] sm:$0xff]  ;;  %v123_v15 = vld [vmem:[#allocation2 + $0x198] sm:$0xff]  ;;  %v5429_v17 = vpack.c.bf16 %v116_v6, %v112_v4  ;;  %v120_v20 = vld [vmem:[#allocation2 + $0x180] sm:$0xff]  ;;  %v5433_v21 = vpack.c.bf16 %v118_v11, %v114_v7 }
  0x49   :  { %3387 = vmatpush1.bf16.msra.mxu1 %v5409_v53  ;;  %3357 = vmatprep.subr.bf16.mxu0 %v5411_v54  ;;  %v127_v16 = vld [vmem:[#allocation2 + $0x1b8] sm:$0xff]  ;;  %v5435_v22 = vpack.c.bf16 %v125_v13, %v121_v12  ;;  %v124_v24 = vld [vmem:[#allocation2 + $0x1a0] sm:$0xff]  ;;  %v122_v25 = vld [vmem:[#allocation2 + $0x190] sm:$0xff] }
  0x4a   :  { %3389 = vmatprep.subr.bf16.mxu1 %v5414_v58  ;;  %v283_v26 = vld [vmem:[%s6589_s0] sm:$0xff]  ;;  %v5441_v29 = vpack.c.bf16 %v127_v16, %v123_v15  ;;  %v126_v30 = vld [vmem:[#allocation2 + $0x1b0] sm:$0xff]  ;;  %v129_v31 = vld [vmem:[#allocation2 + $0x1c8] sm:$0xff]  ;;  %v5447_v38 = vpack.c.bf16 %v124_v24, %v120_v20 }
  0x4b   :  { %v133_v33 = vld [vmem:[#allocation2 + $0x1e8] sm:$0xff]  ;;  %293 = vperm.xlu0 %4912, %v283_v26   ;;  %v131_v34 = vld [vmem:[#allocation2 + $0x1d8] sm:$0xff]  ;;  %v5451_v39 = vpack.c.bf16 %v126_v30, %v122_v25  ;;  %v128_v43 = vld [vmem:[#allocation2 + $0x1c0] sm:$0xff] }
  0x4c   :  { %3359 = vmatpush1.bf16.msra.mxu0 %v5417_v1  ;;  %v135_v35 = vld [vmem:[#allocation2 + $0x1f8] sm:$0xff]  ;;  %v284_v37 = vld [vmem:[%s6589_s0 + $0x8] sm:$0xff]  ;;  %v5453_v42 = vpack.c.bf16 %v133_v33, %v129_v31  ;;  %v132_v44 = vld [vmem:[#allocation2 + $0x1e0] sm:$0xff] }
  0x4d   :  { %3391 = vmatpush1.bf16.msra.mxu1 %v5421_v2  ;;  %3361 = vmatprep.subr.bf16.mxu0 %v5423_v3  ;;  %v130_v46 = vld [vmem:[#allocation2 + $0x1d0] sm:$0xff]  ;;  %v5456_v47 = vpack.c.bf16 %v135_v35, %v131_v34  ;;  %v138_v49 = vld [vmem:[#allocation5 + $0x8] sm:$0xff]  ;;  %v287_v51 = vld [vmem:[%s6589_s0 + $0x20] sm:$0xff]  ;;  %v5462_v57 = vpack.c.bf16 %v132_v44, %v128_v43 }
  0x4e   :  { %3393 = vmatprep.subr.bf16.mxu1 %v5426_v8  ;;  %v134_v48 = vld [vmem:[#allocation2 + $0x1f0] sm:$0xff]  ;;  %v142_v50 = vld [vmem:[#allocation5 + $0x28] sm:$0xff]  ;;  %v140_v55 = vld [vmem:[#allocation5 + $0x18] sm:$0xff] }
  0x4f   :  { %298 = vperm.xlu0 %4912, %v284_v37   ;;  %v144_v56 = vld [vmem:[#allocation5 + $0x38] sm:$0xff]  ;;  %v5466_v59 = vpack.c.bf16 %v134_v48, %v130_v46  ;;  %v5468_v60 = vpack.c.bf16 %v142_v50, %v138_v49  ;;  %v137_v61 = vld [vmem:[#allocation5] sm:$0xff]  ;;  %v139_v63 = vld [vmem:[#allocation5 + $0x10] sm:$0xff] }
  0x50   :  { %3363 = vmatpush1.bf16.msra.mxu0 %v5429_v17  ;;  %v141_v62 = vld [vmem:[#allocation5 + $0x20] sm:$0xff]  ;;  %v5471_v4 = vpack.c.bf16 %v144_v56, %v140_v55  ;;  %v143_v6 = vld [vmem:[#allocation5 + $0x30] sm:$0xff]  ;;  %v146_v7 = vld [vmem:[#allocation5 + $0x48] sm:$0xff] }
  0x51   :  { %3395 = vmatpush1.bf16.msra.mxu1 %v5433_v21  ;;  %3365 = vmatprep.subr.bf16.mxu0 %v5435_v22  ;;  %v150_v11 = vld [vmem:[#allocation5 + $0x68] sm:$0xff]  ;;  %v289_v12 = vld [vmem:[%s6589_s0 + $0x30] sm:$0xff]  ;;  %v148_v13 = vld [vmem:[#allocation5 + $0x58] sm:$0xff]  ;;  %v5477_v16 = vpack.c.bf16 %v141_v62, %v137_v61  ;;  %v5481_v20 = vpack.c.bf16 %v143_v6, %v139_v63 }
  0x52   :  { %3397 = vmatprep.subr.bf16.mxu1 %v5441_v29  ;;  %v152_v15 = vld [vmem:[#allocation5 + $0x78] sm:$0xff]  ;;  %v5483_v24 = vpack.c.bf16 %v150_v11, %v146_v7  ;;  %v145_v25 = vld [vmem:[#allocation5 + $0x40] sm:$0xff]  ;;  %v147_v30 = vld [vmem:[#allocation5 + $0x50] sm:$0xff] }
  0x53   :  { %313 = vperm.xlu0 %4912, %v287_v51   ;;  %v149_v26 = vld [vmem:[#allocation5 + $0x60] sm:$0xff]  ;;  %v5486_v31 = vpack.c.bf16 %v152_v15, %v148_v13  ;;  %v151_v33 = vld [vmem:[#allocation5 + $0x70] sm:$0xff]  ;;  %v154_v34 = vld [vmem:[#allocation5 + $0x88] sm:$0xff] }
  0x54   :  { %3367 = vmatpush1.bf16.msra.mxu0 %v5447_v38  ;;  %v158_v35 = vld [vmem:[#allocation5 + $0xa8] sm:$0xff]  ;;  %v156_v37 = vld [vmem:[#allocation5 + $0x98] sm:$0xff]  ;;  %v5491_v44 = vpack.c.bf16 %v149_v26, %v145_v25  ;;  %v5495_v46 = vpack.c.bf16 %v151_v33, %v147_v30  ;;  %v153_v49 = vld [vmem:[#allocation5 + $0x80] sm:$0xff] }
  0x55   :  { %3399 = vmatpush1.bf16.msra.mxu1 %v5451_v39  ;;  %3369 = vmatprep.subr.bf16.mxu0 %v5453_v42  ;;  %6745 = vst [vmem:[#allocation14_spill] sm:$0xff] %v5486_v31  ;;  %v160_v43 = vld [vmem:[#allocation5 + $0xb8] sm:$0xff]  ;;  %v5497_v48 = vpack.c.bf16 %v158_v35, %v154_v34  ;;  %v157_v50 = vld [vmem:[#allocation5 + $0xa0] sm:$0xff]  ;;  %v155_v51 = vld [vmem:[#allocation5 + $0x90] sm:$0xff] }
  0x56   :  { %3401 = vmatprep.subr.bf16.mxu1 %v5456_v47  ;;  %6746 = vst [vmem:[#allocation15_spill] sm:$0xff] %v5491_v44  ;;  %6747 = vst [vmem:[#allocation16_spill] sm:$0xff] %v5495_v46  ;;  %v5500_v55 = vpack.c.bf16 %v160_v43, %v156_v37  ;;  %v159_v56 = vld [vmem:[#allocation5 + $0xb0] sm:$0xff]  ;;  %v162_v61 = vld [vmem:[#allocation5 + $0xc8] sm:$0xff]  ;;  %v5505_v7 = vpack.c.bf16 %v157_v50, %v153_v49 }
  0x57   :  { %323 = vperm.xlu0 %4912, %v289_v12   ;;  %6748 = vst [vmem:[#allocation17_spill] sm:$0xff] %v5497_v48  ;;  %v166_v62 = vld [vmem:[#allocation5 + $0xe8] sm:$0xff]  ;;  %v164_v63 = vld [vmem:[#allocation5 + $0xd8] sm:$0xff]  ;;  %v5509_v11 = vpack.c.bf16 %v159_v56, %v155_v51  ;;  %v161_v13 = vld [vmem:[#allocation5 + $0xc0] sm:$0xff] }
  0x58   :  { %3371 = vmatpush1.bf16.msra.mxu0 %v5462_v57  ;;  %6749 = vst [vmem:[#allocation18_spill] sm:$0xff] %v5500_v55  ;;  %v168_v6 = vld [vmem:[#allocation5 + $0xf8] sm:$0xff]  ;;  %6750 = vst [vmem:[#allocation19_spill] sm:$0xff] %v5505_v7  ;;  %v5511_v12 = vpack.c.bf16 %v166_v62, %v162_v61  ;;  %v165_v15 = vld [vmem:[#allocation5 + $0xe0] sm:$0xff] }
  0x59   :  { %3403 = vmatpush1.bf16.msra.mxu1 %v5466_v59  ;;  %3405 = vmatprep.subr.bf16.mxu0 %v5468_v60  ;;  %6751 = vst [vmem:[#allocation20_spill] sm:$0xff] %v5509_v11  ;;  %v163_v25 = vld [vmem:[#allocation5 + $0xd0] sm:$0xff]  ;;  %v5514_v26 = vpack.c.bf16 %v168_v6, %v164_v63  ;;  %v170_v33 = vld [vmem:[#allocation5 + $0x108] sm:$0xff]  ;;  %v172_v35 = vld [vmem:[#allocation5 + $0x118] sm:$0xff]  ;;  %v5517_v43 = vpack.c.bf16 %v165_v15, %v161_v13 }
  0x5a   :  { %3469 = vmatprep.subr.bf16.mxu1 %v5471_v4  ;;  %6752 = vst [vmem:[#allocation21_spill] sm:$0xff] %v5511_v12  ;;  %v167_v30 = vld [vmem:[#allocation5 + $0xf0] sm:$0xff]  ;;  %v174_v34 = vld [vmem:[#allocation5 + $0x128] sm:$0xff]  ;;  %v176_v37 = vld [vmem:[#allocation5 + $0x138] sm:$0xff] }
  0x5b   :  { %523 = vmatmul.mubr.f32.vlgmr.msra.gmra.mrb[0].mxu0 %v6598_v0  ;;  %6753 = vst [vmem:[#allocation22_spill] sm:$0xff] %v5514_v26  ;;  %6754 = vst [vmem:[#allocation23_spill] sm:$0xff] %v5517_v43  ;;  %v5521_v49 = vpack.c.bf16 %v167_v30, %v163_v25  ;;  %v5523_v50 = vpack.c.bf16 %v174_v34, %v170_v33  ;;  %v169_v51 = vld [vmem:[#allocation5 + $0x100] sm:$0xff]  ;;  %v5526_v61 = vpack.c.bf16 %v176_v37, %v172_v35  ;;  %v171_v62 = vld [vmem:[#allocation5 + $0x110] sm:$0xff] }
  0x5c   :  { %594 = vmatmul.mubr.f32.vlgmr.msra.gmra.mrb[0].mxu1 %v6598_v0  ;;  %3407 = vmatpush1.bf16.msra.mxu0 %v5477_v16  ;;  %v173_v56 = vld [vmem:[#allocation5 + $0x120] sm:$0xff]  ;;  %v175_v63 = vld [vmem:[#allocation5 + $0x130] sm:$0xff]  ;;  %v178_v15 = vld [vmem:[#allocation5 + $0x148] sm:$0xff] }
  0x5d   :  { %3471 = vmatpush1.bf16.msra.mxu1 %v5481_v20  ;;  %3409 = vmatprep.subr.bf16.mxu0 %v5483_v24  ;;  %6755 = vst [vmem:[#allocation24_spill] sm:$0xff] %v5521_v49  ;;  %6756 = vst [vmem:[#allocation25_spill] sm:$0xff] %v5523_v50  ;;  %v5529_v6 = vpack.c.bf16 %v173_v56, %v169_v51  ;;  %v5533_v13 = vpack.c.bf16 %v175_v63, %v171_v62  ;;  %v182_v25 = vld [vmem:[#allocation5 + $0x168] sm:$0xff]  ;;  %v180_v30 = vld [vmem:[#allocation5 + $0x158] sm:$0xff] }
  0x5e   :  { %3473 = vmatprep.subr.bf16.mxu1 %v5486_v31  ;;  %692 = vmatprep.mubr.f32.mxu0 %v6598_v0  ;;  %6757 = vst [vmem:[#allocation26_spill] sm:$0xff] %v5526_v61  ;;  %v5538_v33 = vpack.c.bf16 %v182_v25, %v178_v15  ;;  %v184_v34 = vld [vmem:[#allocation5 + $0x178] sm:$0xff]  ;;  %v177_v35 = vld [vmem:[#allocation5 + $0x140] sm:$0xff]  ;;  %v179_v62 = vld [vmem:[#allocation5 + $0x150] sm:$0xff] }
  0x5f   :  { %763 = vmatprep.mubr.f32.mxu1 %v6598_v0  ;;  %6758 = vst [vmem:[#allocation27_spill] sm:$0xff] %v5529_v6  ;;  %6759 = vst [vmem:[#allocation28_spill] sm:$0xff] %v5533_v13  ;;  %v181_v37 = vld [vmem:[#allocation5 + $0x160] sm:$0xff]  ;;  %v5540_v51 = vpack.c.bf16 %v184_v34, %v180_v30  ;;  %v183_v63 = vld [vmem:[#allocation5 + $0x170] sm:$0xff] }
  0x60   :  { %3411 = vmatpush1.bf16.msra.mxu0 %v5491_v44  ;;  %6760 = vst [vmem:[#allocation29_spill] sm:$0xff] %v5538_v33  ;;  %v5542_v56 = vpack.c.bf16 %v181_v37, %v177_v35  ;;  %v5545_v0 = vpack.c.bf16 %v183_v63, %v179_v62  ;;  %v190_v15 = vld [vmem:[#allocation5 + $0x1a8] sm:$0xff]  ;;  %v188_v25 = vld [vmem:[#allocation5 + $0x198] sm:$0xff]  ;;  %v185_v34 = vld [vmem:[#allocation5 + $0x180] sm:$0xff] }
  0x61   :  { %3475 = vmatpush1.bf16.msra.mxu1 %v5495_v46  ;;  %3413 = vmatprep.subr.bf16.mxu0 %v5497_v48  ;;  %6761 = vst [vmem:[#allocation30_spill] sm:$0xff] %v5540_v51  ;;  %v192_v30 = vld [vmem:[#allocation5 + $0x1b8] sm:$0xff]  ;;  %v189_v35 = vld [vmem:[#allocation5 + $0x1a0] sm:$0xff]  ;;  %v187_v62 = vld [vmem:[#allocation5 + $0x190] sm:$0xff] }
  0x62   :  { %3477 = vmatprep.subr.bf16.mxu1 %v5500_v55  ;;  %6762 = vst [vmem:[#allocation31_spill] sm:$0xff] %v5542_v56  ;;  %6763 = vst [vmem:[#allocation32_spill] sm:$0xff] %v5545_v0  ;;  %v5552_v37 = vpack.c.bf16 %v192_v30, %v188_v25  ;;  %v191_v63 = vld [vmem:[#allocation5 + $0x1b0] sm:$0xff]  ;;  %v200_v25 = vld [vmem:[#allocation5 + $0x1f8] sm:$0xff] }
  0x63   :  { %v193_v30 = vld [vmem:[#allocation5 + $0x1c0] sm:$0xff] }
  0x64   :  { %3415 = vmatpush1.bf16.msra.mxu0 %v5505_v7  ;;  %6765 = vst [vmem:[#allocation34_spill] sm:$0xff] %v5552_v37 }
  0x65   :  { %3479 = vmatpush1.bf16.msra.mxu1 %v5509_v11  ;;  %3417 = vmatprep.subr.bf16.mxu0 %v5511_v12 }
  0x66   :  { %3481 = vmatprep.subr.bf16.mxu1 %v5514_v26  ;;  %v251_v26 = vld [vmem:[#allocation5 + $0x390] sm:$0xff] }
  0x68   :  { %3419 = vmatpush1.bf16.msra.mxu0 %v5517_v43  ;;  %v253_v43 = vld [vmem:[#allocation5 + $0x3a0] sm:$0xff] }
  0x69   :  { %3483 = vmatpush1.bf16.msra.mxu1 %v5521_v49  ;;  %3421 = vmatprep.subr.bf16.mxu0 %v5523_v50  ;;  %v250_v50 = vld [vmem:[#allocation5 + $0x388] sm:$0xff]  ;;  %v256_v49 = vld [vmem:[#allocation5 + $0x3b8] sm:$0xff] }
  0x6a   :  { %3485 = vmatprep.subr.bf16.mxu1 %v5526_v61  ;;  %v5554_v61 = vpack.c.bf16 %v189_v35, %v185_v34  ;;  %v197_v34 = vld [vmem:[#allocation5 + $0x1e0] sm:$0xff] }
  0x6c   :  { %3423 = vmatpush1.bf16.msra.mxu0 %v5529_v6  ;;  %6766 = vst [vmem:[#allocation35_spill] sm:$0xff] %v5554_v61 }
  0x6d   :  { %3487 = vmatpush1.bf16.msra.mxu1 %v5533_v13  ;;  %3425 = vmatprep.subr.bf16.mxu0 %v5538_v33  ;;  %v186_v13 = vld [vmem:[#allocation5 + $0x188] sm:$0xff]  ;;  %v5566_v33 = vpack.c.bf16 %v197_v34, %v193_v30  ;;  %v205_v30 = vld [vmem:[#allocation5 + $0x220] sm:$0xff] }
  0x6e   :  { %3489 = vmatprep.subr.bf16.mxu1 %v5540_v51  ;;  %v5550_v6 = vpack.c.bf16 %v190_v15, %v186_v13  ;;  %v5557_v51 = vpack.c.bf16 %v191_v63, %v187_v62  ;;  %v198_v13 = vld [vmem:[#allocation5 + $0x1e8] sm:$0xff]  ;;  %v196_v15 = vld [vmem:[#allocation5 + $0x1d8] sm:$0xff]  ;;  %v195_v62 = vld [vmem:[#allocation5 + $0x1d0] sm:$0xff] }
  0x6f   :  { %v5564_v35 = vpack.c.bf16 %v200_v25, %v196_v15  ;;  %6770 = vst [vmem:[#allocation39_spill] sm:$0xff] %v5566_v33  ;;  %v199_v63 = vld [vmem:[#allocation5 + $0x1f0] sm:$0xff]  ;;  %v208_v15 = vld [vmem:[#allocation5 + $0x238] sm:$0xff]  ;;  %v201_v25 = vld [vmem:[#allocation5 + $0x200] sm:$0xff] }
  0x70   :  { %3427 = vmatpush1.bf16.msra.mxu0 %v5542_v56  ;;  %6764 = vst [vmem:[#allocation33_spill] sm:$0xff] %v5550_v6  ;;  %6767 = vst [vmem:[#allocation36_spill] sm:$0xff] %v5557_v51 }
  0x71   :  { %3491 = vmatpush1.bf16.msra.mxu1 %v5545_v0  ;;  %3429 = vmatprep.subr.bf16.mxu0 %v5550_v6  ;;  %v194_v0 = vld [vmem:[#allocation5 + $0x1c8] sm:$0xff]  ;;  %6769 = vst [vmem:[#allocation38_spill] sm:$0xff] %v5564_v35  ;;  %v5578_v6 = vpack.c.bf16 %v205_v30, %v201_v25  ;;  %v213_v25 = vld [vmem:[#allocation5 + $0x260] sm:$0xff] }
  0x72   :  { %3493 = vmatprep.subr.bf16.mxu1 %v5552_v37  ;;  %v5562_v56 = vpack.c.bf16 %v198_v13, %v194_v0  ;;  %v5569_v37 = vpack.c.bf16 %v199_v63, %v195_v62  ;;  %v206_v0 = vld [vmem:[#allocation5 + $0x228] sm:$0xff]  ;;  %v204_v13 = vld [vmem:[#allocation5 + $0x218] sm:$0xff]  ;;  %v203_v62 = vld [vmem:[#allocation5 + $0x210] sm:$0xff] }
  0x73   :  { %v5576_v34 = vpack.c.bf16 %v208_v15, %v204_v13  ;;  %6774 = vst [vmem:[#allocation43_spill] sm:$0xff] %v5578_v6  ;;  %v207_v63 = vld [vmem:[#allocation5 + $0x230] sm:$0xff]  ;;  %v216_v13 = vld [vmem:[#allocation5 + $0x278] sm:$0xff]  ;;  %v209_v15 = vld [vmem:[#allocation5 + $0x240] sm:$0xff] }
  0x74   :  { %3431 = vmatpush1.bf16.msra.mxu0 %v5554_v61  ;;  %6768 = vst [vmem:[#allocation37_spill] sm:$0xff] %v5562_v56  ;;  %6771 = vst [vmem:[#allocation40_spill] sm:$0xff] %v5569_v37 }
  0x75   :  { %3495 = vmatpush1.bf16.msra.mxu1 %v5557_v51  ;;  %3433 = vmatprep.subr.bf16.mxu0 %v5562_v56  ;;  %v202_v51 = vld [vmem:[#allocation5 + $0x208] sm:$0xff]  ;;  %6773 = vst [vmem:[#allocation42_spill] sm:$0xff] %v5576_v34  ;;  %v5590_v56 = vpack.c.bf16 %v213_v25, %v209_v15  ;;  %v221_v15 = vld [vmem:[#allocation5 + $0x2a0] sm:$0xff] }
  0x76   :  { %3497 = vmatprep.subr.bf16.mxu1 %v5564_v35  ;;  %v5574_v61 = vpack.c.bf16 %v206_v0, %v202_v51  ;;  %v5581_v35 = vpack.c.bf16 %v207_v63, %v203_v62  ;;  %v214_v51 = vld [vmem:[#allocation5 + $0x268] sm:$0xff]  ;;  %v212_v0 = vld [vmem:[#allocation5 + $0x258] sm:$0xff]  ;;  %v211_v62 = vld [vmem:[#allocation5 + $0x250] sm:$0xff] }
  0x77   :  { %v5588_v30 = vpack.c.bf16 %v216_v13, %v212_v0  ;;  %6778 = vst [vmem:[#allocation47_spill] sm:$0xff] %v5590_v56  ;;  %v215_v63 = vld [vmem:[#allocation5 + $0x270] sm:$0xff]  ;;  %v224_v0 = vld [vmem:[#allocation5 + $0x2b8] sm:$0xff]  ;;  %v217_v13 = vld [vmem:[#allocation5 + $0x280] sm:$0xff] }
  0x78   :  { %3435 = vmatpush1.bf16.msra.mxu0 %v5566_v33  ;;  %6772 = vst [vmem:[#allocation41_spill] sm:$0xff] %v5574_v61  ;;  %6775 = vst [vmem:[#allocation44_spill] sm:$0xff] %v5581_v35 }
  0x79   :  { %3499 = vmatpush1.bf16.msra.mxu1 %v5569_v37  ;;  %3437 = vmatprep.subr.bf16.mxu0 %v5574_v61  ;;  %v210_v37 = vld [vmem:[#allocation5 + $0x248] sm:$0xff]  ;;  %6777 = vst [vmem:[#allocation46_spill] sm:$0xff] %v5588_v30  ;;  %v5602_v61 = vpack.c.bf16 %v221_v15, %v217_v13  ;;  %v229_v13 = vld [vmem:[#allocation5 + $0x2e0] sm:$0xff] }
  0x7a   :  { %3501 = vmatprep.subr.bf16.mxu1 %v5576_v34  ;;  %v5586_v33 = vpack.c.bf16 %v214_v51, %v210_v37  ;;  %v5593_v34 = vpack.c.bf16 %v215_v63, %v211_v62  ;;  %v222_v37 = vld [vmem:[#allocation5 + $0x2a8] sm:$0xff]  ;;  %v220_v51 = vld [vmem:[#allocation5 + $0x298] sm:$0xff]  ;;  %v219_v62 = vld [vmem:[#allocation5 + $0x290] sm:$0xff] }
  0x7b   :  { %v5600_v25 = vpack.c.bf16 %v224_v0, %v220_v51  ;;  %6782 = vst [vmem:[#allocation51_spill] sm:$0xff] %v5602_v61  ;;  %v223_v63 = vld [vmem:[#allocation5 + $0x2b0] sm:$0xff]  ;;  %v232_v51 = vld [vmem:[#allocation5 + $0x2f8] sm:$0xff]  ;;  %v225_v0 = vld [vmem:[#allocation5 + $0x2c0] sm:$0xff] }
  0x7c   :  { %3439 = vmatpush1.bf16.msra.mxu0 %v5578_v6  ;;  %6776 = vst [vmem:[#allocation45_spill] sm:$0xff] %v5586_v33  ;;  %6779 = vst [vmem:[#allocation48_spill] sm:$0xff] %v5593_v34 }
  0x7d   :  { %3503 = vmatpush1.bf16.msra.mxu1 %v5581_v35  ;;  %3441 = vmatprep.subr.bf16.mxu0 %v5586_v33  ;;  %v218_v35 = vld [vmem:[#allocation5 + $0x288] sm:$0xff]  ;;  %6781 = vst [vmem:[#allocation50_spill] sm:$0xff] %v5600_v25  ;;  %v5614_v33 = vpack.c.bf16 %v229_v13, %v225_v0  ;;  %v237_v0 = vld [vmem:[#allocation5 + $0x320] sm:$0xff] }
  0x7e   :  { %3505 = vmatprep.subr.bf16.mxu1 %v5588_v30  ;;  %v5598_v6 = vpack.c.bf16 %v222_v37, %v218_v35  ;;  %v5605_v30 = vpack.c.bf16 %v223_v63, %v219_v62  ;;  %v230_v35 = vld [vmem:[#allocation5 + $0x2e8] sm:$0xff]  ;;  %v228_v37 = vld [vmem:[#allocation5 + $0x2d8] sm:$0xff]  ;;  %v227_v62 = vld [vmem:[#allocation5 + $0x2d0] sm:$0xff] }
  0x7f   :  { %v5612_v15 = vpack.c.bf16 %v232_v51, %v228_v37  ;;  %6786 = vst [vmem:[#allocation55_spill] sm:$0xff] %v5614_v33  ;;  %v231_v63 = vld [vmem:[#allocation5 + $0x2f0] sm:$0xff]  ;;  %v240_v37 = vld [vmem:[#allocation5 + $0x338] sm:$0xff]  ;;  %v233_v51 = vld [vmem:[#allocation5 + $0x300] sm:$0xff] }
  0x80   :  { %3443 = vmatpush1.bf16.msra.mxu0 %v5590_v56  ;;  %6780 = vst [vmem:[#allocation49_spill] sm:$0xff] %v5598_v6  ;;  %6783 = vst [vmem:[#allocation52_spill] sm:$0xff] %v5605_v30 }
  0x81   :  { %3507 = vmatpush1.bf16.msra.mxu1 %v5593_v34  ;;  %3445 = vmatprep.subr.bf16.mxu0 %v5598_v6  ;;  %v226_v34 = vld [vmem:[#allocation5 + $0x2c8] sm:$0xff]  ;;  %6785 = vst [vmem:[#allocation54_spill] sm:$0xff] %v5612_v15  ;;  %v5626_v6 = vpack.c.bf16 %v237_v0, %v233_v51  ;;  %v243_v51 = vld [vmem:[#allocation5 + $0x350] sm:$0xff] }
  0x82   :  { %3509 = vmatprep.subr.bf16.mxu1 %v5600_v25  ;;  %v5610_v56 = vpack.c.bf16 %v230_v35, %v226_v34  ;;  %v5617_v25 = vpack.c.bf16 %v231_v63, %v227_v62  ;;  %v238_v34 = vld [vmem:[#allocation5 + $0x328] sm:$0xff]  ;;  %v236_v35 = vld [vmem:[#allocation5 + $0x318] sm:$0xff]  ;;  %v235_v62 = vld [vmem:[#allocation5 + $0x310] sm:$0xff] }
  0x83   :  { %v5624_v13 = vpack.c.bf16 %v240_v37, %v236_v35  ;;  %6790 = vst [vmem:[#allocation59_spill] sm:$0xff] %v5626_v6  ;;  %v239_v63 = vld [vmem:[#allocation5 + $0x330] sm:$0xff]  ;;  %v241_v35 = vld [vmem:[#allocation5 + $0x340] sm:$0xff] }
  0x84   :  { %3447 = vmatpush1.bf16.msra.mxu0 %v5602_v61  ;;  %6784 = vst [vmem:[#allocation53_spill] sm:$0xff] %v5610_v56  ;;  %6787 = vst [vmem:[#allocation56_spill] sm:$0xff] %v5617_v25  ;;  %v245_v37 = vld [vmem:[#allocation5 + $0x360] sm:$0xff]  ;;  %v247_v0 = vld [vmem:[#allocation5 + $0x370] sm:$0xff] }
  0x85   :  { %3511 = vmatpush1.bf16.msra.mxu1 %v5605_v30  ;;  %3449 = vmatprep.subr.bf16.mxu0 %v5610_v56  ;;  %v234_v30 = vld [vmem:[#allocation5 + $0x308] sm:$0xff]  ;;  %6789 = vst [vmem:[#allocation58_spill] sm:$0xff] %v5624_v13 }
  0x86   :  { %3513 = vmatprep.subr.bf16.mxu1 %v5612_v15  ;;  %v5622_v61 = vpack.c.bf16 %v238_v34, %v234_v30  ;;  %v5629_v15 = vpack.c.bf16 %v239_v63, %v235_v62  ;;  %v246_v56 = vld [vmem:[#allocation5 + $0x368] sm:$0xff]  ;;  %v248_v34 = vld [vmem:[#allocation5 + $0x378] sm:$0xff]  ;;  %v5639_v63 = vpack.c.bf16 %v245_v37, %v241_v35 }
  0x87   :  { %v258_v35 = vld [vmem:[#allocation5 + $0x3c8] sm:$0xff] }
  0x88   :  { %3451 = vmatpush1.bf16.msra.mxu0 %v5614_v33  ;;  %6788 = vst [vmem:[#allocation57_spill] sm:$0xff] %v5622_v61  ;;  %6791 = vst [vmem:[#allocation60_spill] sm:$0xff] %v5629_v15  ;;  %v242_v33 = vld [vmem:[#allocation5 + $0x348] sm:$0xff] }
  0x89   :  { %3515 = vmatpush1.bf16.msra.mxu1 %v5617_v25  ;;  %3453 = vmatprep.subr.bf16.mxu0 %v5622_v61  ;;  %v244_v25 = vld [vmem:[#allocation5 + $0x358] sm:$0xff]  ;;  %v5634_v30 = vpack.c.bf16 %v246_v56, %v242_v33  ;;  %6794 = vst [vmem:[#allocation63_spill] sm:$0xff] %v5639_v63  ;;  %v254_v61 = vld [vmem:[#allocation5 + $0x3a8] sm:$0xff]  ;;  %v249_v56 = vld [vmem:[#allocation5 + $0x380] sm:$0xff] }
  0x8a   :  { %3517 = vmatprep.subr.bf16.mxu1 %v5624_v13  ;;  %v5637_v62 = vpack.c.bf16 %v248_v34, %v244_v25  ;;  %v5641_v13 = vpack.c.bf16 %v247_v0, %v243_v51  ;;  %v5649_v25 = vpack.c.bf16 %v253_v43, %v249_v56  ;;  %v255_v34 = vld [vmem:[#allocation5 + $0x3b0] sm:$0xff]  ;;  %v262_v37 = vld [vmem:[#allocation5 + $0x3e8] sm:$0xff]  ;;  %v257_v51 = vld [vmem:[#allocation5 + $0x3c0] sm:$0xff] }
  0x8b   :  { %6792 = vst [vmem:[#allocation61_spill] sm:$0xff] %v5634_v30  ;;  %v261_v43 = vld [vmem:[#allocation5 + $0x3e0] sm:$0xff]  ;;  %v259_v56 = vld [vmem:[#allocation5 + $0x3d0] sm:$0xff] }
  0x8c   :  { %3455 = vmatpush1.bf16.msra.mxu0 %v5626_v6  ;;  %6793 = vst [vmem:[#allocation62_spill] sm:$0xff] %v5637_v62  ;;  %6795 = vst [vmem:[#allocation64_spill] sm:$0xff] %v5641_v13  ;;  %v252_v6 = vld [vmem:[#allocation5 + $0x398] sm:$0xff] }
  0x8d   :  { %3519 = vmatpush1.bf16.msra.mxu1 %v5629_v15  ;;  %3457 = vmatprep.subr.bf16.mxu0 %v5634_v30  ;;  %v5643_v15 = vpack.c.bf16 %v254_v61, %v250_v50  ;;  %v5645_v33 = vpack.c.bf16 %v256_v49, %v252_v6  ;;  %6798 = vst [vmem:[#allocation67_spill] sm:$0xff] %v5649_v25  ;;  %v260_v61 = vld [vmem:[#allocation5 + $0x3d8] sm:$0xff] }
  0x8e   :  { %3521 = vmatprep.subr.bf16.mxu1 %v5637_v62  ;;  %v5653_v50 = vpack.c.bf16 %v255_v34, %v251_v26  ;;  %v5655_v49 = vpack.c.bf16 %v262_v37, %v258_v35  ;;  %v264_v6 = vld [vmem:[#allocation5 + $0x3f8] sm:$0xff]  ;;  %v5661_v62 = vpack.c.bf16 %v261_v43, %v257_v51  ;;  %v332_v34 = vlaneseq  ;;  %v136_v43 = vld [vmem:[%s6592_s3] sm:$0xf] }
  0x8f   :  { %6796 = vst [vmem:[#allocation65_spill] sm:$0xff] %v5643_v15  ;;  %6797 = vst [vmem:[#allocation66_spill] sm:$0xff] %v5645_v33  ;;  %v5658_v0 = vpack.c.bf16 %v264_v6, %v260_v61 }
  0x90   :  { %3459 = vmatpush1.bf16.msra.mxu0 %v5639_v63  ;;  %6799 = vst [vmem:[#allocation68_spill] sm:$0xff] %v5653_v50  ;;  %6800 = vst [vmem:[#allocation69_spill] sm:$0xff] %v5655_v49  ;;  %v263_v63 = vld [vmem:[#allocation5 + $0x3f0] sm:$0xff]  ;;  %v333_v35 = vshrl.u32 %v332_v34, 7 }
  0x91   :  { %3523 = vmatpush1.bf16.msra.mxu1 %v5641_v13  ;;  %3461 = vmatprep.subr.bf16.mxu0 %v5643_v15  ;;  %6801 = vst [vmem:[#allocation70_spill] sm:$0xff] %v5658_v0  ;;  %6802 = vst [vmem:[#allocation71_spill] sm:$0xff] %v5661_v62  ;;  %v5665_v26 = vpack.c.bf16 %v263_v63, %v259_v56  ;;  %v71_v63 = vld [vmem:[%s6590_s1] sm:$0xf] }
  0x92   :  { %3525 = vmatprep.subr.bf16.mxu1 %v5645_v33  ;;  %v5672_v37 = vsub.s32 0, %v333_v35  ;;  %v5674_v61 = vsub.s32 1, %v333_v35  ;;  %v5688_v34 = vsub.s32 3, %v333_v35 }
  0x93   :  { %6803 = vst [vmem:[#allocation72_spill] sm:$0xff] %v5665_v26 }
  0x94   :  { %3463 = vmatpush1.bf16.msra.mxu0 %v5649_v25  ;;  %6804 = vst [vmem:[#allocation73_spill] sm:$0xff] %v5672_v37  ;;  %6805 = vst [vmem:[#allocation74_spill] sm:$0xff] %v5674_v61  ;;  %v5680_v6 = vrot.slane %v71_v63, %v5672_v37  ;;  %v5683_v51 = vrot.slane %v71_v63, %v5674_v61 }
  0x95   :  { %3527 = vmatpush1.bf16.msra.mxu1 %v5653_v50  ;;  %3465 = vmatprep.subr.bf16.mxu0 %v5655_v49  ;;  %6808 = vst [vmem:[#allocation77_spill] sm:$0xff] %v5688_v34  ;;  %v5701_v49 = vsub.s32 2, %v333_v35 }
  0x96   :  { %3529 = vmatprep.subr.bf16.mxu1 %v5658_v0  ;;  %6806 = vst [vmem:[#allocation75_spill] sm:$0xff] %v5680_v6  ;;  %6807 = vst [vmem:[#allocation76_spill] sm:$0xff] %v5683_v51  ;;  %v5699_v0 = vrot.slane %v71_v63, %v5688_v34 }
  0x98   :  { %3467 = vmatpush1.bf16.msra.mxu0 %v5661_v62  ;;  %v5696_v62 = vrot.slane %v136_v43, %v5674_v61  ;;  %6811 = vst [vmem:[#allocation80_spill] sm:$0xff] %v5699_v0 }
  0x99   :  { %3531 = vmatpush1.bf16.msra.mxu1 %v5665_v26  ;;  %3533 = vmatprep.subr.bf16.mxu0 %v5366_v5  ;;  %v5692_v5 = vrot.slane %v136_v43, %v5672_v37  ;;  %v5707_v37 = vrot.slane %v136_v43, %v5688_v34 }
  0x9a   :  { %3565 = vmatprep.subr.bf16.mxu1 %v5368_v9  ;;  %6810 = vst [vmem:[#allocation79_spill] sm:$0xff] %v5696_v62 }
  0x9b   :  { %6809 = vst [vmem:[#allocation78_spill] sm:$0xff] %v5692_v5 }
  0xca   :  { %v294_v56 = vpop.permute.xlu0 %293 }
  0xcb   :  { %v352_v9 = vmul.f32 %v5680_v6, %v294_v56  ;;  %v353_v26 = vmul.f32 %v5683_v51, %v294_v56  ;;  %v355_v6 = vmul.f32 %v5699_v0, %v294_v56  ;;  %v5710_v51 = vrot.slane %v71_v63, %v5701_v49 }
  0xcc   :  { %v5715_v0 = vrot.slane %v136_v43, %v5701_v49 }
  0xcd   :  { %v405_v50 = vadd.f32 %v5692_v5, %v352_v9  ;;  %v406_v25 = vadd.f32 %v5696_v62, %v353_v26  ;;  %v408_v9 = vadd.f32 %v5707_v37, %v355_v6  ;;  %v354_v26 = vmul.f32 %v5710_v51, %v294_v56 }
  0xcf   :  { %v407_v63 = vadd.f32 %v5715_v0, %v354_v26  ;;  %v6814_v26 = vld [vmem:[#allocation21_spill] sm:$0xff] }
 0x12e   :  { %v524_v33 = vpop.f32.mrb[0].mxu0 }
 0x12f   :  { %v600_v61 = vadd.f32 %v524_v33, %v405_v50  ;;  %v595_v15 = vpop.f32.mrb[0].mxu1  ;;  %v526_v13 = vpop.f32.mrb[1].mxu0 }
 0x130   :  { %v601_v30 = vadd.f32 %v526_v13, %v406_v25  ;;  %v597_v12 = vpop.f32.mrb[1].mxu1  ;;  %v602_v33 = vadd.f32 %v595_v15, %v407_v63  ;;  %v6815_v63 = vld [vmem:[#allocation22_spill] sm:$0xff] }
 0x131   :  { %v3239_v35 = vmul.f32 -1.442695, %v600_v61  ;;  %v603_v62 = vadd.f32 %v597_v12, %v408_v9 }
 0x132   :  { %v3240_v11 = vmul.f32 -1.442695, %v601_v30 }
 0x133   :  { %4914 = vpow2.f32 %v3239_v35  ;;  %v3241_v5 = vmul.f32 -1.442695, %v603_v62 }
 0x134   :  { %4916 = vpow2.f32 %v3240_v11 }
 0x135   :  { %4918 = vpow2.f32 %v3241_v5  ;;  %v6812_v5 = vmov 0.0  }
 0x136   :  { %4920 = vtanh.f32 %v602_v33  ;;  %v6816_v33 = vld [vmem:[#allocation23_spill] sm:$0xff] }
 0x13d   :  { %v4915_v50 = vpop.eup %4914 }
 0x13e   :  { %v4917_v34 = vpop.eup %4916  ;;  %v607_v13 = vadd.f32 1.0, %v4915_v50  ;;  %v6817_v50 = vld [vmem:[#allocation24_spill] sm:$0xff] }
 0x13f   :  { %v613_v30 = vadd.f32 1.0, %v4917_v34  ;;  %v4919_v25 = vpop.eup %4918  ;;  %v6813_v34 = vld [vmem:[#allocation20_spill] sm:$0xff] }
 0x140   :  { %4922 = vrcp.f32 %v607_v13  ;;  %v4921_v61 = vpop.eup %4920  ;;  %v620_v35 = vadd.f32 1.0, %v4919_v25  ;;  %v6818_v13 = vld [vmem:[#allocation25_spill] sm:$0xff]  ;;  %v6820_v25 = vld [vmem:[#allocation27_spill] sm:$0xff] }
 0x141   :  { %4924 = vrcp.f32 %v613_v30  ;;  %v6819_v30 = vld [vmem:[#allocation26_spill] sm:$0xff] }
 0x142   :  { %4926 = vrcp.f32 %v620_v35  ;;  %v6825_v35 = vld [vmem:[#allocation32_spill] sm:$0xff] }
 0x14a   :  { %v4923_v6 = vpop.eup %4922 }
 0x14b   :  { %v4925_v56 = vpop.eup %4924  ;;  %v624_v43 = vmul.f32 %v4923_v6, %v4921_v61  ;;  %v6821_v61 = vld [vmem:[#allocation28_spill] sm:$0xff]  ;;  %v6822_v6 = vld [vmem:[#allocation29_spill] sm:$0xff] }
 0x14c   :  { %v623_v11 = vmul.f32 0.0, %v4925_v56  ;;  %v4927_v15 = vpop.eup %4926  ;;  %v6823_v56 = vld [vmem:[#allocation30_spill] sm:$0xff] }
 0x14e   :  { %v5718_v12 = vadd.f32 %v624_v43, %v623_v11  ;;  %v6824_v43 = vld [vmem:[#allocation31_spill] sm:$0xff]  ;;  %v6826_v11 = vld [vmem:[#allocation33_spill] sm:$0xff] }
 0x150   :  { %4928 = vtanh.f32 %v5718_v12 }
 0x15a   :  { %v4929_v62 = vpop.eup %4928 }
 0x15b   :  { %v627_v9 = vmul.f32 %v4929_v62, %v4927_v15  ;;  %v6827_v15 = vld [vmem:[#allocation34_spill] sm:$0xff]  ;;  %v6828_v62 = vld [vmem:[#allocation35_spill] sm:$0xff] }
 0x15d   :  { %693 = vmatmul.mubr.f32.vlgmr.msra.gmra.mrb[2].mxu0 %v627_v9  ;;  %764 = vmatmul.mubr.f32.vlgmr.msra.gmra.mrb[2].mxu1 %v627_v9 }
 0x15e   :  { %3535 = vmatpush1.bf16.msra.mxu0 %v5370_v10  ;;  %3567 = vmatpush1.bf16.msra.mxu1 %v5373_v14 }
 0x15f   :  { %3537 = vmatprep.subr.bf16.mxu0 %v5377_v18  ;;  %3569 = vmatprep.subr.bf16.mxu1 %v5379_v19 }
 0x160   :  { %858 = vmatprep.mubr.f32.mxu0 %v6812_v5  ;;  %929 = vmatprep.mubr.f32.mxu1 %v6812_v5 }
 0x162   :  { %3539 = vmatpush1.bf16.msra.mxu0 %v5382_v23  ;;  %3571 = vmatpush1.bf16.msra.mxu1 %v5386_v27 }
 0x163   :  { %3541 = vmatprep.subr.bf16.mxu0 %v5388_v28  ;;  %3573 = vmatprep.subr.bf16.mxu1 %v5390_v32 }
 0x166   :  { %3543 = vmatpush1.bf16.msra.mxu0 %v5393_v36  ;;  %3575 = vmatpush1.bf16.msra.mxu1 %v5397_v40 }
 0x167   :  { %3545 = vmatprep.subr.bf16.mxu0 %v5399_v41  ;;  %3577 = vmatprep.subr.bf16.mxu1 %v5402_v45 }
 0x16a   :  { %3547 = vmatpush1.bf16.msra.mxu0 %v5405_v52  ;;  %3579 = vmatpush1.bf16.msra.mxu1 %v5409_v53 }
 0x16b   :  { %3549 = vmatprep.subr.bf16.mxu0 %v5411_v54  ;;  %3581 = vmatprep.subr.bf16.mxu1 %v5414_v58 }
 0x16e   :  { %3551 = vmatpush1.bf16.msra.mxu0 %v5417_v1  ;;  %3583 = vmatpush1.bf16.msra.mxu1 %v5421_v2 }
 0x16f   :  { %3553 = vmatprep.subr.bf16.mxu0 %v5423_v3  ;;  %3585 = vmatprep.subr.bf16.mxu1 %v5426_v8 }
 0x172   :  { %3555 = vmatpush1.bf16.msra.mxu0 %v5429_v17  ;;  %3587 = vmatpush1.bf16.msra.mxu1 %v5433_v21 }
 0x173   :  { %3557 = vmatprep.subr.bf16.mxu0 %v5435_v22  ;;  %3589 = vmatprep.subr.bf16.mxu1 %v5441_v29 }
 0x176   :  { %3559 = vmatpush1.bf16.msra.mxu0 %v5447_v38  ;;  %3591 = vmatpush1.bf16.msra.mxu1 %v5451_v39 }
 0x177   :  { %3561 = vmatprep.subr.bf16.mxu0 %v5453_v42  ;;  %3593 = vmatprep.subr.bf16.mxu1 %v5456_v47 }
 0x17a   :  { %3563 = vmatpush1.bf16.msra.mxu0 %v5462_v57  ;;  %3595 = vmatpush1.bf16.msra.mxu1 %v5466_v59 }
 0x17b   :  { %3597 = vmatprep.subr.bf16.mxu0 %v5468_v60  ;;  %3661 = vmatprep.subr.bf16.mxu1 %v5471_v4 }
 0x17d   :  { %859 = vmatmul.mubr.f32.vlgmr.msra.gmra.mrb[4].mxu0 %v627_v9  ;;  %930 = vmatmul.mubr.f32.vlgmr.msra.gmra.mrb[4].mxu1 %v627_v9  ;;  %v6829_v9 = vld [vmem:[#allocation36_spill] sm:$0xff] }
 0x17e   :  { %3599 = vmatpush1.bf16.msra.mxu0 %v5477_v16  ;;  %3663 = vmatpush1.bf16.msra.mxu1 %v5481_v20 }
 0x17f   :  { %3601 = vmatprep.subr.bf16.mxu0 %v5483_v24  ;;  %3665 = vmatprep.subr.bf16.mxu1 %v5486_v31 }
 0x182   :  { %3603 = vmatpush1.bf16.msra.mxu0 %v5491_v44  ;;  %3667 = vmatpush1.bf16.msra.mxu1 %v5495_v46 }
 0x183   :  { %3605 = vmatprep.subr.bf16.mxu0 %v5497_v48  ;;  %3669 = vmatprep.subr.bf16.mxu1 %v5500_v55 }
 0x186   :  { %3607 = vmatpush1.bf16.msra.mxu0 %v5505_v7  ;;  %3671 = vmatpush1.bf16.msra.mxu1 %v6813_v34 }
 0x187   :  { %3609 = vmatprep.subr.bf16.mxu0 %v6814_v26  ;;  %3673 = vmatprep.subr.bf16.mxu1 %v6815_v63  ;;  %v6872_v63 = vld [vmem:[#allocation77_spill] sm:$0xff] }
 0x18a   :  { %3611 = vmatpush1.bf16.msra.mxu0 %v6816_v33  ;;  %3675 = vmatpush1.bf16.msra.mxu1 %v6817_v50 }
 0x18b   :  { %3613 = vmatprep.subr.bf16.mxu0 %v6818_v13  ;;  %3677 = vmatprep.subr.bf16.mxu1 %v6819_v30  ;;  %v6830_v30 = vld [vmem:[#allocation37_spill] sm:$0xff] }
 0x18e   :  { %3615 = vmatpush1.bf16.msra.mxu0 %v6820_v25  ;;  %3679 = vmatpush1.bf16.msra.mxu1 %v6821_v61  ;;  %v6831_v25 = vld [vmem:[#allocation38_spill] sm:$0xff]  ;;  %v6832_v61 = vld [vmem:[#allocation39_spill] sm:$0xff] }
 0x18f   :  { %3617 = vmatprep.subr.bf16.mxu0 %v6822_v6  ;;  %3681 = vmatprep.subr.bf16.mxu1 %v6823_v56  ;;  %v6833_v6 = vld [vmem:[#allocation40_spill] sm:$0xff]  ;;  %v6834_v56 = vld [vmem:[#allocation41_spill] sm:$0xff] }
 0x192   :  { %3619 = vmatpush1.bf16.msra.mxu0 %v6824_v43  ;;  %3683 = vmatpush1.bf16.msra.mxu1 %v6825_v35  ;;  %v6835_v43 = vld [vmem:[#allocation42_spill] sm:$0xff]  ;;  %v6836_v35 = vld [vmem:[#allocation43_spill] sm:$0xff] }
 0x193   :  { %3621 = vmatprep.subr.bf16.mxu0 %v6826_v11  ;;  %3685 = vmatprep.subr.bf16.mxu1 %v6827_v15  ;;  %v6837_v11 = vld [vmem:[#allocation44_spill] sm:$0xff]  ;;  %v6838_v15 = vld [vmem:[#allocation45_spill] sm:$0xff] }
 0x196   :  { %3623 = vmatpush1.bf16.msra.mxu0 %v6828_v62  ;;  %3687 = vmatpush1.bf16.msra.mxu1 %v6829_v9  ;;  %v6839_v62 = vld [vmem:[#allocation46_spill] sm:$0xff]  ;;  %v6840_v9 = vld [vmem:[#allocation47_spill] sm:$0xff] }
 0x197   :  { %3625 = vmatprep.subr.bf16.mxu0 %v6830_v30  ;;  %3689 = vmatprep.subr.bf16.mxu1 %v6831_v25  ;;  %v6841_v30 = vld [vmem:[#allocation48_spill] sm:$0xff]  ;;  %v6842_v25 = vld [vmem:[#allocation49_spill] sm:$0xff] }
 0x19a   :  { %3627 = vmatpush1.bf16.msra.mxu0 %v6832_v61  ;;  %3691 = vmatpush1.bf16.msra.mxu1 %v6833_v6  ;;  %v6843_v61 = vld [vmem:[#allocation50_spill] sm:$0xff]  ;;  %v6844_v6 = vld [vmem:[#allocation51_spill] sm:$0xff] }
 0x19b   :  { %3629 = vmatprep.subr.bf16.mxu0 %v6834_v56  ;;  %3693 = vmatprep.subr.bf16.mxu1 %v6835_v43  ;;  %v6845_v56 = vld [vmem:[#allocation52_spill] sm:$0xff]  ;;  %v6846_v43 = vld [vmem:[#allocation53_spill] sm:$0xff] }
 0x19e   :  { %3631 = vmatpush1.bf16.msra.mxu0 %v6836_v35  ;;  %3695 = vmatpush1.bf16.msra.mxu1 %v6837_v11  ;;  %v6847_v35 = vld [vmem:[#allocation54_spill] sm:$0xff]  ;;  %v6848_v11 = vld [vmem:[#allocation55_spill] sm:$0xff] }
 0x19f   :  { %3633 = vmatprep.subr.bf16.mxu0 %v6838_v15  ;;  %3697 = vmatprep.subr.bf16.mxu1 %v6839_v62  ;;  %v6849_v15 = vld [vmem:[#allocation56_spill] sm:$0xff]  ;;  %v6850_v62 = vld [vmem:[#allocation57_spill] sm:$0xff] }
 0x1a2   :  { %3635 = vmatpush1.bf16.msra.mxu0 %v6840_v9  ;;  %3699 = vmatpush1.bf16.msra.mxu1 %v6841_v30  ;;  %v6851_v9 = vld [vmem:[#allocation58_spill] sm:$0xff]  ;;  %v6852_v30 = vld [vmem:[#allocation59_spill] sm:$0xff] }
 0x1a3   :  { %3637 = vmatprep.subr.bf16.mxu0 %v6842_v25  ;;  %3701 = vmatprep.subr.bf16.mxu1 %v6843_v61  ;;  %v6853_v25 = vld [vmem:[#allocation60_spill] sm:$0xff]  ;;  %v6854_v61 = vld [vmem:[#allocation61_spill] sm:$0xff] }
 0x1a6   :  { %3639 = vmatpush1.bf16.msra.mxu0 %v6844_v6  ;;  %3703 = vmatpush1.bf16.msra.mxu1 %v6845_v56  ;;  %v6855_v6 = vld [vmem:[#allocation62_spill] sm:$0xff]  ;;  %v6856_v56 = vld [vmem:[#allocation63_spill] sm:$0xff] }
 0x1a7   :  { %3641 = vmatprep.subr.bf16.mxu0 %v6846_v43  ;;  %3705 = vmatprep.subr.bf16.mxu1 %v6847_v35  ;;  %v6857_v43 = vld [vmem:[#allocation64_spill] sm:$0xff]  ;;  %v6858_v35 = vld [vmem:[#allocation65_spill] sm:$0xff] }
 0x1aa   :  { %3643 = vmatpush1.bf16.msra.mxu0 %v6848_v11  ;;  %3707 = vmatpush1.bf16.msra.mxu1 %v6849_v15  ;;  %v6859_v11 = vld [vmem:[#allocation66_spill] sm:$0xff]  ;;  %v6860_v15 = vld [vmem:[#allocation67_spill] sm:$0xff] }
 0x1ab   :  { %3645 = vmatprep.subr.bf16.mxu0 %v6850_v62  ;;  %3709 = vmatprep.subr.bf16.mxu1 %v6851_v9  ;;  %v6861_v62 = vld [vmem:[#allocation68_spill] sm:$0xff]  ;;  %v6862_v9 = vld [vmem:[#allocation69_spill] sm:$0xff] }
 0x1ae   :  { %3647 = vmatpush1.bf16.msra.mxu0 %v6852_v30  ;;  %3711 = vmatpush1.bf16.msra.mxu1 %v6853_v25  ;;  %v6863_v30 = vld [vmem:[#allocation70_spill] sm:$0xff]  ;;  %v6864_v25 = vld [vmem:[#allocation71_spill] sm:$0xff] }
 0x1af   :  { %3649 = vmatprep.subr.bf16.mxu0 %v6854_v61  ;;  %3713 = vmatprep.subr.bf16.mxu1 %v6855_v6  ;;  %v6865_v61 = vld [vmem:[#allocation72_spill] sm:$0xff] }
 0x1b0   :  { %v6866_v6 = vld [vmem:[#allocation12_spill] sm:$0xff] }
 0x1b2   :  { %3651 = vmatpush1.bf16.msra.mxu0 %v6856_v56  ;;  %3715 = vmatpush1.bf16.msra.mxu1 %v6857_v43  ;;  %v6867_v56 = vld [vmem:[#allocation13_spill] sm:$0xff] }
 0x1b3   :  { %3653 = vmatprep.subr.bf16.mxu0 %v6858_v35  ;;  %3717 = vmatprep.subr.bf16.mxu1 %v6859_v11  ;;  %v285_v11 = vld [vmem:[%s6589_s0 + $0x10] sm:$0xff] }
 0x1b4   :  { %303 = vperm.xlu1 %4913, %v285_v11   ;;  %v6868_v11 = vld [vmem:[#allocation73_spill] sm:$0xff] }
 0x1b6   :  { %3655 = vmatpush1.bf16.msra.mxu0 %v6860_v15  ;;  %3719 = vmatpush1.bf16.msra.mxu1 %v6861_v62  ;;  %v286_v62 = vld [vmem:[%s6589_s0 + $0x18] sm:$0xff] }
 0x1b7   :  { %3657 = vmatprep.subr.bf16.mxu0 %v6862_v9  ;;  %3721 = vmatprep.subr.bf16.mxu1 %v6863_v30  ;;  %v6870_v30 = vld [vmem:[#allocation74_spill] sm:$0xff] }
 0x1b8   :  { %308 = vperm.xlu1 %4913, %v286_v62  }
 0x1ba   :  { %3659 = vmatpush1.bf16.msra.mxu0 %v6864_v25  ;;  %3723 = vmatpush1.bf16.msra.mxu1 %v6865_v61  ;;  %v288_v25 = vld [vmem:[%s6589_s0 + $0x28] sm:$0xff] }
 0x1bb   :  { %3725 = vmatprep.subr.bf16.mxu0 %v6866_v6  ;;  %3757 = vmatprep.subr.bf16.mxu1 %v6867_v56  ;;  %v290_v6 = vld [vmem:[%s6589_s0 + $0x38] sm:$0xff]  ;;  %v265_v56 = vld [vmem:[%s6594_s5] sm:$0xf] }
 0x1bc   :  { %318 = vperm.xlu1 %4913, %v288_v25   ;;  %v5835_v61 = vrot.slane %v265_v56, %v6868_v11  ;;  %v5838_v9 = vrot.slane %v265_v56, %v6870_v30  ;;  %v5843_v26 = vrot.slane %v265_v56, %v6872_v63  ;;  %v5847_v30 = vrot.slane %v265_v56, %v5701_v49 }
 0x1be   :  { %6869 = vst [vmem:[#allocation73_spill] sm:$0xff] %v5835_v61  ;;  %6871 = vst [vmem:[#allocation74_spill] sm:$0xff] %v5838_v9 }
 0x1bf   :  { %6873 = vst [vmem:[#allocation77_spill] sm:$0xff] %v5843_v26  ;;  %6874 = vst [vmem:[#allocation81_spill] sm:$0xff] %v5847_v30 }
 0x1c0   :  { %328 = vperm.xlu1 %4913, %v290_v6  }
 0x230   :  { %v694_v62 = vpop.f32.mrb[2].mxu0  ;;  %v765_v15 = vpop.f32.mrb[2].mxu1 }
 0x231   :  { %v695_v35 = vadd.f32 %v694_v62, %v5835_v61  ;;  %v696_v25 = vpop.f32.mrb[3].mxu0  ;;  %v767_v43 = vpop.f32.mrb[3].mxu1  ;;  %v766_v34 = vadd.f32 %v765_v15, %v5847_v30  ;;  %v6877_v30 = vld [vmem:[#allocation78_spill] sm:$0xff] }
 0x232   :  { %v697_v13 = vadd.f32 %v696_v25, %v5838_v9  ;;  %v768_v6 = vadd.f32 %v767_v43, %v5843_v26  ;;  %v6876_v26 = vld [vmem:[#allocation76_spill] sm:$0xff] }
 0x233   :  { %v3242_v50 = vmul.f32 -1.442695, %v695_v35 }
 0x234   :  { %v3243_v33 = vmul.f32 -1.442695, %v697_v13  ;;  %v3244_v11 = vmul.f32 -1.442695, %v768_v6  ;;  %v299_v13 = vpop.permute.xlu0 %298 }
 0x235   :  { %4930 = vpow2.f32 %v3242_v50  ;;  %v357_v49 = vmul.f32 %v6876_v26, %v299_v13  ;;  %v6879_v26 = vld [vmem:[#allocation80_spill] sm:$0xff] }
 0x236   :  { %4932 = vpow2.f32 %v3243_v33  ;;  %v6875_v33 = vld [vmem:[#allocation75_spill] sm:$0xff]  ;;  %v359_v44 = vmul.f32 %v6879_v26, %v299_v13 }
 0x237   :  { %4934 = vpow2.f32 %v3244_v11  ;;  %v356_v25 = vmul.f32 %v6875_v33, %v299_v13 }
 0x238   :  { %4936 = vtanh.f32 %v766_v34 }
 0x239   :  { %v409_v55 = vadd.f32 %v6877_v30, %v356_v25  ;;  %v412_v25 = vadd.f32 %v5707_v37, %v359_v44 }
 0x23f   :  { %v4931_v62 = vpop.eup %4930 }
 0x240   :  { %v4933_v61 = vpop.eup %4932  ;;  %v773_v7 = vadd.f32 1.0, %v4931_v62 }
 0x241   :  { %v779_v35 = vadd.f32 1.0, %v4933_v61  ;;  %v4935_v63 = vpop.eup %4934 }
 0x242   :  { %4938 = vrcp.f32 %v773_v7  ;;  %v4937_v50 = vpop.eup %4936  ;;  %v786_v9 = vadd.f32 1.0, %v4935_v63  ;;  %v6878_v7 = vld [vmem:[#allocation79_spill] sm:$0xff] }
 0x243   :  { %4940 = vrcp.f32 %v779_v35  ;;  %v410_v11 = vadd.f32 %v6878_v7, %v357_v49 }
 0x244   :  { %4942 = vrcp.f32 %v786_v9 }
 0x24c   :  { %v4939_v43 = vpop.eup %4938 }
 0x24d   :  { %v4941_v56 = vpop.eup %4940  ;;  %v790_v6 = vmul.f32 %v4939_v43, %v4937_v50  ;;  %v358_v43 = vmul.f32 %v5710_v51, %v299_v13 }
 0x24e   :  { %v789_v15 = vmul.f32 0.0, %v4941_v56 }
 0x24f   :  { %v411_v9 = vadd.f32 %v5715_v0, %v358_v43 }
 0x250   :  { %v5853_v62 = vadd.f32 %v790_v6, %v789_v15  ;;  %v860_v34 = vpop.f32.mrb[4].mxu0  ;;  %v931_v61 = vpop.f32.mrb[4].mxu1 }
 0x251   :  { %v936_v35 = vadd.f32 %v860_v34, %v409_v55  ;;  %v862_v48 = vpop.f32.mrb[5].mxu0  ;;  %v933_v46 = vpop.f32.mrb[5].mxu1  ;;  %v938_v15 = vadd.f32 %v931_v61, %v411_v9  ;;  %v6882_v9 = vld [vmem:[#allocation17_spill] sm:$0xff] }
 0x252   :  { %4944 = vtanh.f32 %v5853_v62  ;;  %v937_v33 = vadd.f32 %v862_v48, %v410_v11  ;;  %v939_v56 = vadd.f32 %v933_v46, %v412_v25  ;;  %v4943_v6 = vpop.eup %4942 }
 0x253   :  { %v3245_v50 = vmul.f32 -1.442695, %v936_v35 }
 0x254   :  { %v3246_v63 = vmul.f32 -1.442695, %v937_v33  ;;  %v3247_v49 = vmul.f32 -1.442695, %v939_v56 }
 0x255   :  { %4946 = vpow2.f32 %v3245_v50 }
 0x256   :  { %4948 = vpow2.f32 %v3246_v63 }
 0x257   :  { %4950 = vpow2.f32 %v3247_v49  ;;  %v6884_v49 = vld [vmem:[#allocation19_spill] sm:$0xff] }
 0x258   :  { %4952 = vtanh.f32 %v938_v15  ;;  %v6885_v15 = vld [vmem:[#allocation20_spill] sm:$0xff] }
 0x25c   :  { %v4945_v55 = vpop.eup %4944 }
 0x25d   :  { %v793_v34 = vmul.f32 %v4945_v55, %v4943_v6  ;;  %v6881_v6 = vld [vmem:[#allocation16_spill] sm:$0xff]  ;;  %v6883_v55 = vld [vmem:[#allocation18_spill] sm:$0xff] }
 0x25f   :  { %v4947_v7 = vpop.eup %4946  ;;  %1028 = vmatprep.mubr.f32.mxu0 %v793_v34  ;;  %1099 = vmatprep.mubr.f32.mxu1 %v793_v34  ;;  %v6886_v34 = vld [vmem:[#allocation21_spill] sm:$0xff] }
 0x260   :  { %v4949_v48 = vpop.eup %4948  ;;  %v943_v11 = vadd.f32 1.0, %v4947_v7 }
 0x261   :  { %v949_v33 = vadd.f32 1.0, %v4949_v48  ;;  %v4951_v44 = vpop.eup %4950  ;;  %v6887_v48 = vld [vmem:[#allocation22_spill] sm:$0xff] }
 0x262   :  { %4954 = vrcp.f32 %v943_v11  ;;  %v4953_v13 = vpop.eup %4952  ;;  %v956_v63 = vadd.f32 1.0, %v4951_v44  ;;  %v6888_v11 = vld [vmem:[#allocation23_spill] sm:$0xff]  ;;  %v6890_v44 = vld [vmem:[#allocation25_spill] sm:$0xff] }
 0x263   :  { %4956 = vrcp.f32 %v949_v33  ;;  %v6889_v33 = vld [vmem:[#allocation24_spill] sm:$0xff] }
 0x264   :  { %4958 = vrcp.f32 %v956_v63  ;;  %v6895_v63 = vld [vmem:[#allocation30_spill] sm:$0xff] }
 0x26c   :  { %v4955_v46 = vpop.eup %4954 }
 0x26d   :  { %v4957_v35 = vpop.eup %4956  ;;  %v960_v50 = vmul.f32 %v4955_v46, %v4953_v13  ;;  %v6891_v13 = vld [vmem:[#allocation26_spill] sm:$0xff]  ;;  %v6892_v46 = vld [vmem:[#allocation27_spill] sm:$0xff] }
 0x26e   :  { %v959_v25 = vmul.f32 %v4957_v35, %v5718_v12  ;;  %v4959_v43 = vpop.eup %4958  ;;  %v6880_v12 = vld [vmem:[#allocation15_spill] sm:$0xff]  ;;  %v6893_v35 = vld [vmem:[#allocation28_spill] sm:$0xff] }
 0x270   :  { %v5862_v61 = vadd.f32 %v960_v50, %v959_v25  ;;  %v6894_v50 = vld [vmem:[#allocation29_spill] sm:$0xff]  ;;  %v6896_v25 = vld [vmem:[#allocation31_spill] sm:$0xff] }
 0x272   :  { %4960 = vtanh.f32 %v5862_v61 }
 0x27c   :  { %v4961_v7 = vpop.eup %4960 }
 0x27d   :  { %v963_v56 = vmul.f32 %v4961_v7, %v4959_v43  ;;  %v6897_v43 = vld [vmem:[#allocation32_spill] sm:$0xff]  ;;  %v6898_v7 = vld [vmem:[#allocation33_spill] sm:$0xff] }
 0x27f   :  { %1029 = vmatmul.mubr.f32.vlgmr.msra.gmra.mrb[6].mxu0 %v963_v56  ;;  %1100 = vmatmul.mubr.f32.vlgmr.msra.gmra.mrb[6].mxu1 %v963_v56 }
 0x280   :  { %3727 = vmatpush1.bf16.msra.mxu0 %v5370_v10  ;;  %3759 = vmatpush1.bf16.msra.mxu1 %v5373_v14 }
 0x281   :  { %3729 = vmatprep.subr.bf16.mxu0 %v5377_v18  ;;  %3761 = vmatprep.subr.bf16.mxu1 %v5379_v19 }
 0x282   :  { %1194 = vmatprep.mubr.f32.mxu0 %v6812_v5  ;;  %1265 = vmatprep.mubr.f32.mxu1 %v6812_v5 }
 0x284   :  { %3731 = vmatpush1.bf16.msra.mxu0 %v5382_v23  ;;  %3763 = vmatpush1.bf16.msra.mxu1 %v5386_v27 }
 0x285   :  { %3733 = vmatprep.subr.bf16.mxu0 %v5388_v28  ;;  %3765 = vmatprep.subr.bf16.mxu1 %v5390_v32 }
 0x288   :  { %3735 = vmatpush1.bf16.msra.mxu0 %v5393_v36  ;;  %3767 = vmatpush1.bf16.msra.mxu1 %v5397_v40 }
 0x289   :  { %3737 = vmatprep.subr.bf16.mxu0 %v5399_v41  ;;  %3769 = vmatprep.subr.bf16.mxu1 %v5402_v45 }
 0x28c   :  { %3739 = vmatpush1.bf16.msra.mxu0 %v5405_v52  ;;  %3771 = vmatpush1.bf16.msra.mxu1 %v5409_v53 }
 0x28d   :  { %3741 = vmatprep.subr.bf16.mxu0 %v5411_v54  ;;  %3773 = vmatprep.subr.bf16.mxu1 %v5414_v58 }
 0x290   :  { %3743 = vmatpush1.bf16.msra.mxu0 %v5417_v1  ;;  %3775 = vmatpush1.bf16.msra.mxu1 %v5421_v2 }
 0x291   :  { %3745 = vmatprep.subr.bf16.mxu0 %v5423_v3  ;;  %3777 = vmatprep.subr.bf16.mxu1 %v5426_v8 }
 0x294   :  { %3747 = vmatpush1.bf16.msra.mxu0 %v5429_v17  ;;  %3779 = vmatpush1.bf16.msra.mxu1 %v5433_v21 }
 0x295   :  { %3749 = vmatprep.subr.bf16.mxu0 %v5435_v22  ;;  %3781 = vmatprep.subr.bf16.mxu1 %v5441_v29 }
 0x298   :  { %3751 = vmatpush1.bf16.msra.mxu0 %v5447_v38  ;;  %3783 = vmatpush1.bf16.msra.mxu1 %v5451_v39 }
 0x299   :  { %3753 = vmatprep.subr.bf16.mxu0 %v5453_v42  ;;  %3785 = vmatprep.subr.bf16.mxu1 %v5456_v47 }
 0x29c   :  { %3755 = vmatpush1.bf16.msra.mxu0 %v5462_v57  ;;  %3787 = vmatpush1.bf16.msra.mxu1 %v5466_v59 }
 0x29d   :  { %3789 = vmatprep.subr.bf16.mxu0 %v5468_v60  ;;  %3853 = vmatprep.subr.bf16.mxu1 %v5471_v4 }
 0x29f   :  { %1195 = vmatmul.mubr.f32.vlgmr.msra.gmra.mrb[8].mxu0 %v963_v56  ;;  %1266 = vmatmul.mubr.f32.vlgmr.msra.gmra.mrb[8].mxu1 %v963_v56  ;;  %v6899_v56 = vld [vmem:[#allocation34_spill] sm:$0xff] }
 0x2a0   :  { %3791 = vmatpush1.bf16.msra.mxu0 %v5477_v16  ;;  %3855 = vmatpush1.bf16.msra.mxu1 %v5481_v20 }
 0x2a1   :  { %3793 = vmatprep.subr.bf16.mxu0 %v5483_v24  ;;  %3857 = vmatprep.subr.bf16.mxu1 %v5486_v31 }
 0x2a4   :  { %3795 = vmatpush1.bf16.msra.mxu0 %v6880_v12  ;;  %3859 = vmatpush1.bf16.msra.mxu1 %v6881_v6 }
 0x2a5   :  { %3797 = vmatprep.subr.bf16.mxu0 %v6882_v9  ;;  %3861 = vmatprep.subr.bf16.mxu1 %v6883_v55 }
 0x2a8   :  { %3799 = vmatpush1.bf16.msra.mxu0 %v6884_v49  ;;  %3863 = vmatpush1.bf16.msra.mxu1 %v6885_v15 }
 0x2a9   :  { %3801 = vmatprep.subr.bf16.mxu0 %v6886_v34  ;;  %3865 = vmatprep.subr.bf16.mxu1 %v6887_v48  ;;  %v6941_v34 = vld [vmem:[#allocation74_spill] sm:$0xff] }
 0x2ac   :  { %3803 = vmatpush1.bf16.msra.mxu0 %v6888_v11  ;;  %3867 = vmatpush1.bf16.msra.mxu1 %v6889_v33  ;;  %v6900_v33 = vld [vmem:[#allocation35_spill] sm:$0xff]  ;;  %v6940_v11 = vld [vmem:[#allocation73_spill] sm:$0xff] }
 0x2ad   :  { %3805 = vmatprep.subr.bf16.mxu0 %v6890_v44  ;;  %3869 = vmatprep.subr.bf16.mxu1 %v6891_v13  ;;  %v6901_v44 = vld [vmem:[#allocation36_spill] sm:$0xff]  ;;  %v6902_v13 = vld [vmem:[#allocation37_spill] sm:$0xff] }
 0x2b0   :  { %3807 = vmatpush1.bf16.msra.mxu0 %v6892_v46  ;;  %3871 = vmatpush1.bf16.msra.mxu1 %v6893_v35  ;;  %v6903_v46 = vld [vmem:[#allocation38_spill] sm:$0xff]  ;;  %v6904_v35 = vld [vmem:[#allocation39_spill] sm:$0xff] }
 0x2b1   :  { %3809 = vmatprep.subr.bf16.mxu0 %v6894_v50  ;;  %3873 = vmatprep.subr.bf16.mxu1 %v6895_v63  ;;  %v6905_v50 = vld [vmem:[#allocation40_spill] sm:$0xff]  ;;  %v6906_v63 = vld [vmem:[#allocation41_spill] sm:$0xff] }
 0x2b4   :  { %3811 = vmatpush1.bf16.msra.mxu0 %v6896_v25  ;;  %3875 = vmatpush1.bf16.msra.mxu1 %v6897_v43  ;;  %v6907_v25 = vld [vmem:[#allocation42_spill] sm:$0xff]  ;;  %v6908_v43 = vld [vmem:[#allocation43_spill] sm:$0xff] }
 0x2b5   :  { %3813 = vmatprep.subr.bf16.mxu0 %v6898_v7  ;;  %3877 = vmatprep.subr.bf16.mxu1 %v6899_v56  ;;  %v6909_v7 = vld [vmem:[#allocation44_spill] sm:$0xff]  ;;  %v6910_v56 = vld [vmem:[#allocation45_spill] sm:$0xff] }
 0x2b8   :  { %3815 = vmatpush1.bf16.msra.mxu0 %v6900_v33  ;;  %3879 = vmatpush1.bf16.msra.mxu1 %v6901_v44  ;;  %v6911_v33 = vld [vmem:[#allocation46_spill] sm:$0xff]  ;;  %v6912_v44 = vld [vmem:[#allocation47_spill] sm:$0xff] }
 0x2b9   :  { %3817 = vmatprep.subr.bf16.mxu0 %v6902_v13  ;;  %3881 = vmatprep.subr.bf16.mxu1 %v6903_v46  ;;  %v6913_v13 = vld [vmem:[#allocation48_spill] sm:$0xff]  ;;  %v6914_v46 = vld [vmem:[#allocation49_spill] sm:$0xff] }
 0x2bc   :  { %3819 = vmatpush1.bf16.msra.mxu0 %v6904_v35  ;;  %3883 = vmatpush1.bf16.msra.mxu1 %v6905_v50  ;;  %v6915_v35 = vld [vmem:[#allocation50_spill] sm:$0xff]  ;;  %v6916_v50 = vld [vmem:[#allocation51_spill] sm:$0xff] }
 0x2bd   :  { %3821 = vmatprep.subr.bf16.mxu0 %v6906_v63  ;;  %3885 = vmatprep.subr.bf16.mxu1 %v6907_v25  ;;  %v6917_v63 = vld [vmem:[#allocation52_spill] sm:$0xff]  ;;  %v6918_v25 = vld [vmem:[#allocation53_spill] sm:$0xff] }
 0x2c0   :  { %3823 = vmatpush1.bf16.msra.mxu0 %v6908_v43  ;;  %3887 = vmatpush1.bf16.msra.mxu1 %v6909_v7  ;;  %v6919_v43 = vld [vmem:[#allocation54_spill] sm:$0xff]  ;;  %v6920_v7 = vld [vmem:[#allocation55_spill] sm:$0xff] }
 0x2c1   :  { %3825 = vmatprep.subr.bf16.mxu0 %v6910_v56  ;;  %3889 = vmatprep.subr.bf16.mxu1 %v6911_v33  ;;  %v6921_v56 = vld [vmem:[#allocation56_spill] sm:$0xff]  ;;  %v6922_v33 = vld [vmem:[#allocation57_spill] sm:$0xff] }
 0x2c4   :  { %3827 = vmatpush1.bf16.msra.mxu0 %v6912_v44  ;;  %3891 = vmatpush1.bf16.msra.mxu1 %v6913_v13  ;;  %v6923_v44 = vld [vmem:[#allocation58_spill] sm:$0xff]  ;;  %v6924_v13 = vld [vmem:[#allocation59_spill] sm:$0xff] }
 0x2c5   :  { %3829 = vmatprep.subr.bf16.mxu0 %v6914_v46  ;;  %3893 = vmatprep.subr.bf16.mxu1 %v6915_v35  ;;  %v6925_v46 = vld [vmem:[#allocation60_spill] sm:$0xff]  ;;  %v6926_v35 = vld [vmem:[#allocation61_spill] sm:$0xff] }
 0x2c8   :  { %3831 = vmatpush1.bf16.msra.mxu0 %v6916_v50  ;;  %3895 = vmatpush1.bf16.msra.mxu1 %v6917_v63  ;;  %v6927_v50 = vld [vmem:[#allocation62_spill] sm:$0xff]  ;;  %v6928_v63 = vld [vmem:[#allocation63_spill] sm:$0xff] }
 0x2c9   :  { %3833 = vmatprep.subr.bf16.mxu0 %v6918_v25  ;;  %3897 = vmatprep.subr.bf16.mxu1 %v6919_v43  ;;  %v6929_v25 = vld [vmem:[#allocation64_spill] sm:$0xff]  ;;  %v6930_v43 = vld [vmem:[#allocation65_spill] sm:$0xff] }
 0x2cc   :  { %3835 = vmatpush1.bf16.msra.mxu0 %v6920_v7  ;;  %3899 = vmatpush1.bf16.msra.mxu1 %v6921_v56  ;;  %v6931_v7 = vld [vmem:[#allocation66_spill] sm:$0xff]  ;;  %v6932_v56 = vld [vmem:[#allocation67_spill] sm:$0xff] }
 0x2cd   :  { %3837 = vmatprep.subr.bf16.mxu0 %v6922_v33  ;;  %3901 = vmatprep.subr.bf16.mxu1 %v6923_v44  ;;  %v6933_v33 = vld [vmem:[#allocation68_spill] sm:$0xff]  ;;  %v6934_v44 = vld [vmem:[#allocation69_spill] sm:$0xff] }
 0x2d0   :  { %3839 = vmatpush1.bf16.msra.mxu0 %v6924_v13  ;;  %3903 = vmatpush1.bf16.msra.mxu1 %v6925_v46  ;;  %v6935_v13 = vld [vmem:[#allocation70_spill] sm:$0xff]  ;;  %v6936_v46 = vld [vmem:[#allocation71_spill] sm:$0xff] }
 0x2d1   :  { %3841 = vmatprep.subr.bf16.mxu0 %v6926_v35  ;;  %3905 = vmatprep.subr.bf16.mxu1 %v6927_v50  ;;  %v6937_v35 = vld [vmem:[#allocation72_spill] sm:$0xff] }
 0x2d2   :  { %v6938_v50 = vld [vmem:[#allocation12_spill] sm:$0xff] }
 0x2d4   :  { %3843 = vmatpush1.bf16.msra.mxu0 %v6928_v63  ;;  %3907 = vmatpush1.bf16.msra.mxu1 %v6929_v25  ;;  %v6939_v63 = vld [vmem:[#allocation13_spill] sm:$0xff] }
 0x2d5   :  { %3845 = vmatprep.subr.bf16.mxu0 %v6930_v43  ;;  %3909 = vmatprep.subr.bf16.mxu1 %v6931_v7 }
 0x2d8   :  { %3847 = vmatpush1.bf16.msra.mxu0 %v6932_v56  ;;  %3911 = vmatpush1.bf16.msra.mxu1 %v6933_v33 }
 0x2d9   :  { %3849 = vmatprep.subr.bf16.mxu0 %v6934_v44  ;;  %3913 = vmatprep.subr.bf16.mxu1 %v6935_v13  ;;  %v6942_v13 = vld [vmem:[#allocation77_spill] sm:$0xff] }
 0x2dc   :  { %3851 = vmatpush1.bf16.msra.mxu0 %v6936_v46  ;;  %3915 = vmatpush1.bf16.msra.mxu1 %v6937_v35  ;;  %v6943_v35 = vld [vmem:[#allocation81_spill] sm:$0xff] }
 0x2dd   :  { %3917 = vmatprep.subr.bf16.mxu0 %v6938_v50  ;;  %3949 = vmatprep.subr.bf16.mxu1 %v6939_v63 }
 0x352   :  { %v1030_v25 = vpop.f32.mrb[6].mxu0  ;;  %v1101_v43 = vpop.f32.mrb[6].mxu1 }
 0x353   :  { %v1031_v7 = vadd.f32 %v1030_v25, %v6940_v11  ;;  %v1032_v48 = vpop.f32.mrb[7].mxu0  ;;  %v1103_v56 = vpop.f32.mrb[7].mxu1  ;;  %v1102_v55 = vadd.f32 %v1101_v43, %v6943_v35  ;;  %v6944_v11 = vld [vmem:[#allocation75_spill] sm:$0xff] }
 0x354   :  { %v1033_v33 = vadd.f32 %v1032_v48, %v6941_v34  ;;  %v1104_v46 = vadd.f32 %v1103_v56, %v6942_v13  ;;  %v304_v25 = vpop.permute.xlu1 %303 }
 0x355   :  { %v3248_v15 = vmul.f32 -1.442695, %v1031_v7  ;;  %v360_v48 = vmul.f32 %v6944_v11, %v304_v25 }
 0x356   :  { %v3249_v44 = vmul.f32 -1.442695, %v1033_v33  ;;  %v3250_v49 = vmul.f32 -1.442695, %v1104_v46  ;;  %v6945_v33 = vld [vmem:[#allocation76_spill] sm:$0xff] }
 0x357   :  { %4962 = vpow2.f32 %v3248_v15  ;;  %v361_v15 = vmul.f32 %v6945_v33, %v304_v25  ;;  %v413_v43 = vadd.f32 %v6877_v30, %v360_v48 }
 0x358   :  { %4964 = vpow2.f32 %v3249_v44 }
 0x359   :  { %4966 = vpow2.f32 %v3250_v49  ;;  %v6946_v49 = vld [vmem:[#allocation79_spill] sm:$0xff] }
 0x35a   :  { %4968 = vtanh.f32 %v1102_v55  ;;  %v414_v55 = vadd.f32 %v6946_v49, %v361_v15 }
 0x361   :  { %v4963_v50 = vpop.eup %4962 }
 0x362   :  { %v4965_v9 = vpop.eup %4964  ;;  %v1109_v63 = vadd.f32 1.0, %v4963_v50 }
 0x363   :  { %v1115_v6 = vadd.f32 1.0, %v4965_v9  ;;  %v4967_v7 = vpop.eup %4966 }
 0x364   :  { %4970 = vrcp.f32 %v1109_v63  ;;  %v4969_v44 = vpop.eup %4968  ;;  %v1122_v13 = vadd.f32 1.0, %v4967_v7 }
 0x365   :  { %4972 = vrcp.f32 %v1115_v6  ;;  %v363_v6 = vmul.f32 %v6879_v26, %v304_v25 }
 0x366   :  { %4974 = vrcp.f32 %v1122_v13 }
 0x367   :  { %v416_v48 = vadd.f32 %v5707_v37, %v363_v6 }
 0x36e   :  { %v4971_v34 = vpop.eup %4970 }
 0x36f   :  { %v4973_v56 = vpop.eup %4972  ;;  %v1126_v46 = vmul.f32 %v4971_v34, %v4969_v44 }
 0x370   :  { %v1125_v50 = vmul.f32 %v4973_v56, %v5853_v62  ;;  %v362_v62 = vmul.f32 %v5710_v51, %v304_v25  ;;  %v4975_v56 = vpop.eup %4974 }
 0x372   :  { %v1196_v9 = vpop.f32.mrb[8].mxu0  ;;  %v1267_v63 = vpop.f32.mrb[8].mxu1  ;;  %v5973_v35 = vadd.f32 %v1126_v46, %v1125_v50  ;;  %v415_v44 = vadd.f32 %v5715_v0, %v362_v62 }
 0x373   :  { %v1272_v11 = vadd.f32 %v1196_v9, %v413_v43  ;;  %v1198_v33 = vpop.f32.mrb[9].mxu0  ;;  %v1269_v12 = vpop.f32.mrb[9].mxu1 }
 0x374   :  { %v1273_v31 = vadd.f32 %v1198_v33, %v414_v55  ;;  %4976 = vtanh.f32 %v5973_v35  ;;  %v1275_v15 = vadd.f32 %v1269_v12, %v416_v48  ;;  %v1274_v43 = vadd.f32 %v1267_v63, %v415_v44 }
 0x375   :  { %v3251_v34 = vmul.f32 -1.442695, %v1272_v11 }
 0x376   :  { %v3252_v7 = vmul.f32 -1.442695, %v1273_v31  ;;  %v3253_v13 = vmul.f32 -1.442695, %v1275_v15 }
 0x377   :  { %4978 = vpow2.f32 %v3251_v34 }
 0x378   :  { %4980 = vpow2.f32 %v3252_v7 }
 0x379   :  { %4982 = vpow2.f32 %v3253_v13  ;;  %v6950_v13 = vld [vmem:[#allocation17_spill] sm:$0xff] }
 0x37a   :  { %4984 = vtanh.f32 %v1274_v43  ;;  %v6951_v43 = vld [vmem:[#allocation18_spill] sm:$0xff] }
 0x37e   :  { %v4977_v46 = vpop.eup %4976 }
 0x37f   :  { %v1129_v50 = vmul.f32 %v4977_v46, %v4975_v56  ;;  %v6948_v56 = vld [vmem:[#allocation15_spill] sm:$0xff]  ;;  %v6949_v46 = vld [vmem:[#allocation16_spill] sm:$0xff] }
 0x381   :  { %v4979_v9 = vpop.eup %4978  ;;  %1364 = vmatprep.mubr.f32.mxu0 %v1129_v50  ;;  %1435 = vmatprep.mubr.f32.mxu1 %v1129_v50  ;;  %v6952_v50 = vld [vmem:[#allocation19_spill] sm:$0xff] }
 0x382   :  { %v4981_v33 = vpop.eup %4980  ;;  %v1279_v11 = vadd.f32 1.0, %v4979_v9  ;;  %v6953_v9 = vld [vmem:[#allocation20_spill] sm:$0xff] }
 0x383   :  { %v1285_v31 = vadd.f32 1.0, %v4981_v33  ;;  %v4983_v25 = vpop.eup %4982  ;;  %v6954_v33 = vld [vmem:[#allocation21_spill] sm:$0xff] }
 0x384   :  { %4986 = vrcp.f32 %v1279_v11  ;;  %v4985_v55 = vpop.eup %4984  ;;  %v1292_v7 = vadd.f32 1.0, %v4983_v25  ;;  %v6955_v11 = vld [vmem:[#allocation22_spill] sm:$0xff]  ;;  %v6957_v25 = vld [vmem:[#allocation24_spill] sm:$0xff] }
 0x385   :  { %4988 = vrcp.f32 %v1285_v31  ;;  %v6956_v31 = vld [vmem:[#allocation23_spill] sm:$0xff] }
 0x386   :  { %4990 = vrcp.f32 %v1292_v7  ;;  %v6962_v7 = vld [vmem:[#allocation29_spill] sm:$0xff] }
 0x38e   :  { %v4987_v12 = vpop.eup %4986 }
 0x38f   :  { %v4989_v6 = vpop.eup %4988  ;;  %v1296_v34 = vmul.f32 %v4987_v12, %v4985_v55  ;;  %v6958_v55 = vld [vmem:[#allocation25_spill] sm:$0xff]  ;;  %v6959_v12 = vld [vmem:[#allocation26_spill] sm:$0xff] }
 0x390   :  { %v1295_v48 = vmul.f32 %v4989_v6, %v5862_v61  ;;  %v4991_v62 = vpop.eup %4990  ;;  %v6947_v61 = vld [vmem:[#allocation14_spill] sm:$0xff]  ;;  %v6960_v6 = vld [vmem:[#allocation27_spill] sm:$0xff] }
 0x392   :  { %v5980_v63 = vadd.f32 %v1296_v34, %v1295_v48  ;;  %v6961_v34 = vld [vmem:[#allocation28_spill] sm:$0xff]  ;;  %v6963_v48 = vld [vmem:[#allocation30_spill] sm:$0xff] }
 0x394   :  { %4992 = vtanh.f32 %v5980_v63 }
 0x39e   :  { %v4993_v15 = vpop.eup %4992 }
 0x39f   :  { %v1299_v44 = vmul.f32 %v4993_v15, %v4991_v62  ;;  %v6964_v62 = vld [vmem:[#allocation31_spill] sm:$0xff]  ;;  %v6965_v15 = vld [vmem:[#allocation32_spill] sm:$0xff] }
 0x3a1   :  { %1365 = vmatmul.mubr.f32.vlgmr.msra.gmra.mrb[10].mxu0 %v1299_v44  ;;  %1436 = vmatmul.mubr.f32.vlgmr.msra.gmra.mrb[10].mxu1 %v1299_v44 }
 0x3a2   :  { %3919 = vmatpush1.bf16.msra.mxu0 %v5370_v10  ;;  %3951 = vmatpush1.bf16.msra.mxu1 %v5373_v14 }
 0x3a3   :  { %3921 = vmatprep.subr.bf16.mxu0 %v5377_v18  ;;  %3953 = vmatprep.subr.bf16.mxu1 %v5379_v19 }
 0x3a4   :  { %1530 = vmatprep.mubr.f32.mxu0 %v6812_v5  ;;  %1601 = vmatprep.mubr.f32.mxu1 %v6812_v5 }
 0x3a6   :  { %3923 = vmatpush1.bf16.msra.mxu0 %v5382_v23  ;;  %3955 = vmatpush1.bf16.msra.mxu1 %v5386_v27 }
 0x3a7   :  { %3925 = vmatprep.subr.bf16.mxu0 %v5388_v28  ;;  %3957 = vmatprep.subr.bf16.mxu1 %v5390_v32 }
 0x3aa   :  { %3927 = vmatpush1.bf16.msra.mxu0 %v5393_v36  ;;  %3959 = vmatpush1.bf16.msra.mxu1 %v5397_v40 }
 0x3ab   :  { %3929 = vmatprep.subr.bf16.mxu0 %v5399_v41  ;;  %3961 = vmatprep.subr.bf16.mxu1 %v5402_v45 }
 0x3ae   :  { %3931 = vmatpush1.bf16.msra.mxu0 %v5405_v52  ;;  %3963 = vmatpush1.bf16.msra.mxu1 %v5409_v53 }
 0x3af   :  { %3933 = vmatprep.subr.bf16.mxu0 %v5411_v54  ;;  %3965 = vmatprep.subr.bf16.mxu1 %v5414_v58 }
 0x3b2   :  { %3935 = vmatpush1.bf16.msra.mxu0 %v5417_v1  ;;  %3967 = vmatpush1.bf16.msra.mxu1 %v5421_v2 }
 0x3b3   :  { %3937 = vmatprep.subr.bf16.mxu0 %v5423_v3  ;;  %3969 = vmatprep.subr.bf16.mxu1 %v5426_v8 }
 0x3b6   :  { %3939 = vmatpush1.bf16.msra.mxu0 %v5429_v17  ;;  %3971 = vmatpush1.bf16.msra.mxu1 %v5433_v21 }
 0x3b7   :  { %3941 = vmatprep.subr.bf16.mxu0 %v5435_v22  ;;  %3973 = vmatprep.subr.bf16.mxu1 %v5441_v29 }
 0x3ba   :  { %3943 = vmatpush1.bf16.msra.mxu0 %v5447_v38  ;;  %3975 = vmatpush1.bf16.msra.mxu1 %v5451_v39 }
 0x3bb   :  { %3945 = vmatprep.subr.bf16.mxu0 %v5453_v42  ;;  %3977 = vmatprep.subr.bf16.mxu1 %v5456_v47 }
 0x3be   :  { %3947 = vmatpush1.bf16.msra.mxu0 %v5462_v57  ;;  %3979 = vmatpush1.bf16.msra.mxu1 %v5466_v59 }
 0x3bf   :  { %3981 = vmatprep.subr.bf16.mxu0 %v5468_v60  ;;  %4045 = vmatprep.subr.bf16.mxu1 %v5471_v4 }
 0x3c1   :  { %1531 = vmatmul.mubr.f32.vlgmr.msra.gmra.mrb[12].mxu0 %v1299_v44  ;;  %1602 = vmatmul.mubr.f32.vlgmr.msra.gmra.mrb[12].mxu1 %v1299_v44  ;;  %v6966_v44 = vld [vmem:[#allocation33_spill] sm:$0xff] }
 0x3c2   :  { %3983 = vmatpush1.bf16.msra.mxu0 %v5477_v16  ;;  %4047 = vmatpush1.bf16.msra.mxu1 %v5481_v20 }
 0x3c3   :  { %3985 = vmatprep.subr.bf16.mxu0 %v5483_v24  ;;  %4049 = vmatprep.subr.bf16.mxu1 %v6947_v61 }
 0x3c6   :  { %3987 = vmatpush1.bf16.msra.mxu0 %v6948_v56  ;;  %4051 = vmatpush1.bf16.msra.mxu1 %v6949_v46 }
 0x3c7   :  { %3989 = vmatprep.subr.bf16.mxu0 %v6950_v13  ;;  %4053 = vmatprep.subr.bf16.mxu1 %v6951_v43 }
 0x3ca   :  { %3991 = vmatpush1.bf16.msra.mxu0 %v6952_v50  ;;  %4055 = vmatpush1.bf16.msra.mxu1 %v6953_v9  ;;  %v7009_v9 = vld [vmem:[#allocation74_spill] sm:$0xff] }
 0x3cb   :  { %3993 = vmatprep.subr.bf16.mxu0 %v6954_v33  ;;  %4057 = vmatprep.subr.bf16.mxu1 %v6955_v11  ;;  %v7008_v11 = vld [vmem:[#allocation73_spill] sm:$0xff] }
 0x3ce   :  { %3995 = vmatpush1.bf16.msra.mxu0 %v6956_v31  ;;  %4059 = vmatpush1.bf16.msra.mxu1 %v6957_v25  ;;  %v6967_v31 = vld [vmem:[#allocation34_spill] sm:$0xff]  ;;  %v6968_v25 = vld [vmem:[#allocation35_spill] sm:$0xff] }
 0x3cf   :  { %3997 = vmatprep.subr.bf16.mxu0 %v6958_v55  ;;  %4061 = vmatprep.subr.bf16.mxu1 %v6959_v12  ;;  %v6969_v55 = vld [vmem:[#allocation36_spill] sm:$0xff]  ;;  %v6970_v12 = vld [vmem:[#allocation37_spill] sm:$0xff] }
 0x3d2   :  { %3999 = vmatpush1.bf16.msra.mxu0 %v6960_v6  ;;  %4063 = vmatpush1.bf16.msra.mxu1 %v6961_v34  ;;  %v6971_v6 = vld [vmem:[#allocation38_spill] sm:$0xff]  ;;  %v6972_v34 = vld [vmem:[#allocation39_spill] sm:$0xff] }
 0x3d3   :  { %4001 = vmatprep.subr.bf16.mxu0 %v6962_v7  ;;  %4065 = vmatprep.subr.bf16.mxu1 %v6963_v48  ;;  %v6973_v7 = vld [vmem:[#allocation40_spill] sm:$0xff]  ;;  %v6974_v48 = vld [vmem:[#allocation41_spill] sm:$0xff] }
 0x3d6   :  { %4003 = vmatpush1.bf16.msra.mxu0 %v6964_v62  ;;  %4067 = vmatpush1.bf16.msra.mxu1 %v6965_v15  ;;  %v6975_v62 = vld [vmem:[#allocation42_spill] sm:$0xff]  ;;  %v6976_v15 = vld [vmem:[#allocation43_spill] sm:$0xff] }
 0x3d7   :  { %4005 = vmatprep.subr.bf16.mxu0 %v6966_v44  ;;  %4069 = vmatprep.subr.bf16.mxu1 %v6967_v31  ;;  %v6977_v44 = vld [vmem:[#allocation44_spill] sm:$0xff]  ;;  %v6978_v31 = vld [vmem:[#allocation45_spill] sm:$0xff] }
 0x3da   :  { %4007 = vmatpush1.bf16.msra.mxu0 %v6968_v25  ;;  %4071 = vmatpush1.bf16.msra.mxu1 %v6969_v55  ;;  %v6979_v25 = vld [vmem:[#allocation46_spill] sm:$0xff]  ;;  %v6980_v55 = vld [vmem:[#allocation47_spill] sm:$0xff] }
 0x3db   :  { %4009 = vmatprep.subr.bf16.mxu0 %v6970_v12  ;;  %4073 = vmatprep.subr.bf16.mxu1 %v6971_v6  ;;  %v6981_v12 = vld [vmem:[#allocation48_spill] sm:$0xff]  ;;  %v6982_v6 = vld [vmem:[#allocation49_spill] sm:$0xff] }
 0x3de   :  { %4011 = vmatpush1.bf16.msra.mxu0 %v6972_v34  ;;  %4075 = vmatpush1.bf16.msra.mxu1 %v6973_v7  ;;  %v6983_v34 = vld [vmem:[#allocation50_spill] sm:$0xff]  ;;  %v6984_v7 = vld [vmem:[#allocation51_spill] sm:$0xff] }
 0x3df   :  { %4013 = vmatprep.subr.bf16.mxu0 %v6974_v48  ;;  %4077 = vmatprep.subr.bf16.mxu1 %v6975_v62  ;;  %v6985_v48 = vld [vmem:[#allocation52_spill] sm:$0xff]  ;;  %v6986_v62 = vld [vmem:[#allocation53_spill] sm:$0xff] }
 0x3e2   :  { %4015 = vmatpush1.bf16.msra.mxu0 %v6976_v15  ;;  %4079 = vmatpush1.bf16.msra.mxu1 %v6977_v44  ;;  %v6987_v15 = vld [vmem:[#allocation54_spill] sm:$0xff]  ;;  %v6988_v44 = vld [vmem:[#allocation55_spill] sm:$0xff] }
 0x3e3   :  { %4017 = vmatprep.subr.bf16.mxu0 %v6978_v31  ;;  %4081 = vmatprep.subr.bf16.mxu1 %v6979_v25  ;;  %v6989_v31 = vld [vmem:[#allocation56_spill] sm:$0xff]  ;;  %v6990_v25 = vld [vmem:[#allocation57_spill] sm:$0xff] }
 0x3e6   :  { %4019 = vmatpush1.bf16.msra.mxu0 %v6980_v55  ;;  %4083 = vmatpush1.bf16.msra.mxu1 %v6981_v12  ;;  %v6991_v55 = vld [vmem:[#allocation58_spill] sm:$0xff]  ;;  %v6992_v12 = vld [vmem:[#allocation59_spill] sm:$0xff] }
 0x3e7   :  { %4021 = vmatprep.subr.bf16.mxu0 %v6982_v6  ;;  %4085 = vmatprep.subr.bf16.mxu1 %v6983_v34  ;;  %v6993_v6 = vld [vmem:[#allocation60_spill] sm:$0xff]  ;;  %v6994_v34 = vld [vmem:[#allocation61_spill] sm:$0xff] }
 0x3ea   :  { %4023 = vmatpush1.bf16.msra.mxu0 %v6984_v7  ;;  %4087 = vmatpush1.bf16.msra.mxu1 %v6985_v48  ;;  %v6995_v7 = vld [vmem:[#allocation62_spill] sm:$0xff]  ;;  %v6996_v48 = vld [vmem:[#allocation63_spill] sm:$0xff] }
 0x3eb   :  { %4025 = vmatprep.subr.bf16.mxu0 %v6986_v62  ;;  %4089 = vmatprep.subr.bf16.mxu1 %v6987_v15  ;;  %v6997_v62 = vld [vmem:[#allocation64_spill] sm:$0xff]  ;;  %v6998_v15 = vld [vmem:[#allocation65_spill] sm:$0xff] }
 0x3ee   :  { %4027 = vmatpush1.bf16.msra.mxu0 %v6988_v44  ;;  %4091 = vmatpush1.bf16.msra.mxu1 %v6989_v31  ;;  %v6999_v44 = vld [vmem:[#allocation66_spill] sm:$0xff]  ;;  %v7000_v31 = vld [vmem:[#allocation67_spill] sm:$0xff] }
 0x3ef   :  { %4029 = vmatprep.subr.bf16.mxu0 %v6990_v25  ;;  %4093 = vmatprep.subr.bf16.mxu1 %v6991_v55  ;;  %v7001_v25 = vld [vmem:[#allocation68_spill] sm:$0xff]  ;;  %v7002_v55 = vld [vmem:[#allocation69_spill] sm:$0xff] }
 0x3f2   :  { %4031 = vmatpush1.bf16.msra.mxu0 %v6992_v12  ;;  %4095 = vmatpush1.bf16.msra.mxu1 %v6993_v6  ;;  %v7003_v12 = vld [vmem:[#allocation70_spill] sm:$0xff]  ;;  %v7004_v6 = vld [vmem:[#allocation71_spill] sm:$0xff] }
 0x3f3   :  { %4033 = vmatprep.subr.bf16.mxu0 %v6994_v34  ;;  %4097 = vmatprep.subr.bf16.mxu1 %v6995_v7  ;;  %v7005_v34 = vld [vmem:[#allocation72_spill] sm:$0xff] }
 0x3f4   :  { %v7006_v7 = vld [vmem:[#allocation12_spill] sm:$0xff] }
 0x3f6   :  { %4035 = vmatpush1.bf16.msra.mxu0 %v6996_v48  ;;  %4099 = vmatpush1.bf16.msra.mxu1 %v6997_v62  ;;  %v7007_v48 = vld [vmem:[#allocation13_spill] sm:$0xff] }
 0x3f7   :  { %4037 = vmatprep.subr.bf16.mxu0 %v6998_v15  ;;  %4101 = vmatprep.subr.bf16.mxu1 %v6999_v44 }
 0x3fa   :  { %4039 = vmatpush1.bf16.msra.mxu0 %v7000_v31  ;;  %4103 = vmatpush1.bf16.msra.mxu1 %v7001_v25 }
 0x3fb   :  { %4041 = vmatprep.subr.bf16.mxu0 %v7002_v55  ;;  %4105 = vmatprep.subr.bf16.mxu1 %v7003_v12  ;;  %v7010_v12 = vld [vmem:[#allocation77_spill] sm:$0xff] }
 0x3fe   :  { %4043 = vmatpush1.bf16.msra.mxu0 %v7004_v6  ;;  %4107 = vmatpush1.bf16.msra.mxu1 %v7005_v34  ;;  %v7011_v34 = vld [vmem:[#allocation81_spill] sm:$0xff] }
 0x3ff   :  { %4109 = vmatprep.subr.bf16.mxu0 %v7006_v7  ;;  %4141 = vmatprep.subr.bf16.mxu1 %v7007_v48 }
 0x474   :  { %v1366_v62 = vpop.f32.mrb[10].mxu0  ;;  %v1437_v15 = vpop.f32.mrb[10].mxu1 }
 0x475   :  { %v1367_v44 = vadd.f32 %v1366_v62, %v7008_v11  ;;  %v1368_v33 = vpop.f32.mrb[11].mxu0  ;;  %v1439_v31 = vpop.f32.mrb[11].mxu1  ;;  %v1438_v13 = vadd.f32 %v1437_v15, %v7011_v34 }
 0x476   :  { %v1369_v25 = vadd.f32 %v1368_v33, %v7009_v9  ;;  %v1440_v6 = vadd.f32 %v1439_v31, %v7010_v12  ;;  %v309_v11 = vpop.permute.xlu1 %308 }
 0x477   :  { %v3254_v50 = vmul.f32 -1.442695, %v1367_v44  ;;  %v7012_v44 = vld [vmem:[#allocation75_spill] sm:$0xff] }
 0x478   :  { %v3255_v55 = vmul.f32 -1.442695, %v1369_v25  ;;  %v3256_v43 = vmul.f32 -1.442695, %v1440_v6  ;;  %v364_v25 = vmul.f32 %v7012_v44, %v309_v11 }
 0x479   :  { %4994 = vpow2.f32 %v3254_v50 }
 0x47a   :  { %4996 = vpow2.f32 %v3255_v55  ;;  %v7013_v55 = vld [vmem:[#allocation76_spill] sm:$0xff] }
 0x47b   :  { %4998 = vpow2.f32 %v3256_v43  ;;  %v365_v9 = vmul.f32 %v7013_v55, %v309_v11  ;;  %v367_v55 = vmul.f32 %v6879_v26, %v309_v11 }
 0x47c   :  { %5000 = vtanh.f32 %v1438_v13 }
 0x483   :  { %v4995_v7 = vpop.eup %4994 }
 0x484   :  { %v4997_v46 = vpop.eup %4996  ;;  %v1445_v48 = vadd.f32 1.0, %v4995_v7  ;;  %v417_v7 = vadd.f32 %v6877_v30, %v364_v25  ;;  %v366_v25 = vmul.f32 %v5710_v51, %v309_v11 }
 0x485   :  { %v1451_v56 = vadd.f32 1.0, %v4997_v46  ;;  %v4999_v62 = vpop.eup %4998  ;;  %v418_v46 = vadd.f32 %v6946_v49, %v365_v9 }
 0x486   :  { %5002 = vrcp.f32 %v1445_v48  ;;  %v5001_v33 = vpop.eup %5000  ;;  %v1458_v12 = vadd.f32 1.0, %v4999_v62 }
 0x487   :  { %5004 = vrcp.f32 %v1451_v56 }
 0x488   :  { %5006 = vrcp.f32 %v1458_v12  ;;  %v419_v12 = vadd.f32 %v5715_v0, %v366_v25 }
 0x490   :  { %v5003_v50 = vpop.eup %5002 }
 0x491   :  { %v5005_v31 = vpop.eup %5004  ;;  %v1462_v6 = vmul.f32 %v5003_v50, %v5001_v33 }
 0x492   :  { %v1461_v15 = vmul.f32 %v5005_v31, %v5973_v35  ;;  %v420_v35 = vadd.f32 %v5707_v37, %v367_v55  ;;  %v5007_v50 = vpop.eup %5006 }
 0x494   :  { %v1532_v43 = vpop.f32.mrb[12].mxu0  ;;  %v1603_v13 = vpop.f32.mrb[12].mxu1  ;;  %v6090_v56 = vadd.f32 %v1462_v6, %v1461_v15 }
 0x495   :  { %v1608_v48 = vadd.f32 %v1532_v43, %v417_v7  ;;  %v1534_v34 = vpop.f32.mrb[13].mxu0  ;;  %v1605_v44 = vpop.f32.mrb[13].mxu1  ;;  %v1610_v15 = vadd.f32 %v1603_v13, %v419_v12  ;;  %v7015_v12 = vld [vmem:[#allocation15_spill] sm:$0xff] }
 0x496   :  { %v1609_v61 = vadd.f32 %v1534_v34, %v418_v46  ;;  %5008 = vtanh.f32 %v6090_v56  ;;  %v1611_v9 = vadd.f32 %v1605_v44, %v420_v35 }
 0x497   :  { %v3257_v62 = vmul.f32 -1.442695, %v1608_v48 }
 0x498   :  { %v3258_v33 = vmul.f32 -1.442695, %v1609_v61  ;;  %v3259_v6 = vmul.f32 -1.442695, %v1611_v9 }
 0x499   :  { %5010 = vpow2.f32 %v3257_v62 }
 0x49a   :  { %5012 = vpow2.f32 %v3258_v33 }
 0x49b   :  { %5014 = vpow2.f32 %v3259_v6  ;;  %v7017_v6 = vld [vmem:[#allocation17_spill] sm:$0xff] }
 0x49c   :  { %5016 = vtanh.f32 %v1610_v15  ;;  %v7018_v15 = vld [vmem:[#allocation18_spill] sm:$0xff] }
 0x4a0   :  { %v5009_v31 = vpop.eup %5008 }
 0x4a1   :  { %v1465_v34 = vmul.f32 %v5009_v31, %v5007_v50  ;;  %v7016_v31 = vld [vmem:[#allocation16_spill] sm:$0xff] }
 0x4a3   :  { %v5011_v7 = vpop.eup %5010  ;;  %1700 = vmatprep.mubr.f32.mxu0 %v1465_v34  ;;  %1771 = vmatprep.mubr.f32.mxu1 %v1465_v34  ;;  %v7019_v34 = vld [vmem:[#allocation19_spill] sm:$0xff] }
 0x4a4   :  { %v5013_v43 = vpop.eup %5012  ;;  %v1615_v46 = vadd.f32 1.0, %v5011_v7  ;;  %v7020_v7 = vld [vmem:[#allocation20_spill] sm:$0xff] }
 0x4a5   :  { %v1621_v61 = vadd.f32 1.0, %v5013_v43  ;;  %v5015_v55 = vpop.eup %5014  ;;  %v7021_v43 = vld [vmem:[#allocation21_spill] sm:$0xff] }
 0x4a6   :  { %5018 = vrcp.f32 %v1615_v46  ;;  %v5017_v11 = vpop.eup %5016  ;;  %v1628_v33 = vadd.f32 1.0, %v5015_v55  ;;  %v7022_v46 = vld [vmem:[#allocation22_spill] sm:$0xff]  ;;  %v7024_v55 = vld [vmem:[#allocation24_spill] sm:$0xff] }
 0x4a7   :  { %5020 = vrcp.f32 %v1621_v61  ;;  %v7023_v61 = vld [vmem:[#allocation23_spill] sm:$0xff] }
 0x4a8   :  { %5022 = vrcp.f32 %v1628_v33  ;;  %v7029_v33 = vld [vmem:[#allocation29_spill] sm:$0xff] }
 0x4b0   :  { %v5019_v44 = vpop.eup %5018 }
 0x4b1   :  { %v5021_v48 = vpop.eup %5020  ;;  %v1632_v62 = vmul.f32 %v5019_v44, %v5017_v11  ;;  %v7025_v11 = vld [vmem:[#allocation25_spill] sm:$0xff]  ;;  %v7026_v44 = vld [vmem:[#allocation26_spill] sm:$0xff] }
 0x4b2   :  { %v1631_v35 = vmul.f32 %v5021_v48, %v5980_v63  ;;  %v5023_v25 = vpop.eup %5022  ;;  %v7014_v63 = vld [vmem:[#allocation14_spill] sm:$0xff]  ;;  %v7027_v48 = vld [vmem:[#allocation27_spill] sm:$0xff] }
 0x4b4   :  { %v6098_v13 = vadd.f32 %v1632_v62, %v1631_v35  ;;  %v7028_v62 = vld [vmem:[#allocation28_spill] sm:$0xff]  ;;  %v7030_v35 = vld [vmem:[#allocation30_spill] sm:$0xff] }
 0x4b6   :  { %5024 = vtanh.f32 %v6098_v13 }
 0x4c0   :  { %v5025_v9 = vpop.eup %5024 }
 0x4c1   :  { %v1635_v50 = vmul.f32 %v5025_v9, %v5023_v25  ;;  %v7031_v25 = vld [vmem:[#allocation31_spill] sm:$0xff]  ;;  %v7032_v9 = vld [vmem:[#allocation32_spill] sm:$0xff] }
 0x4c3   :  { %1701 = vmatmul.mubr.f32.vlgmr.msra.gmra.mrb[14].mxu0 %v1635_v50  ;;  %1772 = vmatmul.mubr.f32.vlgmr.msra.gmra.mrb[14].mxu1 %v1635_v50 }
 0x4c4   :  { %4111 = vmatpush1.bf16.msra.mxu0 %v5370_v10  ;;  %4143 = vmatpush1.bf16.msra.mxu1 %v5373_v14 }
 0x4c5   :  { %4113 = vmatprep.subr.bf16.mxu0 %v5377_v18  ;;  %4145 = vmatprep.subr.bf16.mxu1 %v5379_v19 }
 0x4c6   :  { %1866 = vmatprep.mubr.f32.mxu0 %v6812_v5  ;;  %1937 = vmatprep.mubr.f32.mxu1 %v6812_v5 }
 0x4c8   :  { %4115 = vmatpush1.bf16.msra.mxu0 %v5382_v23  ;;  %4147 = vmatpush1.bf16.msra.mxu1 %v5386_v27 }
 0x4c9   :  { %4117 = vmatprep.subr.bf16.mxu0 %v5388_v28  ;;  %4149 = vmatprep.subr.bf16.mxu1 %v5390_v32 }
 0x4cc   :  { %4119 = vmatpush1.bf16.msra.mxu0 %v5393_v36  ;;  %4151 = vmatpush1.bf16.msra.mxu1 %v5397_v40 }
 0x4cd   :  { %4121 = vmatprep.subr.bf16.mxu0 %v5399_v41  ;;  %4153 = vmatprep.subr.bf16.mxu1 %v5402_v45 }
 0x4d0   :  { %4123 = vmatpush1.bf16.msra.mxu0 %v5405_v52  ;;  %4155 = vmatpush1.bf16.msra.mxu1 %v5409_v53 }
 0x4d1   :  { %4125 = vmatprep.subr.bf16.mxu0 %v5411_v54  ;;  %4157 = vmatprep.subr.bf16.mxu1 %v5414_v58 }
 0x4d4   :  { %4127 = vmatpush1.bf16.msra.mxu0 %v5417_v1  ;;  %4159 = vmatpush1.bf16.msra.mxu1 %v5421_v2 }
 0x4d5   :  { %4129 = vmatprep.subr.bf16.mxu0 %v5423_v3  ;;  %4161 = vmatprep.subr.bf16.mxu1 %v5426_v8 }
 0x4d8   :  { %4131 = vmatpush1.bf16.msra.mxu0 %v5429_v17  ;;  %4163 = vmatpush1.bf16.msra.mxu1 %v5433_v21 }
 0x4d9   :  { %4133 = vmatprep.subr.bf16.mxu0 %v5435_v22  ;;  %4165 = vmatprep.subr.bf16.mxu1 %v5441_v29 }
 0x4dc   :  { %4135 = vmatpush1.bf16.msra.mxu0 %v5447_v38  ;;  %4167 = vmatpush1.bf16.msra.mxu1 %v5451_v39 }
 0x4dd   :  { %4137 = vmatprep.subr.bf16.mxu0 %v5453_v42  ;;  %4169 = vmatprep.subr.bf16.mxu1 %v5456_v47 }
 0x4e0   :  { %4139 = vmatpush1.bf16.msra.mxu0 %v5462_v57  ;;  %4171 = vmatpush1.bf16.msra.mxu1 %v5466_v59 }
 0x4e1   :  { %4173 = vmatprep.subr.bf16.mxu0 %v5468_v60  ;;  %4237 = vmatprep.subr.bf16.mxu1 %v5471_v4 }
 0x4e3   :  { %1867 = vmatmul.mubr.f32.vlgmr.msra.gmra.mrb[16].mxu0 %v1635_v50  ;;  %1938 = vmatmul.mubr.f32.vlgmr.msra.gmra.mrb[16].mxu1 %v1635_v50  ;;  %v7033_v50 = vld [vmem:[#allocation33_spill] sm:$0xff] }
 0x4e4   :  { %4175 = vmatpush1.bf16.msra.mxu0 %v5477_v16  ;;  %4239 = vmatpush1.bf16.msra.mxu1 %v5481_v20 }
 0x4e5   :  { %4177 = vmatprep.subr.bf16.mxu0 %v5483_v24  ;;  %4241 = vmatprep.subr.bf16.mxu1 %v7014_v63 }
 0x4e8   :  { %4179 = vmatpush1.bf16.msra.mxu0 %v7015_v12  ;;  %4243 = vmatpush1.bf16.msra.mxu1 %v7016_v31 }
 0x4e9   :  { %4181 = vmatprep.subr.bf16.mxu0 %v7017_v6  ;;  %4245 = vmatprep.subr.bf16.mxu1 %v7018_v15 }
 0x4ec   :  { %4183 = vmatpush1.bf16.msra.mxu0 %v7019_v34  ;;  %4247 = vmatpush1.bf16.msra.mxu1 %v7020_v7  ;;  %v7076_v7 = vld [vmem:[#allocation74_spill] sm:$0xff] }
 0x4ed   :  { %4185 = vmatprep.subr.bf16.mxu0 %v7021_v43  ;;  %4249 = vmatprep.subr.bf16.mxu1 %v7022_v46  ;;  %v7075_v46 = vld [vmem:[#allocation73_spill] sm:$0xff] }
 0x4f0   :  { %4187 = vmatpush1.bf16.msra.mxu0 %v7023_v61  ;;  %4251 = vmatpush1.bf16.msra.mxu1 %v7024_v55  ;;  %v7034_v61 = vld [vmem:[#allocation34_spill] sm:$0xff]  ;;  %v7035_v55 = vld [vmem:[#allocation35_spill] sm:$0xff] }
 0x4f1   :  { %4189 = vmatprep.subr.bf16.mxu0 %v7025_v11  ;;  %4253 = vmatprep.subr.bf16.mxu1 %v7026_v44  ;;  %v7036_v11 = vld [vmem:[#allocation36_spill] sm:$0xff]  ;;  %v7037_v44 = vld [vmem:[#allocation37_spill] sm:$0xff] }
 0x4f4   :  { %4191 = vmatpush1.bf16.msra.mxu0 %v7027_v48  ;;  %4255 = vmatpush1.bf16.msra.mxu1 %v7028_v62  ;;  %v7038_v48 = vld [vmem:[#allocation38_spill] sm:$0xff]  ;;  %v7039_v62 = vld [vmem:[#allocation39_spill] sm:$0xff] }
 0x4f5   :  { %4193 = vmatprep.subr.bf16.mxu0 %v7029_v33  ;;  %4257 = vmatprep.subr.bf16.mxu1 %v7030_v35  ;;  %v7040_v33 = vld [vmem:[#allocation40_spill] sm:$0xff]  ;;  %v7041_v35 = vld [vmem:[#allocation41_spill] sm:$0xff] }
 0x4f8   :  { %4195 = vmatpush1.bf16.msra.mxu0 %v7031_v25  ;;  %4259 = vmatpush1.bf16.msra.mxu1 %v7032_v9  ;;  %v7042_v25 = vld [vmem:[#allocation42_spill] sm:$0xff]  ;;  %v7043_v9 = vld [vmem:[#allocation43_spill] sm:$0xff] }
 0x4f9   :  { %4197 = vmatprep.subr.bf16.mxu0 %v7033_v50  ;;  %4261 = vmatprep.subr.bf16.mxu1 %v7034_v61  ;;  %v7044_v50 = vld [vmem:[#allocation44_spill] sm:$0xff]  ;;  %v7045_v61 = vld [vmem:[#allocation45_spill] sm:$0xff] }
 0x4fc   :  { %4199 = vmatpush1.bf16.msra.mxu0 %v7035_v55  ;;  %4263 = vmatpush1.bf16.msra.mxu1 %v7036_v11  ;;  %v7046_v55 = vld [vmem:[#allocation46_spill] sm:$0xff]  ;;  %v7047_v11 = vld [vmem:[#allocation47_spill] sm:$0xff] }
 0x4fd   :  { %4201 = vmatprep.subr.bf16.mxu0 %v7037_v44  ;;  %4265 = vmatprep.subr.bf16.mxu1 %v7038_v48  ;;  %v7048_v44 = vld [vmem:[#allocation48_spill] sm:$0xff]  ;;  %v7049_v48 = vld [vmem:[#allocation49_spill] sm:$0xff] }
 0x500   :  { %4203 = vmatpush1.bf16.msra.mxu0 %v7039_v62  ;;  %4267 = vmatpush1.bf16.msra.mxu1 %v7040_v33  ;;  %v7050_v62 = vld [vmem:[#allocation50_spill] sm:$0xff]  ;;  %v7051_v33 = vld [vmem:[#allocation51_spill] sm:$0xff] }
 0x501   :  { %4205 = vmatprep.subr.bf16.mxu0 %v7041_v35  ;;  %4269 = vmatprep.subr.bf16.mxu1 %v7042_v25  ;;  %v7052_v35 = vld [vmem:[#allocation52_spill] sm:$0xff]  ;;  %v7053_v25 = vld [vmem:[#allocation53_spill] sm:$0xff] }
 0x504   :  { %4207 = vmatpush1.bf16.msra.mxu0 %v7043_v9  ;;  %4271 = vmatpush1.bf16.msra.mxu1 %v7044_v50  ;;  %v7054_v9 = vld [vmem:[#allocation54_spill] sm:$0xff]  ;;  %v7055_v50 = vld [vmem:[#allocation55_spill] sm:$0xff] }
 0x505   :  { %4209 = vmatprep.subr.bf16.mxu0 %v7045_v61  ;;  %4273 = vmatprep.subr.bf16.mxu1 %v7046_v55  ;;  %v7056_v61 = vld [vmem:[#allocation56_spill] sm:$0xff]  ;;  %v7057_v55 = vld [vmem:[#allocation57_spill] sm:$0xff] }
 0x508   :  { %4211 = vmatpush1.bf16.msra.mxu0 %v7047_v11  ;;  %4275 = vmatpush1.bf16.msra.mxu1 %v7048_v44  ;;  %v7058_v11 = vld [vmem:[#allocation58_spill] sm:$0xff]  ;;  %v7059_v44 = vld [vmem:[#allocation59_spill] sm:$0xff] }
 0x509   :  { %4213 = vmatprep.subr.bf16.mxu0 %v7049_v48  ;;  %4277 = vmatprep.subr.bf16.mxu1 %v7050_v62  ;;  %v7060_v48 = vld [vmem:[#allocation60_spill] sm:$0xff]  ;;  %v7061_v62 = vld [vmem:[#allocation61_spill] sm:$0xff] }
 0x50c   :  { %4215 = vmatpush1.bf16.msra.mxu0 %v7051_v33  ;;  %4279 = vmatpush1.bf16.msra.mxu1 %v7052_v35  ;;  %v7062_v33 = vld [vmem:[#allocation62_spill] sm:$0xff]  ;;  %v7063_v35 = vld [vmem:[#allocation63_spill] sm:$0xff] }
 0x50d   :  { %4217 = vmatprep.subr.bf16.mxu0 %v7053_v25  ;;  %4281 = vmatprep.subr.bf16.mxu1 %v7054_v9  ;;  %v7064_v25 = vld [vmem:[#allocation64_spill] sm:$0xff]  ;;  %v7065_v9 = vld [vmem:[#allocation65_spill] sm:$0xff] }
 0x510   :  { %4219 = vmatpush1.bf16.msra.mxu0 %v7055_v50  ;;  %4283 = vmatpush1.bf16.msra.mxu1 %v7056_v61  ;;  %v7066_v50 = vld [vmem:[#allocation66_spill] sm:$0xff]  ;;  %v7067_v61 = vld [vmem:[#allocation67_spill] sm:$0xff] }
 0x511   :  { %4221 = vmatprep.subr.bf16.mxu0 %v7057_v55  ;;  %4285 = vmatprep.subr.bf16.mxu1 %v7058_v11  ;;  %v7068_v55 = vld [vmem:[#allocation68_spill] sm:$0xff]  ;;  %v7069_v11 = vld [vmem:[#allocation69_spill] sm:$0xff] }
 0x514   :  { %4223 = vmatpush1.bf16.msra.mxu0 %v7059_v44  ;;  %4287 = vmatpush1.bf16.msra.mxu1 %v7060_v48  ;;  %v7070_v44 = vld [vmem:[#allocation70_spill] sm:$0xff]  ;;  %v7071_v48 = vld [vmem:[#allocation71_spill] sm:$0xff] }
 0x515   :  { %4225 = vmatprep.subr.bf16.mxu0 %v7061_v62  ;;  %4289 = vmatprep.subr.bf16.mxu1 %v7062_v33  ;;  %v7072_v62 = vld [vmem:[#allocation72_spill] sm:$0xff] }
 0x516   :  { %v7073_v33 = vld [vmem:[#allocation12_spill] sm:$0xff] }
 0x518   :  { %4227 = vmatpush1.bf16.msra.mxu0 %v7063_v35  ;;  %4291 = vmatpush1.bf16.msra.mxu1 %v7064_v25  ;;  %v7074_v35 = vld [vmem:[#allocation13_spill] sm:$0xff] }
 0x519   :  { %4229 = vmatprep.subr.bf16.mxu0 %v7065_v9  ;;  %4293 = vmatprep.subr.bf16.mxu1 %v7066_v50 }
 0x51c   :  { %4231 = vmatpush1.bf16.msra.mxu0 %v7067_v61  ;;  %4295 = vmatpush1.bf16.msra.mxu1 %v7068_v55 }
 0x51d   :  { %4233 = vmatprep.subr.bf16.mxu0 %v7069_v11  ;;  %4297 = vmatprep.subr.bf16.mxu1 %v7070_v44  ;;  %v7077_v44 = vld [vmem:[#allocation77_spill] sm:$0xff] }
 0x520   :  { %4235 = vmatpush1.bf16.msra.mxu0 %v7071_v48  ;;  %4299 = vmatpush1.bf16.msra.mxu1 %v7072_v62  ;;  %v7078_v62 = vld [vmem:[#allocation81_spill] sm:$0xff] }
 0x521   :  { %4301 = vmatprep.subr.bf16.mxu0 %v7073_v33  ;;  %4333 = vmatprep.subr.bf16.mxu1 %v7074_v35 }
 0x596   :  { %v1702_v25 = vpop.f32.mrb[14].mxu0  ;;  %v1773_v9 = vpop.f32.mrb[14].mxu1 }
 0x597   :  { %v1703_v50 = vadd.f32 %v1702_v25, %v7075_v46  ;;  %v1704_v43 = vpop.f32.mrb[15].mxu0  ;;  %v1775_v61 = vpop.f32.mrb[15].mxu1  ;;  %v1774_v6 = vadd.f32 %v1773_v9, %v7078_v62 }
 0x598   :  { %v1705_v55 = vadd.f32 %v1704_v43, %v7076_v7  ;;  %v1776_v48 = vadd.f32 %v1775_v61, %v7077_v44  ;;  %v314_v46 = vpop.permute.xlu0 %313 }
 0x599   :  { %v3260_v34 = vmul.f32 -1.442695, %v1703_v50  ;;  %v7079_v50 = vld [vmem:[#allocation75_spill] sm:$0xff] }
 0x59a   :  { %v3261_v11 = vmul.f32 -1.442695, %v1705_v55  ;;  %v3262_v15 = vmul.f32 -1.442695, %v1776_v48  ;;  %v368_v55 = vmul.f32 %v7079_v50, %v314_v46 }
 0x59b   :  { %5026 = vpow2.f32 %v3260_v34 }
 0x59c   :  { %5028 = vpow2.f32 %v3261_v11  ;;  %v7080_v11 = vld [vmem:[#allocation76_spill] sm:$0xff] }
 0x59d   :  { %5030 = vpow2.f32 %v3262_v15  ;;  %v369_v7 = vmul.f32 %v7080_v11, %v314_v46  ;;  %v371_v11 = vmul.f32 %v6879_v26, %v314_v46 }
 0x59e   :  { %5032 = vtanh.f32 %v1774_v6 }
 0x5a5   :  { %v5027_v33 = vpop.eup %5026 }
 0x5a6   :  { %v5029_v31 = vpop.eup %5028  ;;  %v1781_v35 = vadd.f32 1.0, %v5027_v33  ;;  %v421_v33 = vadd.f32 %v6877_v30, %v368_v55  ;;  %v370_v55 = vmul.f32 %v5710_v51, %v314_v46 }
 0x5a7   :  { %v1787_v12 = vadd.f32 1.0, %v5029_v31  ;;  %v5031_v25 = vpop.eup %5030  ;;  %v422_v31 = vadd.f32 %v6946_v49, %v369_v7 }
 0x5a8   :  { %5034 = vrcp.f32 %v1781_v35  ;;  %v5033_v43 = vpop.eup %5032  ;;  %v1794_v44 = vadd.f32 1.0, %v5031_v25 }
 0x5a9   :  { %5036 = vrcp.f32 %v1787_v12 }
 0x5aa   :  { %5038 = vrcp.f32 %v1794_v44  ;;  %v423_v44 = vadd.f32 %v5715_v0, %v370_v55 }
 0x5b2   :  { %v5035_v34 = vpop.eup %5034 }
 0x5b3   :  { %v5037_v61 = vpop.eup %5036  ;;  %v1798_v48 = vmul.f32 %v5035_v34, %v5033_v43 }
 0x5b4   :  { %v1797_v9 = vmul.f32 %v5037_v61, %v6090_v56  ;;  %v424_v56 = vadd.f32 %v5707_v37, %v371_v11  ;;  %v5039_v34 = vpop.eup %5038 }
 0x5b6   :  { %v1868_v15 = vpop.f32.mrb[16].mxu0  ;;  %v1939_v6 = vpop.f32.mrb[16].mxu1  ;;  %v6208_v12 = vadd.f32 %v1798_v48, %v1797_v9 }
 0x5b7   :  { %v1944_v35 = vadd.f32 %v1868_v15, %v421_v33  ;;  %v1870_v62 = vpop.f32.mrb[17].mxu0  ;;  %v1941_v50 = vpop.f32.mrb[17].mxu1  ;;  %v1946_v9 = vadd.f32 %v1939_v6, %v423_v44  ;;  %v7082_v44 = vld [vmem:[#allocation15_spill] sm:$0xff] }
 0x5b8   :  { %v1945_v63 = vadd.f32 %v1870_v62, %v422_v31  ;;  %5040 = vtanh.f32 %v6208_v12  ;;  %v1947_v7 = vadd.f32 %v1941_v50, %v424_v56 }
 0x5b9   :  { %v3263_v25 = vmul.f32 -1.442695, %v1944_v35 }
 0x5ba   :  { %v3264_v43 = vmul.f32 -1.442695, %v1945_v63  ;;  %v3265_v48 = vmul.f32 -1.442695, %v1947_v7 }
 0x5bb   :  { %5042 = vpow2.f32 %v3263_v25 }
 0x5bc   :  { %5044 = vpow2.f32 %v3264_v43 }
 0x5bd   :  { %5046 = vpow2.f32 %v3265_v48  ;;  %v7084_v48 = vld [vmem:[#allocation17_spill] sm:$0xff] }
 0x5be   :  { %5048 = vtanh.f32 %v1946_v9  ;;  %v7085_v9 = vld [vmem:[#allocation18_spill] sm:$0xff] }
 0x5c2   :  { %v5041_v61 = vpop.eup %5040 }
 0x5c3   :  { %v1801_v62 = vmul.f32 %v5041_v61, %v5039_v34  ;;  %v7083_v61 = vld [vmem:[#allocation16_spill] sm:$0xff] }
 0x5c5   :  { %v5043_v33 = vpop.eup %5042  ;;  %2036 = vmatprep.mubr.f32.mxu0 %v1801_v62  ;;  %2107 = vmatprep.mubr.f32.mxu1 %v1801_v62  ;;  %v7086_v62 = vld [vmem:[#allocation19_spill] sm:$0xff] }
 0x5c6   :  { %v5045_v15 = vpop.eup %5044  ;;  %v1951_v31 = vadd.f32 1.0, %v5043_v33  ;;  %v7087_v33 = vld [vmem:[#allocation20_spill] sm:$0xff] }
 0x5c7   :  { %v1957_v63 = vadd.f32 1.0, %v5045_v15  ;;  %v5047_v11 = vpop.eup %5046  ;;  %v7088_v15 = vld [vmem:[#allocation21_spill] sm:$0xff] }
 0x5c8   :  { %5050 = vrcp.f32 %v1951_v31  ;;  %v5049_v46 = vpop.eup %5048  ;;  %v1964_v43 = vadd.f32 1.0, %v5047_v11  ;;  %v7089_v31 = vld [vmem:[#allocation22_spill] sm:$0xff]  ;;  %v7091_v11 = vld [vmem:[#allocation24_spill] sm:$0xff] }
 0x5c9   :  { %5052 = vrcp.f32 %v1957_v63  ;;  %v7090_v63 = vld [vmem:[#allocation23_spill] sm:$0xff] }
 0x5ca   :  { %5054 = vrcp.f32 %v1964_v43  ;;  %v7096_v43 = vld [vmem:[#allocation29_spill] sm:$0xff] }
 0x5d2   :  { %v5051_v50 = vpop.eup %5050 }
 0x5d3   :  { %v5053_v35 = vpop.eup %5052  ;;  %v1968_v25 = vmul.f32 %v5051_v50, %v5049_v46  ;;  %v7092_v46 = vld [vmem:[#allocation25_spill] sm:$0xff]  ;;  %v7093_v50 = vld [vmem:[#allocation26_spill] sm:$0xff] }
 0x5d4   :  { %v1967_v56 = vmul.f32 %v5053_v35, %v6098_v13  ;;  %v5055_v55 = vpop.eup %5054  ;;  %v7081_v13 = vld [vmem:[#allocation14_spill] sm:$0xff]  ;;  %v7094_v35 = vld [vmem:[#allocation27_spill] sm:$0xff] }
 0x5d6   :  { %v6216_v6 = vadd.f32 %v1968_v25, %v1967_v56  ;;  %v7095_v25 = vld [vmem:[#allocation28_spill] sm:$0xff]  ;;  %v7097_v56 = vld [vmem:[#allocation30_spill] sm:$0xff] }
 0x5d8   :  { %5056 = vtanh.f32 %v6216_v6 }
 0x5e2   :  { %v5057_v7 = vpop.eup %5056 }
 0x5e3   :  { %v1971_v34 = vmul.f32 %v5057_v7, %v5055_v55  ;;  %v7098_v55 = vld [vmem:[#allocation31_spill] sm:$0xff]  ;;  %v7099_v7 = vld [vmem:[#allocation32_spill] sm:$0xff] }
 0x5e5   :  { %2037 = vmatmul.mubr.f32.vlgmr.msra.gmra.mrb[18].mxu0 %v1971_v34  ;;  %2108 = vmatmul.mubr.f32.vlgmr.msra.gmra.mrb[18].mxu1 %v1971_v34 }
 0x5e6   :  { %4303 = vmatpush1.bf16.msra.mxu0 %v5370_v10  ;;  %4335 = vmatpush1.bf16.msra.mxu1 %v5373_v14 }
 0x5e7   :  { %4305 = vmatprep.subr.bf16.mxu0 %v5377_v18  ;;  %4337 = vmatprep.subr.bf16.mxu1 %v5379_v19 }
 0x5e8   :  { %2202 = vmatprep.mubr.f32.mxu0 %v6812_v5  ;;  %2273 = vmatprep.mubr.f32.mxu1 %v6812_v5 }
 0x5ea   :  { %4307 = vmatpush1.bf16.msra.mxu0 %v5382_v23  ;;  %4339 = vmatpush1.bf16.msra.mxu1 %v5386_v27 }
 0x5eb   :  { %4309 = vmatprep.subr.bf16.mxu0 %v5388_v28  ;;  %4341 = vmatprep.subr.bf16.mxu1 %v5390_v32 }
 0x5ee   :  { %4311 = vmatpush1.bf16.msra.mxu0 %v5393_v36  ;;  %4343 = vmatpush1.bf16.msra.mxu1 %v5397_v40 }
 0x5ef   :  { %4313 = vmatprep.subr.bf16.mxu0 %v5399_v41  ;;  %4345 = vmatprep.subr.bf16.mxu1 %v5402_v45 }
 0x5f2   :  { %4315 = vmatpush1.bf16.msra.mxu0 %v5405_v52  ;;  %4347 = vmatpush1.bf16.msra.mxu1 %v5409_v53 }
 0x5f3   :  { %4317 = vmatprep.subr.bf16.mxu0 %v5411_v54  ;;  %4349 = vmatprep.subr.bf16.mxu1 %v5414_v58 }
 0x5f6   :  { %4319 = vmatpush1.bf16.msra.mxu0 %v5417_v1  ;;  %4351 = vmatpush1.bf16.msra.mxu1 %v5421_v2 }
 0x5f7   :  { %4321 = vmatprep.subr.bf16.mxu0 %v5423_v3  ;;  %4353 = vmatprep.subr.bf16.mxu1 %v5426_v8 }
 0x5fa   :  { %4323 = vmatpush1.bf16.msra.mxu0 %v5429_v17  ;;  %4355 = vmatpush1.bf16.msra.mxu1 %v5433_v21 }
 0x5fb   :  { %4325 = vmatprep.subr.bf16.mxu0 %v5435_v22  ;;  %4357 = vmatprep.subr.bf16.mxu1 %v5441_v29 }
 0x5fe   :  { %4327 = vmatpush1.bf16.msra.mxu0 %v5447_v38  ;;  %4359 = vmatpush1.bf16.msra.mxu1 %v5451_v39 }
 0x5ff   :  { %4329 = vmatprep.subr.bf16.mxu0 %v5453_v42  ;;  %4361 = vmatprep.subr.bf16.mxu1 %v5456_v47 }
 0x602   :  { %4331 = vmatpush1.bf16.msra.mxu0 %v5462_v57  ;;  %4363 = vmatpush1.bf16.msra.mxu1 %v5466_v59 }
 0x603   :  { %4365 = vmatprep.subr.bf16.mxu0 %v5468_v60  ;;  %4429 = vmatprep.subr.bf16.mxu1 %v5471_v4 }
 0x605   :  { %2203 = vmatmul.mubr.f32.vlgmr.msra.gmra.mrb[20].mxu0 %v1971_v34  ;;  %2274 = vmatmul.mubr.f32.vlgmr.msra.gmra.mrb[20].mxu1 %v1971_v34  ;;  %v7100_v34 = vld [vmem:[#allocation33_spill] sm:$0xff] }
 0x606   :  { %4367 = vmatpush1.bf16.msra.mxu0 %v5477_v16  ;;  %4431 = vmatpush1.bf16.msra.mxu1 %v5481_v20 }
 0x607   :  { %4369 = vmatprep.subr.bf16.mxu0 %v5483_v24  ;;  %4433 = vmatprep.subr.bf16.mxu1 %v7081_v13 }
 0x60a   :  { %4371 = vmatpush1.bf16.msra.mxu0 %v7082_v44  ;;  %4435 = vmatpush1.bf16.msra.mxu1 %v7083_v61 }
 0x60b   :  { %4373 = vmatprep.subr.bf16.mxu0 %v7084_v48  ;;  %4437 = vmatprep.subr.bf16.mxu1 %v7085_v9 }
 0x60e   :  { %4375 = vmatpush1.bf16.msra.mxu0 %v7086_v62  ;;  %4439 = vmatpush1.bf16.msra.mxu1 %v7087_v33  ;;  %v7143_v33 = vld [vmem:[#allocation74_spill] sm:$0xff] }
 0x60f   :  { %4377 = vmatprep.subr.bf16.mxu0 %v7088_v15  ;;  %4441 = vmatprep.subr.bf16.mxu1 %v7089_v31  ;;  %v7142_v31 = vld [vmem:[#allocation73_spill] sm:$0xff] }
 0x612   :  { %4379 = vmatpush1.bf16.msra.mxu0 %v7090_v63  ;;  %4443 = vmatpush1.bf16.msra.mxu1 %v7091_v11  ;;  %v7101_v63 = vld [vmem:[#allocation34_spill] sm:$0xff]  ;;  %v7102_v11 = vld [vmem:[#allocation35_spill] sm:$0xff] }
 0x613   :  { %4381 = vmatprep.subr.bf16.mxu0 %v7092_v46  ;;  %4445 = vmatprep.subr.bf16.mxu1 %v7093_v50  ;;  %v7103_v46 = vld [vmem:[#allocation36_spill] sm:$0xff]  ;;  %v7104_v50 = vld [vmem:[#allocation37_spill] sm:$0xff] }
 0x616   :  { %4383 = vmatpush1.bf16.msra.mxu0 %v7094_v35  ;;  %4447 = vmatpush1.bf16.msra.mxu1 %v7095_v25  ;;  %v7105_v35 = vld [vmem:[#allocation38_spill] sm:$0xff]  ;;  %v7106_v25 = vld [vmem:[#allocation39_spill] sm:$0xff] }
 0x617   :  { %4385 = vmatprep.subr.bf16.mxu0 %v7096_v43  ;;  %4449 = vmatprep.subr.bf16.mxu1 %v7097_v56  ;;  %v7107_v43 = vld [vmem:[#allocation40_spill] sm:$0xff]  ;;  %v7108_v56 = vld [vmem:[#allocation41_spill] sm:$0xff] }
 0x61a   :  { %4387 = vmatpush1.bf16.msra.mxu0 %v7098_v55  ;;  %4451 = vmatpush1.bf16.msra.mxu1 %v7099_v7  ;;  %v7109_v55 = vld [vmem:[#allocation42_spill] sm:$0xff]  ;;  %v7110_v7 = vld [vmem:[#allocation43_spill] sm:$0xff] }
 0x61b   :  { %4389 = vmatprep.subr.bf16.mxu0 %v7100_v34  ;;  %4453 = vmatprep.subr.bf16.mxu1 %v7101_v63  ;;  %v7111_v34 = vld [vmem:[#allocation44_spill] sm:$0xff]  ;;  %v7112_v63 = vld [vmem:[#allocation45_spill] sm:$0xff] }
 0x61e   :  { %4391 = vmatpush1.bf16.msra.mxu0 %v7102_v11  ;;  %4455 = vmatpush1.bf16.msra.mxu1 %v7103_v46  ;;  %v7113_v11 = vld [vmem:[#allocation46_spill] sm:$0xff]  ;;  %v7114_v46 = vld [vmem:[#allocation47_spill] sm:$0xff] }
 0x61f   :  { %4393 = vmatprep.subr.bf16.mxu0 %v7104_v50  ;;  %4457 = vmatprep.subr.bf16.mxu1 %v7105_v35  ;;  %v7115_v50 = vld [vmem:[#allocation48_spill] sm:$0xff]  ;;  %v7116_v35 = vld [vmem:[#allocation49_spill] sm:$0xff] }
 0x622   :  { %4395 = vmatpush1.bf16.msra.mxu0 %v7106_v25  ;;  %4459 = vmatpush1.bf16.msra.mxu1 %v7107_v43  ;;  %v7117_v25 = vld [vmem:[#allocation50_spill] sm:$0xff]  ;;  %v7118_v43 = vld [vmem:[#allocation51_spill] sm:$0xff] }
 0x623   :  { %4397 = vmatprep.subr.bf16.mxu0 %v7108_v56  ;;  %4461 = vmatprep.subr.bf16.mxu1 %v7109_v55  ;;  %v7119_v56 = vld [vmem:[#allocation52_spill] sm:$0xff]  ;;  %v7120_v55 = vld [vmem:[#allocation53_spill] sm:$0xff] }
 0x626   :  { %4399 = vmatpush1.bf16.msra.mxu0 %v7110_v7  ;;  %4463 = vmatpush1.bf16.msra.mxu1 %v7111_v34  ;;  %v7121_v7 = vld [vmem:[#allocation54_spill] sm:$0xff]  ;;  %v7122_v34 = vld [vmem:[#allocation55_spill] sm:$0xff] }
 0x627   :  { %4401 = vmatprep.subr.bf16.mxu0 %v7112_v63  ;;  %4465 = vmatprep.subr.bf16.mxu1 %v7113_v11  ;;  %v7123_v63 = vld [vmem:[#allocation56_spill] sm:$0xff]  ;;  %v7124_v11 = vld [vmem:[#allocation57_spill] sm:$0xff] }
 0x62a   :  { %4403 = vmatpush1.bf16.msra.mxu0 %v7114_v46  ;;  %4467 = vmatpush1.bf16.msra.mxu1 %v7115_v50  ;;  %v7125_v46 = vld [vmem:[#allocation58_spill] sm:$0xff]  ;;  %v7126_v50 = vld [vmem:[#allocation59_spill] sm:$0xff] }
 0x62b   :  { %4405 = vmatprep.subr.bf16.mxu0 %v7116_v35  ;;  %4469 = vmatprep.subr.bf16.mxu1 %v7117_v25  ;;  %v7127_v35 = vld [vmem:[#allocation60_spill] sm:$0xff]  ;;  %v7128_v25 = vld [vmem:[#allocation61_spill] sm:$0xff] }
 0x62e   :  { %4407 = vmatpush1.bf16.msra.mxu0 %v7118_v43  ;;  %4471 = vmatpush1.bf16.msra.mxu1 %v7119_v56  ;;  %v7129_v43 = vld [vmem:[#allocation62_spill] sm:$0xff]  ;;  %v7130_v56 = vld [vmem:[#allocation63_spill] sm:$0xff] }
 0x62f   :  { %4409 = vmatprep.subr.bf16.mxu0 %v7120_v55  ;;  %4473 = vmatprep.subr.bf16.mxu1 %v7121_v7  ;;  %v7131_v55 = vld [vmem:[#allocation64_spill] sm:$0xff]  ;;  %v7132_v7 = vld [vmem:[#allocation65_spill] sm:$0xff] }
 0x632   :  { %4411 = vmatpush1.bf16.msra.mxu0 %v7122_v34  ;;  %4475 = vmatpush1.bf16.msra.mxu1 %v7123_v63  ;;  %v7133_v34 = vld [vmem:[#allocation66_spill] sm:$0xff]  ;;  %v7134_v63 = vld [vmem:[#allocation67_spill] sm:$0xff] }
 0x633   :  { %4413 = vmatprep.subr.bf16.mxu0 %v7124_v11  ;;  %4477 = vmatprep.subr.bf16.mxu1 %v7125_v46  ;;  %v7135_v11 = vld [vmem:[#allocation68_spill] sm:$0xff]  ;;  %v7136_v46 = vld [vmem:[#allocation69_spill] sm:$0xff] }
 0x636   :  { %4415 = vmatpush1.bf16.msra.mxu0 %v7126_v50  ;;  %4479 = vmatpush1.bf16.msra.mxu1 %v7127_v35  ;;  %v7137_v50 = vld [vmem:[#allocation70_spill] sm:$0xff]  ;;  %v7138_v35 = vld [vmem:[#allocation71_spill] sm:$0xff] }
 0x637   :  { %4417 = vmatprep.subr.bf16.mxu0 %v7128_v25  ;;  %4481 = vmatprep.subr.bf16.mxu1 %v7129_v43  ;;  %v7139_v25 = vld [vmem:[#allocation72_spill] sm:$0xff] }
 0x638   :  { %v7140_v43 = vld [vmem:[#allocation12_spill] sm:$0xff] }
 0x63a   :  { %4419 = vmatpush1.bf16.msra.mxu0 %v7130_v56  ;;  %4483 = vmatpush1.bf16.msra.mxu1 %v7131_v55  ;;  %v7141_v56 = vld [vmem:[#allocation13_spill] sm:$0xff] }
 0x63b   :  { %4421 = vmatprep.subr.bf16.mxu0 %v7132_v7  ;;  %4485 = vmatprep.subr.bf16.mxu1 %v7133_v34 }
 0x63e   :  { %4423 = vmatpush1.bf16.msra.mxu0 %v7134_v63  ;;  %4487 = vmatpush1.bf16.msra.mxu1 %v7135_v11 }
 0x63f   :  { %4425 = vmatprep.subr.bf16.mxu0 %v7136_v46  ;;  %4489 = vmatprep.subr.bf16.mxu1 %v7137_v50  ;;  %v7144_v50 = vld [vmem:[#allocation77_spill] sm:$0xff] }
 0x642   :  { %4427 = vmatpush1.bf16.msra.mxu0 %v7138_v35  ;;  %4491 = vmatpush1.bf16.msra.mxu1 %v7139_v25  ;;  %v7145_v25 = vld [vmem:[#allocation81_spill] sm:$0xff] }
 0x643   :  { %4493 = vmatprep.subr.bf16.mxu0 %v7140_v43  ;;  %4525 = vmatprep.subr.bf16.mxu1 %v7141_v56 }
 0x6b8   :  { %v2038_v55 = vpop.f32.mrb[18].mxu0  ;;  %v2109_v7 = vpop.f32.mrb[18].mxu1 }
 0x6b9   :  { %v2039_v34 = vadd.f32 %v2038_v55, %v7142_v31  ;;  %v2040_v15 = vpop.f32.mrb[19].mxu0  ;;  %v2111_v63 = vpop.f32.mrb[19].mxu1  ;;  %v2110_v48 = vadd.f32 %v2109_v7, %v7145_v25 }
 0x6ba   :  { %v2041_v11 = vadd.f32 %v2040_v15, %v7143_v33  ;;  %v2112_v35 = vadd.f32 %v2111_v63, %v7144_v50  ;;  %v319_v31 = vpop.permute.xlu1 %318 }
 0x6bb   :  { %v3266_v62 = vmul.f32 -1.442695, %v2039_v34  ;;  %v7146_v34 = vld [vmem:[#allocation75_spill] sm:$0xff] }
 0x6bc   :  { %v3267_v46 = vmul.f32 -1.442695, %v2041_v11  ;;  %v3268_v9 = vmul.f32 -1.442695, %v2112_v35  ;;  %v372_v11 = vmul.f32 %v7146_v34, %v319_v31 }
 0x6bd   :  { %5058 = vpow2.f32 %v3266_v62 }
 0x6be   :  { %5060 = vpow2.f32 %v3267_v46  ;;  %v7147_v46 = vld [vmem:[#allocation76_spill] sm:$0xff] }
 0x6bf   :  { %5062 = vpow2.f32 %v3268_v9  ;;  %v373_v33 = vmul.f32 %v7147_v46, %v319_v31  ;;  %v375_v46 = vmul.f32 %v6879_v26, %v319_v31 }
 0x6c0   :  { %5064 = vtanh.f32 %v2110_v48 }
 0x6c7   :  { %v5059_v43 = vpop.eup %5058 }
 0x6c8   :  { %v5061_v61 = vpop.eup %5060  ;;  %v2117_v56 = vadd.f32 1.0, %v5059_v43  ;;  %v425_v43 = vadd.f32 %v6877_v30, %v372_v11  ;;  %v374_v11 = vmul.f32 %v5710_v51, %v319_v31 }
 0x6c9   :  { %v2123_v44 = vadd.f32 1.0, %v5061_v61  ;;  %v5063_v55 = vpop.eup %5062  ;;  %v426_v61 = vadd.f32 %v6946_v49, %v373_v33 }
 0x6ca   :  { %5066 = vrcp.f32 %v2117_v56  ;;  %v5065_v15 = vpop.eup %5064  ;;  %v2130_v50 = vadd.f32 1.0, %v5063_v55 }
 0x6cb   :  { %5068 = vrcp.f32 %v2123_v44 }
 0x6cc   :  { %5070 = vrcp.f32 %v2130_v50  ;;  %v427_v50 = vadd.f32 %v5715_v0, %v374_v11 }
 0x6d4   :  { %v5067_v62 = vpop.eup %5066 }
 0x6d5   :  { %v5069_v63 = vpop.eup %5068  ;;  %v2134_v35 = vmul.f32 %v5067_v62, %v5065_v15 }
 0x6d6   :  { %v2133_v7 = vmul.f32 %v5069_v63, %v6208_v12  ;;  %v428_v12 = vadd.f32 %v5707_v37, %v375_v46  ;;  %v5071_v62 = vpop.eup %5070 }
 0x6d8   :  { %v2204_v9 = vpop.f32.mrb[20].mxu0  ;;  %v2275_v48 = vpop.f32.mrb[20].mxu1  ;;  %v6326_v44 = vadd.f32 %v2134_v35, %v2133_v7 }
 0x6d9   :  { %v2280_v56 = vadd.f32 %v2204_v9, %v425_v43  ;;  %v2206_v25 = vpop.f32.mrb[21].mxu0  ;;  %v2277_v34 = vpop.f32.mrb[21].mxu1  ;;  %v2282_v7 = vadd.f32 %v2275_v48, %v427_v50  ;;  %v7149_v50 = vld [vmem:[#allocation15_spill] sm:$0xff] }
 0x6da   :  { %v2281_v13 = vadd.f32 %v2206_v25, %v426_v61  ;;  %5072 = vtanh.f32 %v6326_v44  ;;  %v2283_v33 = vadd.f32 %v2277_v34, %v428_v12 }
 0x6db   :  { %v3269_v55 = vmul.f32 -1.442695, %v2280_v56 }
 0x6dc   :  { %v3270_v15 = vmul.f32 -1.442695, %v2281_v13  ;;  %v3271_v35 = vmul.f32 -1.442695, %v2283_v33 }
 0x6dd   :  { %5074 = vpow2.f32 %v3269_v55 }
 0x6de   :  { %5076 = vpow2.f32 %v3270_v15 }
 0x6df   :  { %5078 = vpow2.f32 %v3271_v35  ;;  %v7151_v35 = vld [vmem:[#allocation17_spill] sm:$0xff] }
 0x6e0   :  { %5080 = vtanh.f32 %v2282_v7  ;;  %v7152_v7 = vld [vmem:[#allocation18_spill] sm:$0xff] }
 0x6e4   :  { %v5073_v63 = vpop.eup %5072 }
 0x6e5   :  { %v2137_v25 = vmul.f32 %v5073_v63, %v5071_v62  ;;  %v7150_v63 = vld [vmem:[#allocation16_spill] sm:$0xff] }
 0x6e7   :  { %v5075_v43 = vpop.eup %5074  ;;  %2372 = vmatprep.mubr.f32.mxu0 %v2137_v25  ;;  %2443 = vmatprep.mubr.f32.mxu1 %v2137_v25  ;;  %v7153_v25 = vld [vmem:[#allocation19_spill] sm:$0xff] }
 0x6e8   :  { %v5077_v9 = vpop.eup %5076  ;;  %v2287_v61 = vadd.f32 1.0, %v5075_v43  ;;  %v7154_v43 = vld [vmem:[#allocation20_spill] sm:$0xff] }
 0x6e9   :  { %v2293_v13 = vadd.f32 1.0, %v5077_v9  ;;  %v5079_v46 = vpop.eup %5078  ;;  %v7155_v9 = vld [vmem:[#allocation21_spill] sm:$0xff] }
 0x6ea   :  { %5082 = vrcp.f32 %v2287_v61  ;;  %v5081_v31 = vpop.eup %5080  ;;  %v2300_v15 = vadd.f32 1.0, %v5079_v46  ;;  %v7156_v61 = vld [vmem:[#allocation22_spill] sm:$0xff]  ;;  %v7158_v46 = vld [vmem:[#allocation24_spill] sm:$0xff] }
 0x6eb   :  { %5084 = vrcp.f32 %v2293_v13  ;;  %v7157_v13 = vld [vmem:[#allocation23_spill] sm:$0xff] }
 0x6ec   :  { %5086 = vrcp.f32 %v2300_v15  ;;  %v7163_v15 = vld [vmem:[#allocation29_spill] sm:$0xff] }
 0x6f4   :  { %v5083_v34 = vpop.eup %5082 }
 0x6f5   :  { %v5085_v56 = vpop.eup %5084  ;;  %v2304_v55 = vmul.f32 %v5083_v34, %v5081_v31  ;;  %v7159_v31 = vld [vmem:[#allocation25_spill] sm:$0xff]  ;;  %v7160_v34 = vld [vmem:[#allocation26_spill] sm:$0xff] }
 0x6f6   :  { %v2303_v12 = vmul.f32 %v5085_v56, %v6216_v6  ;;  %v5087_v11 = vpop.eup %5086  ;;  %v7148_v6 = vld [vmem:[#allocation14_spill] sm:$0xff]  ;;  %v7161_v56 = vld [vmem:[#allocation27_spill] sm:$0xff] }
 0x6f8   :  { %v6334_v48 = vadd.f32 %v2304_v55, %v2303_v12  ;;  %v7162_v55 = vld [vmem:[#allocation28_spill] sm:$0xff]  ;;  %v7164_v12 = vld [vmem:[#allocation30_spill] sm:$0xff] }
 0x6fa   :  { %5088 = vtanh.f32 %v6334_v48 }
 0x704   :  { %v5089_v33 = vpop.eup %5088 }
 0x705   :  { %v2307_v62 = vmul.f32 %v5089_v33, %v5087_v11  ;;  %v7165_v11 = vld [vmem:[#allocation31_spill] sm:$0xff]  ;;  %v7166_v33 = vld [vmem:[#allocation32_spill] sm:$0xff] }
 0x707   :  { %2373 = vmatmul.mubr.f32.vlgmr.msra.gmra.mrb[22].mxu0 %v2307_v62  ;;  %2444 = vmatmul.mubr.f32.vlgmr.msra.gmra.mrb[22].mxu1 %v2307_v62 }
 0x708   :  { %4495 = vmatpush1.bf16.msra.mxu0 %v5370_v10  ;;  %4527 = vmatpush1.bf16.msra.mxu1 %v5373_v14 }
 0x709   :  { %4497 = vmatprep.subr.bf16.mxu0 %v5377_v18  ;;  %4529 = vmatprep.subr.bf16.mxu1 %v5379_v19 }
 0x70a   :  { %2538 = vmatprep.mubr.f32.mxu0 %v6812_v5  ;;  %2609 = vmatprep.mubr.f32.mxu1 %v6812_v5 }
 0x70c   :  { %4499 = vmatpush1.bf16.msra.mxu0 %v5382_v23  ;;  %4531 = vmatpush1.bf16.msra.mxu1 %v5386_v27 }
 0x70d   :  { %4501 = vmatprep.subr.bf16.mxu0 %v5388_v28  ;;  %4533 = vmatprep.subr.bf16.mxu1 %v5390_v32 }
 0x710   :  { %4503 = vmatpush1.bf16.msra.mxu0 %v5393_v36  ;;  %4535 = vmatpush1.bf16.msra.mxu1 %v5397_v40 }
 0x711   :  { %4505 = vmatprep.subr.bf16.mxu0 %v5399_v41  ;;  %4537 = vmatprep.subr.bf16.mxu1 %v5402_v45 }
 0x714   :  { %4507 = vmatpush1.bf16.msra.mxu0 %v5405_v52  ;;  %4539 = vmatpush1.bf16.msra.mxu1 %v5409_v53 }
 0x715   :  { %4509 = vmatprep.subr.bf16.mxu0 %v5411_v54  ;;  %4541 = vmatprep.subr.bf16.mxu1 %v5414_v58 }
 0x718   :  { %4511 = vmatpush1.bf16.msra.mxu0 %v5417_v1  ;;  %4543 = vmatpush1.bf16.msra.mxu1 %v5421_v2 }
 0x719   :  { %4513 = vmatprep.subr.bf16.mxu0 %v5423_v3  ;;  %4545 = vmatprep.subr.bf16.mxu1 %v5426_v8 }
 0x71c   :  { %4515 = vmatpush1.bf16.msra.mxu0 %v5429_v17  ;;  %4547 = vmatpush1.bf16.msra.mxu1 %v5433_v21 }
 0x71d   :  { %4517 = vmatprep.subr.bf16.mxu0 %v5435_v22  ;;  %4549 = vmatprep.subr.bf16.mxu1 %v5441_v29 }
 0x720   :  { %4519 = vmatpush1.bf16.msra.mxu0 %v5447_v38  ;;  %4551 = vmatpush1.bf16.msra.mxu1 %v5451_v39 }
 0x721   :  { %4521 = vmatprep.subr.bf16.mxu0 %v5453_v42  ;;  %4553 = vmatprep.subr.bf16.mxu1 %v5456_v47 }
 0x724   :  { %4523 = vmatpush1.bf16.msra.mxu0 %v5462_v57  ;;  %4555 = vmatpush1.bf16.msra.mxu1 %v5466_v59 }
 0x725   :  { %4557 = vmatprep.subr.bf16.mxu0 %v5468_v60  ;;  %4621 = vmatprep.subr.bf16.mxu1 %v5471_v4 }
 0x727   :  { %2539 = vmatmul.mubr.f32.vlgmr.msra.gmra.mrb[24].mxu0 %v2307_v62  ;;  %2610 = vmatmul.mubr.f32.vlgmr.msra.gmra.mrb[24].mxu1 %v2307_v62  ;;  %v7167_v62 = vld [vmem:[#allocation33_spill] sm:$0xff] }
 0x728   :  { %4559 = vmatpush1.bf16.msra.mxu0 %v5477_v16  ;;  %4623 = vmatpush1.bf16.msra.mxu1 %v5481_v20 }
 0x729   :  { %4561 = vmatprep.subr.bf16.mxu0 %v5483_v24  ;;  %4625 = vmatprep.subr.bf16.mxu1 %v7148_v6 }
 0x72c   :  { %4563 = vmatpush1.bf16.msra.mxu0 %v7149_v50  ;;  %4627 = vmatpush1.bf16.msra.mxu1 %v7150_v63 }
 0x72d   :  { %4565 = vmatprep.subr.bf16.mxu0 %v7151_v35  ;;  %4629 = vmatprep.subr.bf16.mxu1 %v7152_v7 }
 0x730   :  { %4567 = vmatpush1.bf16.msra.mxu0 %v7153_v25  ;;  %4631 = vmatpush1.bf16.msra.mxu1 %v7154_v43  ;;  %v7210_v43 = vld [vmem:[#allocation74_spill] sm:$0xff] }
 0x731   :  { %4569 = vmatprep.subr.bf16.mxu0 %v7155_v9  ;;  %4633 = vmatprep.subr.bf16.mxu1 %v7156_v61  ;;  %v7209_v61 = vld [vmem:[#allocation73_spill] sm:$0xff] }
 0x734   :  { %4571 = vmatpush1.bf16.msra.mxu0 %v7157_v13  ;;  %4635 = vmatpush1.bf16.msra.mxu1 %v7158_v46  ;;  %v7168_v13 = vld [vmem:[#allocation34_spill] sm:$0xff]  ;;  %v7169_v46 = vld [vmem:[#allocation35_spill] sm:$0xff] }
 0x735   :  { %4573 = vmatprep.subr.bf16.mxu0 %v7159_v31  ;;  %4637 = vmatprep.subr.bf16.mxu1 %v7160_v34  ;;  %v7170_v31 = vld [vmem:[#allocation36_spill] sm:$0xff]  ;;  %v7171_v34 = vld [vmem:[#allocation37_spill] sm:$0xff] }
 0x738   :  { %4575 = vmatpush1.bf16.msra.mxu0 %v7161_v56  ;;  %4639 = vmatpush1.bf16.msra.mxu1 %v7162_v55  ;;  %v7172_v56 = vld [vmem:[#allocation38_spill] sm:$0xff]  ;;  %v7173_v55 = vld [vmem:[#allocation39_spill] sm:$0xff] }
 0x739   :  { %4577 = vmatprep.subr.bf16.mxu0 %v7163_v15  ;;  %4641 = vmatprep.subr.bf16.mxu1 %v7164_v12  ;;  %v7174_v15 = vld [vmem:[#allocation40_spill] sm:$0xff]  ;;  %v7175_v12 = vld [vmem:[#allocation41_spill] sm:$0xff] }
 0x73c   :  { %4579 = vmatpush1.bf16.msra.mxu0 %v7165_v11  ;;  %4643 = vmatpush1.bf16.msra.mxu1 %v7166_v33  ;;  %v7176_v11 = vld [vmem:[#allocation42_spill] sm:$0xff]  ;;  %v7177_v33 = vld [vmem:[#allocation43_spill] sm:$0xff] }
 0x73d   :  { %4581 = vmatprep.subr.bf16.mxu0 %v7167_v62  ;;  %4645 = vmatprep.subr.bf16.mxu1 %v7168_v13  ;;  %v7178_v62 = vld [vmem:[#allocation44_spill] sm:$0xff]  ;;  %v7179_v13 = vld [vmem:[#allocation45_spill] sm:$0xff] }
 0x740   :  { %4583 = vmatpush1.bf16.msra.mxu0 %v7169_v46  ;;  %4647 = vmatpush1.bf16.msra.mxu1 %v7170_v31  ;;  %v7180_v46 = vld [vmem:[#allocation46_spill] sm:$0xff]  ;;  %v7181_v31 = vld [vmem:[#allocation47_spill] sm:$0xff] }
 0x741   :  { %4585 = vmatprep.subr.bf16.mxu0 %v7171_v34  ;;  %4649 = vmatprep.subr.bf16.mxu1 %v7172_v56  ;;  %v7182_v34 = vld [vmem:[#allocation48_spill] sm:$0xff]  ;;  %v7183_v56 = vld [vmem:[#allocation49_spill] sm:$0xff] }
 0x744   :  { %4587 = vmatpush1.bf16.msra.mxu0 %v7173_v55  ;;  %4651 = vmatpush1.bf16.msra.mxu1 %v7174_v15  ;;  %v7184_v55 = vld [vmem:[#allocation50_spill] sm:$0xff]  ;;  %v7185_v15 = vld [vmem:[#allocation51_spill] sm:$0xff] }
 0x745   :  { %4589 = vmatprep.subr.bf16.mxu0 %v7175_v12  ;;  %4653 = vmatprep.subr.bf16.mxu1 %v7176_v11  ;;  %v7186_v12 = vld [vmem:[#allocation52_spill] sm:$0xff]  ;;  %v7187_v11 = vld [vmem:[#allocation53_spill] sm:$0xff] }
 0x748   :  { %4591 = vmatpush1.bf16.msra.mxu0 %v7177_v33  ;;  %4655 = vmatpush1.bf16.msra.mxu1 %v7178_v62  ;;  %v7188_v33 = vld [vmem:[#allocation54_spill] sm:$0xff]  ;;  %v7189_v62 = vld [vmem:[#allocation55_spill] sm:$0xff] }
 0x749   :  { %4593 = vmatprep.subr.bf16.mxu0 %v7179_v13  ;;  %4657 = vmatprep.subr.bf16.mxu1 %v7180_v46  ;;  %v7190_v13 = vld [vmem:[#allocation56_spill] sm:$0xff]  ;;  %v7191_v46 = vld [vmem:[#allocation57_spill] sm:$0xff] }
 0x74c   :  { %4595 = vmatpush1.bf16.msra.mxu0 %v7181_v31  ;;  %4659 = vmatpush1.bf16.msra.mxu1 %v7182_v34  ;;  %v7192_v31 = vld [vmem:[#allocation58_spill] sm:$0xff]  ;;  %v7193_v34 = vld [vmem:[#allocation59_spill] sm:$0xff] }
 0x74d   :  { %4597 = vmatprep.subr.bf16.mxu0 %v7183_v56  ;;  %4661 = vmatprep.subr.bf16.mxu1 %v7184_v55  ;;  %v7194_v56 = vld [vmem:[#allocation60_spill] sm:$0xff]  ;;  %v7195_v55 = vld [vmem:[#allocation61_spill] sm:$0xff] }
 0x750   :  { %4599 = vmatpush1.bf16.msra.mxu0 %v7185_v15  ;;  %4663 = vmatpush1.bf16.msra.mxu1 %v7186_v12  ;;  %v7196_v15 = vld [vmem:[#allocation62_spill] sm:$0xff]  ;;  %v7197_v12 = vld [vmem:[#allocation63_spill] sm:$0xff] }
 0x751   :  { %4601 = vmatprep.subr.bf16.mxu0 %v7187_v11  ;;  %4665 = vmatprep.subr.bf16.mxu1 %v7188_v33  ;;  %v7198_v11 = vld [vmem:[#allocation64_spill] sm:$0xff]  ;;  %v7199_v33 = vld [vmem:[#allocation65_spill] sm:$0xff] }
 0x754   :  { %4603 = vmatpush1.bf16.msra.mxu0 %v7189_v62  ;;  %4667 = vmatpush1.bf16.msra.mxu1 %v7190_v13  ;;  %v7200_v62 = vld [vmem:[#allocation66_spill] sm:$0xff]  ;;  %v7201_v13 = vld [vmem:[#allocation67_spill] sm:$0xff] }
 0x755   :  { %4605 = vmatprep.subr.bf16.mxu0 %v7191_v46  ;;  %4669 = vmatprep.subr.bf16.mxu1 %v7192_v31  ;;  %v7202_v46 = vld [vmem:[#allocation68_spill] sm:$0xff]  ;;  %v7203_v31 = vld [vmem:[#allocation69_spill] sm:$0xff] }
 0x758   :  { %4607 = vmatpush1.bf16.msra.mxu0 %v7193_v34  ;;  %4671 = vmatpush1.bf16.msra.mxu1 %v7194_v56  ;;  %v7204_v34 = vld [vmem:[#allocation70_spill] sm:$0xff]  ;;  %v7205_v56 = vld [vmem:[#allocation71_spill] sm:$0xff] }
 0x759   :  { %4609 = vmatprep.subr.bf16.mxu0 %v7195_v55  ;;  %4673 = vmatprep.subr.bf16.mxu1 %v7196_v15  ;;  %v7206_v55 = vld [vmem:[#allocation72_spill] sm:$0xff] }
 0x75a   :  { %v7207_v15 = vld [vmem:[#allocation12_spill] sm:$0xff] }
 0x75c   :  { %4611 = vmatpush1.bf16.msra.mxu0 %v7197_v12  ;;  %4675 = vmatpush1.bf16.msra.mxu1 %v7198_v11  ;;  %v7208_v12 = vld [vmem:[#allocation13_spill] sm:$0xff] }
 0x75d   :  { %4613 = vmatprep.subr.bf16.mxu0 %v7199_v33  ;;  %4677 = vmatprep.subr.bf16.mxu1 %v7200_v62 }
 0x760   :  { %4615 = vmatpush1.bf16.msra.mxu0 %v7201_v13  ;;  %4679 = vmatpush1.bf16.msra.mxu1 %v7202_v46 }
 0x761   :  { %4617 = vmatprep.subr.bf16.mxu0 %v7203_v31  ;;  %4681 = vmatprep.subr.bf16.mxu1 %v7204_v34  ;;  %v7211_v34 = vld [vmem:[#allocation77_spill] sm:$0xff] }
 0x764   :  { %4619 = vmatpush1.bf16.msra.mxu0 %v7205_v56  ;;  %4683 = vmatpush1.bf16.msra.mxu1 %v7206_v55  ;;  %v7212_v55 = vld [vmem:[#allocation81_spill] sm:$0xff] }
 0x765   :  { %4685 = vmatprep.subr.bf16.mxu0 %v7207_v15  ;;  %4717 = vmatprep.subr.bf16.mxu1 %v7208_v12 }
 0x7da   :  { %v2374_v11 = vpop.f32.mrb[22].mxu0  ;;  %v2445_v33 = vpop.f32.mrb[22].mxu1 }
 0x7db   :  { %v2375_v62 = vadd.f32 %v2374_v11, %v7209_v61  ;;  %v2376_v9 = vpop.f32.mrb[23].mxu0  ;;  %v2447_v13 = vpop.f32.mrb[23].mxu1  ;;  %v2446_v35 = vadd.f32 %v2445_v33, %v7212_v55 }
 0x7dc   :  { %v2377_v46 = vadd.f32 %v2376_v9, %v7210_v43  ;;  %v2448_v56 = vadd.f32 %v2447_v13, %v7211_v34  ;;  %v324_v11 = vpop.permute.xlu0 %323 }
 0x7dd   :  { %v3272_v25 = vmul.f32 -1.442695, %v2375_v62  ;;  %v7213_v62 = vld [vmem:[#allocation75_spill] sm:$0xff]  ;;  %v379_v6 = vmul.f32 %v6879_v26, %v324_v11 }
 0x7de   :  { %v3273_v31 = vmul.f32 -1.442695, %v2377_v46  ;;  %v3274_v7 = vmul.f32 -1.442695, %v2448_v56  ;;  %v376_v46 = vmul.f32 %v7213_v62, %v324_v11 }
 0x7df   :  { %5090 = vpow2.f32 %v3272_v25 }
 0x7e0   :  { %5092 = vpow2.f32 %v3273_v31  ;;  %v7214_v31 = vld [vmem:[#allocation76_spill] sm:$0xff] }
 0x7e1   :  { %5094 = vpow2.f32 %v3274_v7  ;;  %v377_v43 = vmul.f32 %v7214_v31, %v324_v11 }
 0x7e2   :  { %5096 = vtanh.f32 %v2446_v35 }
 0x7e9   :  { %v5091_v15 = vpop.eup %5090 }
 0x7ea   :  { %v5093_v63 = vpop.eup %5092  ;;  %v2453_v12 = vadd.f32 1.0, %v5091_v15  ;;  %v429_v15 = vadd.f32 %v6877_v30, %v376_v46  ;;  %v378_v46 = vmul.f32 %v5710_v51, %v324_v11 }
 0x7eb   :  { %v2459_v50 = vadd.f32 1.0, %v5093_v63  ;;  %v5095_v61 = vpop.eup %5094  ;;  %v430_v63 = vadd.f32 %v6946_v49, %v377_v43 }
 0x7ec   :  { %5098 = vrcp.f32 %v2453_v12  ;;  %v5097_v9 = vpop.eup %5096  ;;  %v2466_v34 = vadd.f32 1.0, %v5095_v61 }
 0x7ed   :  { %5100 = vrcp.f32 %v2459_v50 }
 0x7ee   :  { %5102 = vrcp.f32 %v2466_v34  ;;  %v431_v34 = vadd.f32 %v5715_v0, %v378_v46 }
 0x7f6   :  { %v5099_v25 = vpop.eup %5098 }
 0x7f7   :  { %v5101_v13 = vpop.eup %5100  ;;  %v2470_v56 = vmul.f32 %v5099_v25, %v5097_v9 }
 0x7f8   :  { %v2469_v33 = vmul.f32 %v5101_v13, %v6326_v44  ;;  %v432_v44 = vadd.f32 %v5707_v37, %v379_v6  ;;  %v5103_v25 = vpop.eup %5102 }
 0x7fa   :  { %v2540_v7 = vpop.f32.mrb[24].mxu0  ;;  %v2611_v35 = vpop.f32.mrb[24].mxu1  ;;  %v6444_v50 = vadd.f32 %v2470_v56, %v2469_v33 }
 0x7fb   :  { %v2616_v12 = vadd.f32 %v2540_v7, %v429_v15  ;;  %v2542_v55 = vpop.f32.mrb[25].mxu0  ;;  %v2613_v62 = vpop.f32.mrb[25].mxu1  ;;  %v2618_v33 = vadd.f32 %v2611_v35, %v431_v34  ;;  %v7251_v34 = vld [vmem:[#allocation50_spill] sm:$0xff] }
 0x7fc   :  { %v2617_v31 = vadd.f32 %v2542_v55, %v430_v63  ;;  %5104 = vtanh.f32 %v6444_v50  ;;  %v2619_v43 = vadd.f32 %v2613_v62, %v432_v44 }
 0x7fd   :  { %v3275_v61 = vmul.f32 -1.442695, %v2616_v12 }
 0x7fe   :  { %v3276_v9 = vmul.f32 -1.442695, %v2617_v31  ;;  %v3277_v56 = vmul.f32 -1.442695, %v2619_v43 }
 0x7ff   :  { %5106 = vpow2.f32 %v3275_v61 }
 0x800   :  { %5108 = vpow2.f32 %v3276_v9 }
 0x801   :  { %5110 = vpow2.f32 %v3277_v56  ;;  %v7253_v56 = vld [vmem:[#allocation52_spill] sm:$0xff] }
 0x802   :  { %5112 = vtanh.f32 %v2618_v33  ;;  %v7254_v33 = vld [vmem:[#allocation53_spill] sm:$0xff] }
 0x806   :  { %v5105_v13 = vpop.eup %5104 }
 0x807   :  { %v2473_v15 = vmul.f32 %v5105_v13, %v5103_v25  ;;  %v7252_v13 = vld [vmem:[#allocation51_spill] sm:$0xff] }
 0x809   :  { %v5107_v7 = vpop.eup %5106  ;;  %2708 = vmatprep.mubr.f32.mxu0 %v2473_v15  ;;  %2779 = vmatprep.mubr.f32.mxu1 %v2473_v15  ;;  %v7255_v15 = vld [vmem:[#allocation54_spill] sm:$0xff] }
 0x80a   :  { %v5109_v55 = vpop.eup %5108  ;;  %v2623_v63 = vadd.f32 1.0, %v5107_v7  ;;  %v7256_v7 = vld [vmem:[#allocation55_spill] sm:$0xff] }
 0x80b   :  { %v2629_v31 = vadd.f32 1.0, %v5109_v55  ;;  %v5111_v6 = vpop.eup %5110  ;;  %v7257_v55 = vld [vmem:[#allocation56_spill] sm:$0xff] }
 0x80c   :  { %5114 = vrcp.f32 %v2623_v63  ;;  %v5113_v11 = vpop.eup %5112  ;;  %v2636_v9 = vadd.f32 1.0, %v5111_v6  ;;  %v7258_v63 = vld [vmem:[#allocation57_spill] sm:$0xff]  ;;  %v7260_v6 = vld [vmem:[#allocation59_spill] sm:$0xff] }
 0x80d   :  { %5116 = vrcp.f32 %v2629_v31  ;;  %v7259_v31 = vld [vmem:[#allocation58_spill] sm:$0xff] }
 0x80e   :  { %5118 = vrcp.f32 %v2636_v9  ;;  %v7265_v9 = vld [vmem:[#allocation64_spill] sm:$0xff] }
 0x816   :  { %v5115_v62 = vpop.eup %5114 }
 0x817   :  { %v5117_v12 = vpop.eup %5116  ;;  %v2640_v61 = vmul.f32 %v5115_v62, %v5113_v11  ;;  %v7261_v11 = vld [vmem:[#allocation60_spill] sm:$0xff]  ;;  %v7262_v62 = vld [vmem:[#allocation61_spill] sm:$0xff] }
 0x818   :  { %v2639_v44 = vmul.f32 %v5117_v12, %v6334_v48  ;;  %v5119_v46 = vpop.eup %5118  ;;  %v7250_v48 = vld [vmem:[#allocation49_spill] sm:$0xff]  ;;  %v7263_v12 = vld [vmem:[#allocation62_spill] sm:$0xff] }
 0x81a   :  { %v6452_v35 = vadd.f32 %v2640_v61, %v2639_v44  ;;  %v7264_v61 = vld [vmem:[#allocation63_spill] sm:$0xff]  ;;  %v7266_v44 = vld [vmem:[#allocation65_spill] sm:$0xff] }
 0x81c   :  { %5120 = vtanh.f32 %v6452_v35 }
 0x826   :  { %v5121_v43 = vpop.eup %5120 }
 0x827   :  { %v2643_v25 = vmul.f32 %v5121_v43, %v5119_v46  ;;  %v7267_v46 = vld [vmem:[#allocation66_spill] sm:$0xff]  ;;  %v7268_v43 = vld [vmem:[#allocation67_spill] sm:$0xff] }
 0x829   :  { %2709 = vmatmul.mubr.f32.vlgmr.msra.gmra.mrb[26].mxu0 %v2643_v25  ;;  %2780 = vmatmul.mubr.f32.vlgmr.msra.gmra.mrb[26].mxu1 %v2643_v25 }
 0x82a   :  { %4687 = vmatpush1.bf16.msra.mxu0 %v5370_v10  ;;  %4719 = vmatpush1.bf16.msra.mxu1 %v5373_v14  ;;  %v7215_v10 = vld [vmem:[#allocation14_spill] sm:$0xff]  ;;  %v7216_v14 = vld [vmem:[#allocation15_spill] sm:$0xff] }
 0x82b   :  { %4689 = vmatprep.subr.bf16.mxu0 %v5377_v18  ;;  %4721 = vmatprep.subr.bf16.mxu1 %v5379_v19  ;;  %v7217_v18 = vld [vmem:[#allocation16_spill] sm:$0xff]  ;;  %v7218_v19 = vld [vmem:[#allocation17_spill] sm:$0xff] }
 0x82c   :  { %2874 = vmatprep.mubr.f32.mxu0 %v6812_v5  ;;  %2945 = vmatprep.mubr.f32.mxu1 %v6812_v5 }
 0x82e   :  { %4691 = vmatpush1.bf16.msra.mxu0 %v5382_v23  ;;  %4723 = vmatpush1.bf16.msra.mxu1 %v5386_v27  ;;  %v7219_v23 = vld [vmem:[#allocation18_spill] sm:$0xff]  ;;  %v7220_v27 = vld [vmem:[#allocation19_spill] sm:$0xff] }
 0x82f   :  { %4693 = vmatprep.subr.bf16.mxu0 %v5388_v28  ;;  %4725 = vmatprep.subr.bf16.mxu1 %v5390_v32  ;;  %v7221_v28 = vld [vmem:[#allocation20_spill] sm:$0xff]  ;;  %v7222_v32 = vld [vmem:[#allocation21_spill] sm:$0xff] }
 0x832   :  { %4695 = vmatpush1.bf16.msra.mxu0 %v5393_v36  ;;  %4727 = vmatpush1.bf16.msra.mxu1 %v5397_v40  ;;  %v7223_v36 = vld [vmem:[#allocation22_spill] sm:$0xff]  ;;  %v7224_v40 = vld [vmem:[#allocation23_spill] sm:$0xff] }
 0x833   :  { %4697 = vmatprep.subr.bf16.mxu0 %v5399_v41  ;;  %4729 = vmatprep.subr.bf16.mxu1 %v5402_v45  ;;  %v7225_v41 = vld [vmem:[#allocation24_spill] sm:$0xff]  ;;  %v7226_v45 = vld [vmem:[#allocation25_spill] sm:$0xff] }
 0x836   :  { %4699 = vmatpush1.bf16.msra.mxu0 %v5405_v52  ;;  %4731 = vmatpush1.bf16.msra.mxu1 %v5409_v53  ;;  %v7227_v52 = vld [vmem:[#allocation26_spill] sm:$0xff]  ;;  %v7228_v53 = vld [vmem:[#allocation27_spill] sm:$0xff] }
 0x837   :  { %4701 = vmatprep.subr.bf16.mxu0 %v5411_v54  ;;  %4733 = vmatprep.subr.bf16.mxu1 %v5414_v58  ;;  %v7229_v54 = vld [vmem:[#allocation28_spill] sm:$0xff]  ;;  %v7230_v58 = vld [vmem:[#allocation29_spill] sm:$0xff] }
 0x83a   :  { %4703 = vmatpush1.bf16.msra.mxu0 %v5417_v1  ;;  %4735 = vmatpush1.bf16.msra.mxu1 %v5421_v2  ;;  %v7231_v1 = vld [vmem:[#allocation30_spill] sm:$0xff]  ;;  %v7232_v2 = vld [vmem:[#allocation31_spill] sm:$0xff] }
 0x83b   :  { %4705 = vmatprep.subr.bf16.mxu0 %v5423_v3  ;;  %4737 = vmatprep.subr.bf16.mxu1 %v5426_v8  ;;  %v7233_v3 = vld [vmem:[#allocation32_spill] sm:$0xff]  ;;  %v7234_v8 = vld [vmem:[#allocation33_spill] sm:$0xff] }
 0x83e   :  { %4707 = vmatpush1.bf16.msra.mxu0 %v5429_v17  ;;  %4739 = vmatpush1.bf16.msra.mxu1 %v5433_v21  ;;  %v7235_v17 = vld [vmem:[#allocation34_spill] sm:$0xff]  ;;  %v7236_v21 = vld [vmem:[#allocation35_spill] sm:$0xff] }
 0x83f   :  { %4709 = vmatprep.subr.bf16.mxu0 %v5435_v22  ;;  %4741 = vmatprep.subr.bf16.mxu1 %v5441_v29  ;;  %v7237_v22 = vld [vmem:[#allocation36_spill] sm:$0xff]  ;;  %v7238_v29 = vld [vmem:[#allocation37_spill] sm:$0xff] }
 0x842   :  { %4711 = vmatpush1.bf16.msra.mxu0 %v5447_v38  ;;  %4743 = vmatpush1.bf16.msra.mxu1 %v5451_v39  ;;  %v7239_v38 = vld [vmem:[#allocation38_spill] sm:$0xff]  ;;  %v7240_v39 = vld [vmem:[#allocation39_spill] sm:$0xff] }
 0x843   :  { %4713 = vmatprep.subr.bf16.mxu0 %v5453_v42  ;;  %4745 = vmatprep.subr.bf16.mxu1 %v5456_v47  ;;  %v7241_v42 = vld [vmem:[#allocation40_spill] sm:$0xff]  ;;  %v7242_v47 = vld [vmem:[#allocation41_spill] sm:$0xff] }
 0x846   :  { %4715 = vmatpush1.bf16.msra.mxu0 %v5462_v57  ;;  %4747 = vmatpush1.bf16.msra.mxu1 %v5466_v59  ;;  %v7243_v57 = vld [vmem:[#allocation42_spill] sm:$0xff]  ;;  %v7244_v59 = vld [vmem:[#allocation43_spill] sm:$0xff] }
 0x847   :  { %4749 = vmatprep.subr.bf16.mxu0 %v5468_v60  ;;  %4813 = vmatprep.subr.bf16.mxu1 %v5471_v4  ;;  %v7245_v60 = vld [vmem:[#allocation44_spill] sm:$0xff]  ;;  %v7246_v4 = vld [vmem:[#allocation45_spill] sm:$0xff] }
 0x849   :  { %2875 = vmatmul.mubr.f32.vlgmr.msra.gmra.mrb[28].mxu0 %v2643_v25  ;;  %2946 = vmatmul.mubr.f32.vlgmr.msra.gmra.mrb[28].mxu1 %v2643_v25  ;;  %v7269_v25 = vld [vmem:[#allocation68_spill] sm:$0xff] }
 0x84a   :  { %4751 = vmatpush1.bf16.msra.mxu0 %v5477_v16  ;;  %4815 = vmatpush1.bf16.msra.mxu1 %v5481_v20  ;;  %v7247_v16 = vld [vmem:[#allocation46_spill] sm:$0xff]  ;;  %v7248_v20 = vld [vmem:[#allocation47_spill] sm:$0xff] }
 0x84b   :  { %4753 = vmatprep.subr.bf16.mxu0 %v5483_v24  ;;  %4817 = vmatprep.subr.bf16.mxu1 %v7215_v10  ;;  %v7249_v24 = vld [vmem:[#allocation48_spill] sm:$0xff]  ;;  %v7270_v10 = vld [vmem:[#allocation69_spill] sm:$0xff] }
 0x84e   :  { %4755 = vmatpush1.bf16.msra.mxu0 %v7216_v14  ;;  %4819 = vmatpush1.bf16.msra.mxu1 %v7217_v18  ;;  %v7271_v14 = vld [vmem:[#allocation70_spill] sm:$0xff]  ;;  %v7272_v18 = vld [vmem:[#allocation71_spill] sm:$0xff] }
 0x84f   :  { %4757 = vmatprep.subr.bf16.mxu0 %v7218_v19  ;;  %4821 = vmatprep.subr.bf16.mxu1 %v7219_v23  ;;  %v7273_v19 = vld [vmem:[#allocation72_spill] sm:$0xff] }
 0x852   :  { %4759 = vmatpush1.bf16.msra.mxu0 %v7220_v27  ;;  %4823 = vmatpush1.bf16.msra.mxu1 %v7221_v28  ;;  %v7274_v28 = vld [vmem:[#allocation73_spill] sm:$0xff] }
 0x853   :  { %4761 = vmatprep.subr.bf16.mxu0 %v7222_v32  ;;  %4825 = vmatprep.subr.bf16.mxu1 %v7223_v36 }
 0x856   :  { %4763 = vmatpush1.bf16.msra.mxu0 %v7224_v40  ;;  %4827 = vmatpush1.bf16.msra.mxu1 %v7225_v41  ;;  %v7275_v41 = vld [vmem:[#allocation74_spill] sm:$0xff] }
 0x857   :  { %4765 = vmatprep.subr.bf16.mxu0 %v7226_v45  ;;  %4829 = vmatprep.subr.bf16.mxu1 %v7227_v52 }
 0x85a   :  { %4767 = vmatpush1.bf16.msra.mxu0 %v7228_v53  ;;  %4831 = vmatpush1.bf16.msra.mxu1 %v7229_v54  ;;  %v7276_v54 = vld [vmem:[#allocation77_spill] sm:$0xff] }
 0x85b   :  { %4769 = vmatprep.subr.bf16.mxu0 %v7230_v58  ;;  %4833 = vmatprep.subr.bf16.mxu1 %v7231_v1 }
 0x85e   :  { %4771 = vmatpush1.bf16.msra.mxu0 %v7232_v2  ;;  %4835 = vmatpush1.bf16.msra.mxu1 %v7233_v3  ;;  %v7277_v2 = vld [vmem:[#allocation81_spill] sm:$0xff] }
 0x85f   :  { %4773 = vmatprep.subr.bf16.mxu0 %v7234_v8  ;;  %4837 = vmatprep.subr.bf16.mxu1 %v7235_v17 }
 0x862   :  { %4775 = vmatpush1.bf16.msra.mxu0 %v7236_v21  ;;  %4839 = vmatpush1.bf16.msra.mxu1 %v7237_v22 }
 0x863   :  { %4777 = vmatprep.subr.bf16.mxu0 %v7238_v29  ;;  %4841 = vmatprep.subr.bf16.mxu1 %v7239_v38  ;;  %v329_v29 = vpop.permute.xlu1 %328 }
 0x866   :  { %4779 = vmatpush1.bf16.msra.mxu0 %v7240_v39  ;;  %4843 = vmatpush1.bf16.msra.mxu1 %v7241_v42  ;;  %v7278_v42 = vld [vmem:[#allocation75_spill] sm:$0xff] }
 0x867   :  { %4781 = vmatprep.subr.bf16.mxu0 %v7242_v47  ;;  %4845 = vmatprep.subr.bf16.mxu1 %v7243_v57  ;;  %v380_v47 = vmul.f32 %v7278_v42, %v329_v29  ;;  %v275_v42 = vld [vmem:[#allocation7 + $0x48] sm:$0xff] }
 0x86a   :  { %4783 = vmatpush1.bf16.msra.mxu0 %v7244_v59  ;;  %4847 = vmatpush1.bf16.msra.mxu1 %v7245_v60  ;;  %v7279_v59 = vld [vmem:[#allocation76_spill] sm:$0xff] }
 0x86b   :  { %4785 = vmatprep.subr.bf16.mxu0 %v7246_v4  ;;  %4849 = vmatprep.subr.bf16.mxu1 %v7247_v16  ;;  %v381_v60 = vmul.f32 %v7279_v59, %v329_v29  ;;  %v277_v59 = vld [vmem:[#allocation7 + $0x58] sm:$0xff] }
 0x86e   :  { %4787 = vmatpush1.bf16.msra.mxu0 %v7248_v20  ;;  %4851 = vmatpush1.bf16.msra.mxu1 %v7249_v24 }
 0x86f   :  { %4789 = vmatprep.subr.bf16.mxu0 %v7250_v48  ;;  %4853 = vmatprep.subr.bf16.mxu1 %v7251_v34  ;;  %v433_v48 = vadd.f32 %v6877_v30, %v380_v47 }
 0x872   :  { %4791 = vmatpush1.bf16.msra.mxu0 %v7252_v13  ;;  %4855 = vmatpush1.bf16.msra.mxu1 %v7253_v56  ;;  %v434_v56 = vadd.f32 %v6946_v49, %v381_v60  ;;  %v278_v60 = vld [vmem:[#allocation7 + $0x60] sm:$0xff] }
 0x873   :  { %4793 = vmatprep.subr.bf16.mxu0 %v7254_v33  ;;  %4857 = vmatprep.subr.bf16.mxu1 %v7255_v15 }
 0x876   :  { %4795 = vmatpush1.bf16.msra.mxu0 %v7256_v7  ;;  %4859 = vmatpush1.bf16.msra.mxu1 %v7257_v55 }
 0x877   :  { %4797 = vmatprep.subr.bf16.mxu0 %v7258_v63  ;;  %4861 = vmatprep.subr.bf16.mxu1 %v7259_v31  ;;  %v383_v63 = vmul.f32 %v6879_v26, %v329_v29 }
 0x879   :  { %v436_v30 = vadd.f32 %v5707_v37, %v383_v63 }
 0x87a   :  { %4799 = vmatpush1.bf16.msra.mxu0 %v7260_v6  ;;  %4863 = vmatpush1.bf16.msra.mxu1 %v7261_v11 }
 0x87b   :  { %4801 = vmatprep.subr.bf16.mxu0 %v7262_v62  ;;  %4865 = vmatprep.subr.bf16.mxu1 %v7263_v12 }
 0x87e   :  { %4803 = vmatpush1.bf16.msra.mxu0 %v7264_v61  ;;  %4867 = vmatpush1.bf16.msra.mxu1 %v7265_v9 }
 0x87f   :  { %4805 = vmatprep.subr.bf16.mxu0 %v7266_v44  ;;  %4869 = vmatprep.subr.bf16.mxu1 %v7267_v46 }
 0x882   :  { %4807 = vmatpush1.bf16.msra.mxu0 %v7268_v43  ;;  %4871 = vmatpush1.bf16.msra.mxu1 %v7269_v25 }
 0x883   :  { %4809 = vmatprep.subr.bf16.mxu0 %v7270_v10  ;;  %4873 = vmatprep.subr.bf16.mxu1 %v7271_v14 }
 0x886   :  { %4811 = vmatpush1.bf16.msra.mxu0 %v7272_v18  ;;  %4875 = vmatpush1.bf16.msra.mxu1 %v7273_v19 }
 0x8fc   :  { %v2710_v23 = vpop.f32.mrb[26].mxu0  ;;  %v2781_v27 = vpop.f32.mrb[26].mxu1 }
 0x8fd   :  { %v2711_v32 = vadd.f32 %v2710_v23, %v7274_v28  ;;  %v2712_v36 = vpop.f32.mrb[27].mxu0  ;;  %v2783_v40 = vpop.f32.mrb[27].mxu1  ;;  %v2782_v3 = vadd.f32 %v2781_v27, %v7277_v2 }
 0x8fe   :  { %v2713_v45 = vadd.f32 %v2712_v36, %v7275_v41  ;;  %v2784_v58 = vadd.f32 %v2783_v40, %v7276_v54 }
 0x8ff   :  { %v3278_v52 = vmul.f32 -1.442695, %v2711_v32 }
 0x900   :  { %v3279_v53 = vmul.f32 -1.442695, %v2713_v45  ;;  %v3280_v1 = vmul.f32 -1.442695, %v2784_v58  ;;  %v266_v45 = vld [vmem:[#allocation7] sm:$0xff]  ;;  %v5273_v58 = vmov 0.0|0.0  }
 0x901   :  { %5122 = vpow2.f32 %v3278_v52  ;;  %v267_v52 = vld [vmem:[#allocation7 + $0x8] sm:$0xff]  ;;  %4876 = vmatprep.subr.bf16.mxu0 %v5273_v58 }
 0x902   :  { %5124 = vpow2.f32 %v3279_v53  ;;  %v4877_v53 = vpack.c.bf16 %v267_v52, %v266_v45 }
 0x903   :  { %5126 = vpow2.f32 %v3280_v1  ;;  %v268_v1 = vld [vmem:[#allocation7 + $0x10] sm:$0xff] }
 0x904   :  { %5128 = vtanh.f32 %v2782_v3  ;;  %v269_v3 = vld [vmem:[#allocation7 + $0x18] sm:$0xff] }
 0x90b   :  { %v5123_v8 = vpop.eup %5122 }
 0x90c   :  { %v5125_v17 = vpop.eup %5124  ;;  %v2789_v21 = vadd.f32 1.0, %v5123_v8  ;;  %v4880_v8 = vpack.c.bf16 %v269_v3, %v268_v1 }
 0x90d   :  { %v2795_v22 = vadd.f32 1.0, %v5125_v17  ;;  %v5127_v38 = vpop.eup %5126  ;;  %v271_v17 = vld [vmem:[#allocation7 + $0x28] sm:$0xff] }
 0x90e   :  { %5130 = vrcp.f32 %v2789_v21  ;;  %v5129_v39 = vpop.eup %5128  ;;  %v2802_v20 = vadd.f32 1.0, %v5127_v38 }
 0x90f   :  { %5132 = vrcp.f32 %v2795_v22  ;;  %v272_v22 = vld [vmem:[#allocation7 + $0x30] sm:$0xff] }
 0x910   :  { %5134 = vrcp.f32 %v2802_v20 }
 0x918   :  { %v5131_v57 = vpop.eup %5130 }
 0x919   :  { %v5133_v4 = vpop.eup %5132  ;;  %v2806_v16 = vmul.f32 %v5131_v57, %v5129_v39  ;;  %v274_v39 = vld [vmem:[#allocation7 + $0x40] sm:$0xff]  ;;  %v276_v57 = vld [vmem:[#allocation7 + $0x50] sm:$0xff] }
 0x91a   :  { %v2805_v24 = vmul.f32 %v5133_v4, %v6444_v50  ;;  %v382_v50 = vmul.f32 %v5710_v51, %v329_v29  ;;  %v5135_v62 = vpop.eup %5134  ;;  %v273_v29 = vld [vmem:[#allocation7 + $0x38] sm:$0xff]  ;;  %v4889_v47 = vpack.c.bf16 %v275_v42, %v274_v39  ;;  %v4892_v4 = vpack.c.bf16 %v277_v59, %v276_v57 }
 0x91b   :  { %v4886_v38 = vpack.c.bf16 %v273_v29, %v272_v22 }
 0x91c   :  { %v2876_v34 = vpop.f32.mrb[28].mxu0  ;;  %v2947_v13 = vpop.f32.mrb[28].mxu1  ;;  %v6560_v33 = vadd.f32 %v2806_v16, %v2805_v24  ;;  %v435_v12 = vadd.f32 %v5715_v0, %v382_v50  ;;  %v279_v16 = vld [vmem:[#allocation7 + $0x68] sm:$0xff]  ;;  %v280_v24 = vld [vmem:[#allocation7 + $0x70] sm:$0xff] }
 0x91d   :  { %v2952_v15 = vadd.f32 %v2876_v34, %v433_v48  ;;  %v2878_v7 = vpop.f32.mrb[29].mxu0  ;;  %v2949_v55 = vpop.f32.mrb[29].mxu1  ;;  %v4895_v20 = vpack.c.bf16 %v279_v16, %v278_v60  ;;  %v281_v48 = vld [vmem:[#allocation7 + $0x78] sm:$0xff] }
 0x91e   :  { %v2953_v31 = vadd.f32 %v2878_v7, %v434_v56  ;;  %5136 = vtanh.f32 %v6560_v33  ;;  %v2955_v49 = vadd.f32 %v2949_v55, %v436_v30  ;;  %v2954_v44 = vadd.f32 %v2947_v13, %v435_v12 }
 0x91f   :  { %v3281_v6 = vmul.f32 -1.442695, %v2952_v15  ;;  %v4898_v34 = vpack.c.bf16 %v281_v48, %v280_v24 }
 0x920   :  { %v3282_v11 = vmul.f32 -1.442695, %v2953_v31  ;;  %v3283_v9 = vmul.f32 -1.442695, %v2955_v49 }
 0x921   :  { %5138 = vpow2.f32 %v3281_v6 }
 0x922   :  { %5140 = vpow2.f32 %v3282_v11 }
 0x923   :  { %5142 = vpow2.f32 %v3283_v9 }
 0x924   :  { %5144 = vtanh.f32 %v2954_v44 }
 0x928   :  { %v5137_v61 = vpop.eup %5136 }
 0x929   :  { %v2809_v46 = vmul.f32 %v5137_v61, %v5135_v62 }
 0x92b   :  { %v5139_v26 = vpop.eup %5138  ;;  %3044 = vmatprep.mubr.f32.mxu0 %v2809_v46  ;;  %3115 = vmatprep.mubr.f32.mxu1 %v2809_v46 }
 0x92c   :  { %v5141_v43 = vpop.eup %5140  ;;  %v2959_v25 = vadd.f32 1.0, %v5139_v26 }
 0x92d   :  { %v2965_v10 = vadd.f32 1.0, %v5141_v43  ;;  %v5143_v37 = vpop.eup %5142 }
 0x92e   :  { %5146 = vrcp.f32 %v2959_v25  ;;  %v5145_v51 = vpop.eup %5144  ;;  %v2972_v0 = vadd.f32 1.0, %v5143_v37 }
 0x92f   :  { %5148 = vrcp.f32 %v2965_v10  ;;  %v3287_v10 = vld [vmem:[%s6596_s7] ss:$0 sm:$0xff] }
 0x930   :  { %5150 = vrcp.f32 %v2972_v0 }
 0x938   :  { %v5147_v14 = vpop.eup %5146 }
 0x939   :  { %v5149_v18 = vpop.eup %5148  ;;  %v2976_v19 = vmul.f32 %v5147_v14, %v5145_v51 }
 0x93a   :  { %v2975_v23 = vmul.f32 %v5149_v18, %v6452_v35  ;;  %v5151_v32 = vpop.eup %5150  ;;  %v270_v35 = vld [vmem:[#allocation7 + $0x20] sm:$0xff] }
 0x93b   :  { %v4883_v21 = vpack.c.bf16 %v271_v17, %v270_v35 }
 0x93c   :  { %v2977_v27 = vadd.f32 %v2976_v19, %v2975_v23 }
 0x93e   :  { %5152 = vtanh.f32 %v2977_v27 }
 0x948   :  { %v5153_v36 = vpop.eup %5152 }
 0x949   :  { %v2979_v40 = vmul.f32 %v5153_v36, %v5151_v32 }
 0x94b   :  { %3045 = vmatmul.mubr.f32.vlgmr.msra.gmra.mrb[30].mxu0 %v2979_v40  ;;  %3116 = vmatmul.mubr.f32.vlgmr.msra.gmra.mrb[30].mxu1 %v2979_v40 }
 0x94c   :  { %4878 = vmatpush3.bf16.msra.mxu0 %v4877_v53  ;;  %3337 = vmatprep.mubr.msk.f32.mxu0 %vm5274_vm0, %v6812_v5 }
 0x94d   :  { %4879 = vmatprep.subr.bf16.mxu0 %v5273_v58 }
 0x950   :  { %4881 = vmatpush3.bf16.msra.mxu0 %v4880_v8 }
 0x951   :  { %4882 = vmatprep.subr.bf16.mxu0 %v5273_v58 }
 0x954   :  { %4884 = vmatpush3.bf16.msra.mxu0 %v4883_v21 }
 0x955   :  { %4885 = vmatprep.subr.bf16.mxu0 %v5273_v58 }
 0x958   :  { %4887 = vmatpush3.bf16.msra.mxu0 %v4886_v38 }
 0x959   :  { %4888 = vmatprep.subr.bf16.mxu0 %v5273_v58 }
 0x95c   :  { %4890 = vmatpush3.bf16.msra.mxu0 %v4889_v47 }
 0x95d   :  { %4891 = vmatprep.subr.bf16.mxu0 %v5273_v58 }
 0x960   :  { %4893 = vmatpush3.bf16.msra.mxu0 %v4892_v4 }
 0x961   :  { %4894 = vmatprep.subr.bf16.mxu0 %v5273_v58 }
 0x964   :  { %4896 = vmatpush3.bf16.msra.mxu0 %v4895_v20 }
 0x965   :  { %4897 = vmatprep.subr.bf16.mxu0 %v5273_v58 }
 0x968   :  { %4899 = vmatpush3.bf16.msra.mxu0 %v4898_v34 }
 0xa1e   :  { %v3046_v13 = vpop.f32.mrb[30].mxu0  ;;  %v3117_v56 = vpop.f32.mrb[30].mxu1 }
 0xa1f   :  { %v3047_v15 = vadd.f32 %v3046_v13, %v7274_v28  ;;  %v3048_v7 = vpop.f32.mrb[31].mxu0  ;;  %v3119_v55 = vpop.f32.mrb[31].mxu1  ;;  %v3118_v30 = vadd.f32 %v3117_v56, %v7277_v2 }
 0xa20   :  { %v3049_v63 = vadd.f32 %v3048_v7, %v7275_v41  ;;  %v3120_v5 = vadd.f32 %v3119_v55, %v7276_v54 }
 0xa21   :  { %v3284_v31 = vmul.f32 -1.442695, %v3047_v15 }
 0xa22   :  { %v3285_v6 = vmul.f32 -1.442695, %v3049_v63  ;;  %v3286_v11 = vmul.f32 -1.442695, %v3120_v5 }
 0xa23   :  { %5154 = vpow2.f32 %v3284_v31 }
 0xa24   :  { %5156 = vpow2.f32 %v3285_v6 }
 0xa25   :  { %5158 = vpow2.f32 %v3286_v11 }
 0xa26   :  { %5160 = vtanh.f32 %v3118_v30 }
 0xa2d   :  { %v5155_v50 = vpop.eup %5154 }
 0xa2e   :  { %v5157_v49 = vpop.eup %5156  ;;  %v3125_v62 = vadd.f32 1.0, %v5155_v50 }
 0xa2f   :  { %v3131_v12 = vadd.f32 1.0, %v5157_v49  ;;  %v5159_v28 = vpop.eup %5158 }
 0xa30   :  { %5162 = vrcp.f32 %v3125_v62  ;;  %v5161_v61 = vpop.eup %5160  ;;  %v3138_v46 = vadd.f32 1.0, %v5159_v28 }
 0xa31   :  { %5164 = vrcp.f32 %v3131_v12 }
 0xa32   :  { %5166 = vrcp.f32 %v3138_v46 }
 0xa3a   :  { %v5163_v41 = vpop.eup %5162 }
 0xa3b   :  { %v5165_v9 = vpop.eup %5164  ;;  %v3142_v44 = vmul.f32 %v5163_v41, %v5161_v61 }
 0xa3c   :  { %v3141_v26 = vmul.f32 %v5165_v9, %v6560_v33  ;;  %v5167_v2 = vpop.eup %5166 }
 0xa3e   :  { %v3143_v54 = vadd.f32 %v3142_v44, %v3141_v26 }
 0xa40   :  { %5168 = vtanh.f32 %v3143_v54 }
 0xa4a   :  { %v5169_v43 = vpop.eup %5168 }
 0xa4b   :  { %v3145_v25 = vmul.f32 %v5169_v43, %v5167_v2 }
 0xa4d   :  { %3338 = vmatmul.mubr.f32.vlgmr.msra.gmra.mrb[32].mxu0 %v3145_v25 }
 0xb20   :  { %v3218_v37 = vpop.f32.mrb[32].mxu0 }
 0xb21   :  { %v3219_v51 = vadd.f32 %v3287_v10, %v3218_v37  ;;  %v3339_v14 = vpop.f32.mrb[33].mxu0 }
 0xb23   :  { %3222 = vst [vmem:[#allocation8] sm:$0xff] %v3219_v51 }
 0xb24   :  { %5247 = shalt.err (!%p5244_p0)
}
 0xb25   :  { %s5248_s6 = scalar_lea.hbm %s6597_s8, 128 }
 0xb26   :  { %p5249_p1 = scmp.ne.s32.totalorder %s6597_s8, %s5248_s6  ;;  %p5252_p2 = scmp.lt.u32.totalorder %s5248_s6, %s6597_s8 }
 0xb28   :  { %p5254_p3 = pnand %p5252_p2, %p5249_p1 }
 0xb2a   :  { %5257 = shalt.err (!%p5254_p3)
}
 0xb2b   :  { %3232 = dma.vmem_to_hbm [thread:$0]  %s3230_s2, 128, %s6597_s8, [#allocation4]  }
 0xb2c   :  { %5262 = dma.done.wait [#allocation4], 128  }
 0xb2d   :  { %5263 = vsyncadd [#allocation4], 4294967168 }
 0xb2e   :  { %3236 = vsyncpa [#allocation3], 1 }
 0xb2f   :  { %3237 = vsyncpa [#allocation6], 1 }
 0xb30   :  { %3238 = vsyncpa [#allocation4], 1 }

</bundles_post_ra>
